<compile_context>
chip_gen: v7x
topology: tpu7x:2x2x1
jax: 0.10.0
libtpu: 0.0.40
codegen_flags: <defaults>
</compile_context>

<pallas_src>
import math

import jax
import jax.numpy as jnp
from jax.experimental import pallas as pl
from jax.experimental.pallas import tpu as pltpu

KERNEL_NUM = 21
SIGMA = 0.1
EXACT_SIGMA = 0.001
FEAT_PAD = 128        # lane-dense output / pooling slab width (one full vreg lane width)
RESEED_EVERY = 5      # re-seed the exp recurrence every N kernels (bounds rounding drift)
MASK_NEG = -100.0     # m value for padded doc columns -> every Gaussian underflows to 0


def _gaussian_params(kernel_num=KERNEL_NUM, sigma=SIGMA, exact_sigma=EXACT_SIGMA):
    mus, sigmas = [], []
    for i in range(kernel_num):
        mu = 1.0 / (kernel_num - 1) + 2.0 * i / (kernel_num - 1) - 1.0
        s = sigma
        if mu > 1.0:
            s = exact_sigma
            mu = 1.0
        mus.append(float(mu))
        sigmas.append(float(s))
    return mus, sigmas


MUS, SIGMAS = _gaussian_params()
_C = 0.5 / (SIGMA * SIGMA)                         # 50.0 for the shared-sigma kernels 0..19
_C_EXACT = 0.5 / (EXACT_SIGMA * EXACT_SIGMA)       # exact-match kernel
_DELTA = MUS[1] - MUS[0]                           # uniform mu spacing (0.1)
# exp(-C(m-mu_k)^2) = exp(-C(m-mu_{k-1})^2) * exp(2*C*DELTA*m) * RATIO[k]
_RATIO = [0.0] + [math.exp(-_C * (MUS[k] ** 2 - MUS[k - 1] ** 2))
                  for k in range(1, KERNEL_NUM - 1)]


def _make_knrm_kernel(valid_ld: int, padded_ld: int):
    """Kernel closed over the static document-length / padding constants."""

    def kernel(q_ref, d_ref, feat_ref):
        # q_ref:   (TB, Lq,  D)  f32 L2-normalized query embeddings
        # d_ref:   (TB, Ldp, D)  f32 L2-normalized doc embeddings (rows >= valid_ld are zero)
        # feat_ref:(TB, FEAT_PAD) f32; lanes [0, KERNEL_NUM) hold the pooled features
        qn = q_ref[...]
        dn = d_ref[...]
        tb, lq, _ = qn.shape

        # ---- matching matrices on the MXU; last dim (doc axis) is lane-dense ----
        m = jnp.einsum("bqd,bkd->bqk", qn, dn, preferred_element_type=jnp.float32)

        # Padded doc columns give m == 0, which would still contribute exp(-C*mu^2);
        # push them to MASK_NEG so every Gaussian (seed, t, exact kernel) is exactly 0.
        if padded_ld != valid_ld:
            dcol = jax.lax.broadcasted_iota(jnp.int32, (1, 1, padded_ld), 2)
            m = jnp.where(dcol < valid_ld, m, MASK_NEG)

        # ---- Gaussian kernel pooling with a shared-sigma exp recurrence ----
        t = jnp.exp((2.0 * _C * _DELTA) * m)                    # one EUP pass

        lane = jax.lax.broadcasted_iota(jnp.int32, (1, 1, FEAT_PAD), 2)
        S = jnp.zeros((tb, lq, FEAT_PAD), jnp.float32)          # column k <- sum_d kexp_k

        kexp = None
        for k in range(KERNEL_NUM - 1):                         # the 20 sigma=0.1 kernels
            if k % RESEED_EVERY == 0:
                kexp = jnp.exp(-_C * (m - MUS[k]) ** 2)         # re-seed (limits drift/underflow)
            else:
                kexp = (kexp * t) * _RATIO[k]                   # 2 vmuls instead of 1 exp
            s_doc = jnp.sum(kexp, axis=-1, keepdims=True)       # (TB, Lq, 1) doc-sum
            S = S + jnp.where(lane == k, s_doc, 0.0)            # place into lane k

        # exact-match kernel (mu=1, sigma=0.001) stays a direct f32 exp
        k = KERNEL_NUM - 1
        kexp = jnp.exp(-_C_EXACT * (m - MUS[k]) ** 2)
        s_doc = jnp.sum(kexp, axis=-1, keepdims=True)
        S = S + jnp.where(lane == k, s_doc, 0.0)

        # single log1p on the lane-dense slab (pad lanes stay exactly 0), one Lq
        # reduction (second-minor dim), one unmasked lane-dense store.
        feat_ref[...] = jnp.sum(jnp.log1p(S), axis=1)           # (TB, FEAT_PAD)

    return kernel


def normalize_embedding_table(emb_table, eps=1e-12):
    """F.normalize(p=2, dim=-1) commutes with the gather; do it ONCE on the table
    (hoisted out of the per-call path) instead of per forward call."""
    emb = emb_table.astype(jnp.float32)
    nrm = jnp.maximum(jnp.sqrt(jnp.sum(emb * emb, axis=-1, keepdims=True)), eps)
    return emb / nrm


def _round_up(x, m):
    return ((x + m - 1) // m) * m


def knrm_forward(query_ids, doc_ids, emb_norm, mlp_w, mlp_b, *, batch_tile=64):
    """query_ids: (B, Lq) int32; doc_ids: (B, Ld) int32;
    emb_norm: (V, D) f32 pre-normalized embedding table (normalize_embedding_table);
    mlp_w: (1, KERNEL_NUM) f32; mlp_b: (1,) f32.  Returns (B, 1) f32 scores."""
    # Embedding lookup is glue (XLA gather) for now.
    # TODO(synk): gather + normalize rows in-kernel (table in HBM via memory_space=pl.ANY,
    # scalar-prefetched ids) to drop the HBM round trip of the gathered activations.
    q_emb = jnp.take(emb_norm, query_ids, axis=0)   # (B, Lq, D)
    d_emb = jnp.take(emb_norm, doc_ids, axis=0)     # (B, Ld, D)

    B, Lq, D = q_emb.shape
    Ld = d_emb.shape[1]

    # Lane-dense doc axis: pad Ld up to a multiple of 128 with zero rows; the kernel
    # masks the pad columns exactly.
    # TODO(synk): for very large Ld, add a second ("arbitrary") grid axis over Ld tiles
    # with an s_doc accumulator in VMEM scratch instead of one resident d block.
    Ldp = _round_up(Ld, 128)
    if Ldp != Ld:
        d_emb = jnp.pad(d_emb, ((0, 0), (0, Ldp - Ld), (0, 0)))

    # Batch tile: multiple of 8 (sublanes), aim for >=2 grid steps so both v7x
    # TensorCores get fed; keep the footprint small for v7x's 64 MiB VMEM.
    TB = min(_round_up(batch_tile, 8), _round_up(max(1, -(-B // 2)), 8))
    TB = max(TB, 8)
    n_tiles = -(-B // TB)
    Bp = n_tiles * TB
    if Bp != B:
        # Padded rows still burn VPU/EUP work; prefer B % TB == 0 at production sizes.
        q_emb = jnp.pad(q_emb, ((0, Bp - B), (0, 0), (0, 0)))
        d_emb = jnp.pad(d_emb, ((0, Bp - B), (0, 0), (0, 0)))

    # Explicit VMEM budget: double-buffered inputs + output + pooled intermediates,
    # kept well under v7x's 64 MiB (v5e/v6e can raise batch_tile within the same cap).
    need = 4 * (2 * (TB * Lq * D + TB * Ldp * D) + 2 * TB * FEAT_PAD + 6 * TB * Lq * Ldp)
    vmem_limit = int(min(48 * 2 ** 20, max(16 * 2 ** 20, 2 * need)))

    feats = pl.pallas_call(
        _make_knrm_kernel(Ld, Ldp),
        out_shape=jax.ShapeDtypeStruct((Bp, FEAT_PAD), jnp.float32),
        grid_spec=pltpu.PrefetchScalarGridSpec(
            num_scalar_prefetch=0,
            grid=(n_tiles,),
            in_specs=[
                pl.BlockSpec((TB, Lq, D), lambda b: (b, 0, 0)),
                pl.BlockSpec((TB, Ldp, D), lambda b: (b, 0, 0)),
            ],
            out_specs=pl.BlockSpec((TB, FEAT_PAD), lambda b: (b, 0)),
        ),
        compiler_params=pltpu.CompilerParams(
            dimension_semantics=("parallel",),
            vmem_limit_bytes=vmem_limit),
    )(q_emb, d_emb)

    feats = feats[:B, :KERNEL_NUM]                          # (B, 21)
    w2 = mlp_w.reshape(1, KERNEL_NUM).astype(jnp.float32)
    b2 = mlp_b.reshape(1, 1).astype(jnp.float32)
    return feats @ w2.T + b2                                # (B, 1); sigmoid unused in forward


def knrm_reference(query_ids, doc_ids, emb_table, mlp_w, mlp_b):
    """Pure-JAX reference mirroring the PyTorch forward, for verification."""
    eps = 1e-12
    q = jnp.take(emb_table, query_ids, axis=0)
    d = jnp.take(emb_table, doc_ids, axis=0)
    qn = q / jnp.maximum(jnp.linalg.norm(q, axis=-1, keepdims=True), eps)
    dn = d / jnp.maximum(jnp.linalg.norm(d, axis=-1, keepdims=True), eps)
    m = jnp.einsum("bld,brd->blr", qn, dn)
    feats = []
    for mu, sg in zip(MUS, SIGMAS):
        k = jnp.exp(-0.5 * (m - mu) ** 2 / (sg * sg))
        feats.append(jnp.sum(jnp.log1p(jnp.sum(k, axis=-1)), axis=-1))
    feats = jnp.stack(feats, axis=1)                        # (B, 21)
    return feats @ mlp_w.T + mlp_b[None, :]                 # (B, 1)


if __name__ == "__main__":
    key = jax.random.PRNGKey(0)
    k_emb, k_w, k_b, k_q, k_d = jax.random.split(key, 5)

    B, Lq, Ld, D, V = 2, 8, 12, 32, 50

    # deterministic synthetic parameters (no checkpoint loading)
    emb_table = jax.random.normal(k_emb, (V, D), dtype=jnp.float32)
    mlp_w = 0.1 * jax.random.normal(k_w, (1, KERNEL_NUM), dtype=jnp.float32)
    mlp_b = 0.1 * jax.random.normal(k_b, (1,), dtype=jnp.float32)

    query_ids = jax.random.randint(k_q, (B, Lq), 0, V, dtype=jnp.int32)
    doc_ids = jax.random.randint(k_d, (B, Ld), 0, V, dtype=jnp.int32)

    # table normalization hoisted out of the per-call path (done once)
    emb_norm = normalize_embedding_table(emb_table)

    out = knrm_forward(query_ids, doc_ids, emb_norm, mlp_w, mlp_b)
    out = jax.block_until_ready(out)

    ref = knrm_reference(query_ids, doc_ids, emb_table, mlp_w, mlp_b)
    assert out.shape == (B, 1)
    # slightly looser than machine-eps: the shared-sigma exp recurrence accumulates a
    # few extra f32 ULPs per re-seed group (<= 4 chained multiplies) vs. the naive form.
    assert jnp.allclose(out, ref, rtol=2e-4, atol=2e-4), (out, ref)

    print("KERNEL_OK")
</pallas_src>

<mosaic_0001>
module attributes {stable_mosaic.version = 11 : i64} {
  func.func @kernel(%arg0: i32, %arg1: memref<8x8x32xf32, #tpu.memory_space<vmem>>, %arg2: memref<8x128x32xf32, #tpu.memory_space<vmem>>, %arg3: memref<8x128xf32, #tpu.memory_space<vmem>>) attributes {dimension_semantics = [#tpu.dimension_semantics<parallel>], iteration_bounds = array<i64: 1>, scalar_prefetch = 0 : i64, scratch_operands = 0 : i64, tpu.core_type = #tpu.core_type<tc>, window_params = [{transform_indices = @transform_0, window_bounds = array<i64: 8, 8, 32>}, {transform_indices = @transform_1, window_bounds = array<i64: 8, 128, 32>}, {transform_indices = @transform_2, window_bounds = array<i64: 8, 128>}]} {
    %c0 = arith.constant 0 : index
    %c0_0 = arith.constant 0 : index
    %c0_1 = arith.constant 0 : index
    %0 = vector.load %arg1[%c0, %c0_0, %c0_1] : memref<8x8x32xf32, #tpu.memory_space<vmem>>, vector<8x8x32xf32>
    %c0_2 = arith.constant 0 : index
    %c0_3 = arith.constant 0 : index
    %c0_4 = arith.constant 0 : index
    %1 = vector.load %arg2[%c0_2, %c0_3, %c0_4] : memref<8x128x32xf32, #tpu.memory_space<vmem>>, vector<8x128x32xf32>
    "tpu.trace_start"() <{level = 10 : i32, message = "bqd,bkd->bqk"}> : () -> ()
    %cst = arith.constant dense<0.000000e+00> : vector<8x8x128xf32>
    %2 = tpu.matmul %0, %1, %cst {dimension_numbers = #tpu.dot_dimension_numbers<[2], [2], [1], [1], [0, 0, 0, 1, 1, 1], [0], [0]>} : vector<8x8x32xf32>, vector<8x128x32xf32>, vector<8x8x128xf32> -> vector<8x8x128xf32>
    "tpu.trace_stop"() : () -> ()
    %3 = tpu.iota {dimensions = array<i32: 2>} : vector<1x1x128xi32>
    %c12_i32 = arith.constant 12 : i32
    %4 = vector.broadcast %c12_i32 : i32 to vector<1x1x128xi32>
    %5 = arith.cmpi slt, %3, %4 : vector<1x1x128xi32>
    %cst_5 = arith.constant -1.000000e+02 : f32
    %6 = vector.shape_cast %5 : vector<1x1x128xi1> to vector<1x1x128xi1>
    %7 = vector.broadcast %6 : vector<1x1x128xi1> to vector<8x8x128xi1>
    %8 = vector.broadcast %cst_5 : f32 to vector<8x8x128xf32>
    %9 = arith.select %7, %2, %8 : vector<8x8x128xi1>, vector<8x8x128xf32>
    %cst_6 = arith.constant 1.000000e+01 : f32
    %10 = vector.broadcast %cst_6 : f32 to vector<8x8x128xf32>
    %11 = arith.mulf %10, %9 : vector<8x8x128xf32>
    %12 = math.exp %11 : vector<8x8x128xf32>
    %13 = tpu.iota {dimensions = array<i32: 2>} : vector<1x1x128xi32>
    %cst_7 = arith.constant 0.000000e+00 : f32
    %14 = vector.broadcast %cst_7 : f32 to vector<8x8x128xf32>
    %cst_8 = arith.constant -0.949999988 : f32
    %15 = vector.broadcast %cst_8 : f32 to vector<8x8x128xf32>
    %16 = arith.subf %9, %15 : vector<8x8x128xf32>
    %17 = arith.mulf %16, %16 : vector<8x8x128xf32>
    %cst_9 = arith.constant -5.000000e+01 : f32
    %18 = vector.broadcast %cst_9 : f32 to vector<8x8x128xf32>
    %19 = arith.mulf %18, %17 : vector<8x8x128xf32>
    %20 = math.exp %19 : vector<8x8x128xf32>
    %cst_10 = arith.constant dense<0.000000e+00> : vector<8x8xf32>
    %21 = vector.multi_reduction <add>, %20, %cst_10 [2] : vector<8x8x128xf32> to vector<8x8xf32>
    %22 = vector.shape_cast %21 : vector<8x8xf32> to vector<8x8x1xf32>
    %c0_i32 = arith.constant 0 : i32
    %23 = vector.broadcast %c0_i32 : i32 to vector<1x1x128xi32>
    %24 = arith.cmpi eq, %13, %23 : vector<1x1x128xi32>
    %cst_11 = arith.constant 0.000000e+00 : f32
    %25 = vector.shape_cast %24 : vector<1x1x128xi1> to vector<1x1x128xi1>
    %26 = vector.broadcast %25 : vector<1x1x128xi1> to vector<8x8x128xi1>
    %27 = vector.shape_cast %22 : vector<8x8x1xf32> to vector<8x8x1xf32>
    %28 = vector.broadcast %27 : vector<8x8x1xf32> to vector<8x8x128xf32>
    %29 = vector.broadcast %cst_11 : f32 to vector<8x8x128xf32>
    %30 = arith.select %26, %28, %29 : vector<8x8x128xi1>, vector<8x8x128xf32>
    %31 = arith.addf %14, %30 : vector<8x8x128xf32>
    %32 = arith.mulf %20, %12 : vector<8x8x128xf32>
    %cst_12 = arith.constant 8103.08398 : f32
    %33 = vector.broadcast %cst_12 : f32 to vector<8x8x128xf32>
    %34 = arith.mulf %32, %33 : vector<8x8x128xf32>
    %cst_13 = arith.constant dense<0.000000e+00> : vector<8x8xf32>
    %35 = vector.multi_reduction <add>, %34, %cst_13 [2] : vector<8x8x128xf32> to vector<8x8xf32>
    %36 = vector.shape_cast %35 : vector<8x8xf32> to vector<8x8x1xf32>
    %c1_i32 = arith.constant 1 : i32
    %37 = vector.broadcast %c1_i32 : i32 to vector<1x1x128xi32>
    %38 = arith.cmpi eq, %13, %37 : vector<1x1x128xi32>
    %cst_14 = arith.constant 0.000000e+00 : f32
    %39 = vector.shape_cast %38 : vector<1x1x128xi1> to vector<1x1x128xi1>
    %40 = vector.broadcast %39 : vector<1x1x128xi1> to vector<8x8x128xi1>
    %41 = vector.shape_cast %36 : vector<8x8x1xf32> to vector<8x8x1xf32>
    %42 = vector.broadcast %41 : vector<8x8x1xf32> to vector<8x8x128xf32>
    %43 = vector.broadcast %cst_14 : f32 to vector<8x8x128xf32>
    %44 = arith.select %40, %42, %43 : vector<8x8x128xi1>, vector<8x8x128xf32>
    %45 = arith.addf %31, %44 : vector<8x8x128xf32>
    %46 = arith.mulf %34, %12 : vector<8x8x128xf32>
    %cst_15 = arith.constant 2980.95801 : f32
    %47 = vector.broadcast %cst_15 : f32 to vector<8x8x128xf32>
    %48 = arith.mulf %46, %47 : vector<8x8x128xf32>
    %cst_16 = arith.constant dense<0.000000e+00> : vector<8x8xf32>
    %49 = vector.multi_reduction <add>, %48, %cst_16 [2] : vector<8x8x128xf32> to vector<8x8xf32>
    %50 = vector.shape_cast %49 : vector<8x8xf32> to vector<8x8x1xf32>
    %c2_i32 = arith.constant 2 : i32
    %51 = vector.broadcast %c2_i32 : i32 to vector<1x1x128xi32>
    %52 = arith.cmpi eq, %13, %51 : vector<1x1x128xi32>
    %cst_17 = arith.constant 0.000000e+00 : f32
    %53 = vector.shape_cast %52 : vector<1x1x128xi1> to vector<1x1x128xi1>
    %54 = vector.broadcast %53 : vector<1x1x128xi1> to vector<8x8x128xi1>
    %55 = vector.shape_cast %50 : vector<8x8x1xf32> to vector<8x8x1xf32>
    %56 = vector.broadcast %55 : vector<8x8x1xf32> to vector<8x8x128xf32>
    %57 = vector.broadcast %cst_17 : f32 to vector<8x8x128xf32>
    %58 = arith.select %54, %56, %57 : vector<8x8x128xi1>, vector<8x8x128xf32>
    %59 = arith.addf %45, %58 : vector<8x8x128xf32>
    %60 = arith.mulf %48, %12 : vector<8x8x128xf32>
    %cst_18 = arith.constant 1096.63318 : f32
    %61 = vector.broadcast %cst_18 : f32 to vector<8x8x128xf32>
    %62 = arith.mulf %60, %61 : vector<8x8x128xf32>
    %cst_19 = arith.constant dense<0.000000e+00> : vector<8x8xf32>
    %63 = vector.multi_reduction <add>, %62, %cst_19 [2] : vector<8x8x128xf32> to vector<8x8xf32>
    %64 = vector.shape_cast %63 : vector<8x8xf32> to vector<8x8x1xf32>
    %c3_i32 = arith.constant 3 : i32
    %65 = vector.broadcast %c3_i32 : i32 to vector<1x1x128xi32>
    %66 = arith.cmpi eq, %13, %65 : vector<1x1x128xi32>
    %cst_20 = arith.constant 0.000000e+00 : f32
    %67 = vector.shape_cast %66 : vector<1x1x128xi1> to vector<1x1x128xi1>
    %68 = vector.broadcast %67 : vector<1x1x128xi1> to vector<8x8x128xi1>
    %69 = vector.shape_cast %64 : vector<8x8x1xf32> to vector<8x8x1xf32>
    %70 = vector.broadcast %69 : vector<8x8x1xf32> to vector<8x8x128xf32>
    %71 = vector.broadcast %cst_20 : f32 to vector<8x8x128xf32>
    %72 = arith.select %68, %70, %71 : vector<8x8x128xi1>, vector<8x8x128xf32>
    %73 = arith.addf %59, %72 : vector<8x8x128xf32>
    %74 = arith.mulf %62, %12 : vector<8x8x128xf32>
    %cst_21 = arith.constant 403.428802 : f32
    %75 = vector.broadcast %cst_21 : f32 to vector<8x8x128xf32>
    %76 = arith.mulf %74, %75 : vector<8x8x128xf32>
    %cst_22 = arith.constant dense<0.000000e+00> : vector<8x8xf32>
    %77 = vector.multi_reduction <add>, %76, %cst_22 [2] : vector<8x8x128xf32> to vector<8x8xf32>
    %78 = vector.shape_cast %77 : vector<8x8xf32> to vector<8x8x1xf32>
    %c4_i32 = arith.constant 4 : i32
    %79 = vector.broadcast %c4_i32 : i32 to vector<1x1x128xi32>
    %80 = arith.cmpi eq, %13, %79 : vector<1x1x128xi32>
    %cst_23 = arith.constant 0.000000e+00 : f32
    %81 = vector.shape_cast %80 : vector<1x1x128xi1> to vector<1x1x128xi1>
    %82 = vector.broadcast %81 : vector<1x1x128xi1> to vector<8x8x128xi1>
    %83 = vector.shape_cast %78 : vector<8x8x1xf32> to vector<8x8x1xf32>
    %84 = vector.broadcast %83 : vector<8x8x1xf32> to vector<8x8x128xf32>
    %85 = vector.broadcast %cst_23 : f32 to vector<8x8x128xf32>
    %86 = arith.select %82, %84, %85 : vector<8x8x128xi1>, vector<8x8x128xf32>
    %87 = arith.addf %73, %86 : vector<8x8x128xf32>
    %cst_24 = arith.constant -4.500000e-01 : f32
    %88 = vector.broadcast %cst_24 : f32 to vector<8x8x128xf32>
    %89 = arith.subf %9, %88 : vector<8x8x128xf32>
    %90 = arith.mulf %89, %89 : vector<8x8x128xf32>
    %cst_25 = arith.constant -5.000000e+01 : f32
    %91 = vector.broadcast %cst_25 : f32 to vector<8x8x128xf32>
    %92 = arith.mulf %91, %90 : vector<8x8x128xf32>
    %93 = math.exp %92 : vector<8x8x128xf32>
    %cst_26 = arith.constant dense<0.000000e+00> : vector<8x8xf32>
    %94 = vector.multi_reduction <add>, %93, %cst_26 [2] : vector<8x8x128xf32> to vector<8x8xf32>
    %95 = vector.shape_cast %94 : vector<8x8xf32> to vector<8x8x1xf32>
    %c5_i32 = arith.constant 5 : i32
    %96 = vector.broadcast %c5_i32 : i32 to vector<1x1x128xi32>
    %97 = arith.cmpi eq, %13, %96 : vector<1x1x128xi32>
    %cst_27 = arith.constant 0.000000e+00 : f32
    %98 = vector.shape_cast %97 : vector<1x1x128xi1> to vector<1x1x128xi1>
    %99 = vector.broadcast %98 : vector<1x1x128xi1> to vector<8x8x128xi1>
    %100 = vector.shape_cast %95 : vector<8x8x1xf32> to vector<8x8x1xf32>
    %101 = vector.broadcast %100 : vector<8x8x1xf32> to vector<8x8x128xf32>
    %102 = vector.broadcast %cst_27 : f32 to vector<8x8x128xf32>
    %103 = arith.select %99, %101, %102 : vector<8x8x128xi1>, vector<8x8x128xf32>
    %104 = arith.addf %87, %103 : vector<8x8x128xf32>
    %105 = arith.mulf %93, %12 : vector<8x8x128xf32>
    %cst_28 = arith.constant 54.5981483 : f32
    %106 = vector.broadcast %cst_28 : f32 to vector<8x8x128xf32>
    %107 = arith.mulf %105, %106 : vector<8x8x128xf32>
    %cst_29 = arith.constant dense<0.000000e+00> : vector<8x8xf32>
    %108 = vector.multi_reduction <add>, %107, %cst_29 [2] : vector<8x8x128xf32> to vector<8x8xf32>
    %109 = vector.shape_cast %108 : vector<8x8xf32> to vector<8x8x1xf32>
    %c6_i32 = arith.constant 6 : i32
    %110 = vector.broadcast %c6_i32 : i32 to vector<1x1x128xi32>
    %111 = arith.cmpi eq, %13, %110 : vector<1x1x128xi32>
    %cst_30 = arith.constant 0.000000e+00 : f32
    %112 = vector.shape_cast %111 : vector<1x1x128xi1> to vector<1x1x128xi1>
    %113 = vector.broadcast %112 : vector<1x1x128xi1> to vector<8x8x128xi1>
    %114 = vector.shape_cast %109 : vector<8x8x1xf32> to vector<8x8x1xf32>
    %115 = vector.broadcast %114 : vector<8x8x1xf32> to vector<8x8x128xf32>
    %116 = vector.broadcast %cst_30 : f32 to vector<8x8x128xf32>
    %117 = arith.select %113, %115, %116 : vector<8x8x128xi1>, vector<8x8x128xf32>
    %118 = arith.addf %104, %117 : vector<8x8x128xf32>
    %119 = arith.mulf %107, %12 : vector<8x8x128xf32>
    %cst_31 = arith.constant 20.085537 : f32
    %120 = vector.broadcast %cst_31 : f32 to vector<8x8x128xf32>
    %121 = arith.mulf %119, %120 : vector<8x8x128xf32>
    %cst_32 = arith.constant dense<0.000000e+00> : vector<8x8xf32>
    %122 = vector.multi_reduction <add>, %121, %cst_32 [2] : vector<8x8x128xf32> to vector<8x8xf32>
    %123 = vector.shape_cast %122 : vector<8x8xf32> to vector<8x8x1xf32>
    %c7_i32 = arith.constant 7 : i32
    %124 = vector.broadcast %c7_i32 : i32 to vector<1x1x128xi32>
    %125 = arith.cmpi eq, %13, %124 : vector<1x1x128xi32>
    %cst_33 = arith.constant 0.000000e+00 : f32
    %126 = vector.shape_cast %125 : vector<1x1x128xi1> to vector<1x1x128xi1>
    %127 = vector.broadcast %126 : vector<1x1x128xi1> to vector<8x8x128xi1>
    %128 = vector.shape_cast %123 : vector<8x8x1xf32> to vector<8x8x1xf32>
    %129 = vector.broadcast %128 : vector<8x8x1xf32> to vector<8x8x128xf32>
    %130 = vector.broadcast %cst_33 : f32 to vector<8x8x128xf32>
    %131 = arith.select %127, %129, %130 : vector<8x8x128xi1>, vector<8x8x128xf32>
    %132 = arith.addf %118, %131 : vector<8x8x128xf32>
    %133 = arith.mulf %121, %12 : vector<8x8x128xf32>
    %cst_34 = arith.constant 7.3890562 : f32
    %134 = vector.broadcast %cst_34 : f32 to vector<8x8x128xf32>
    %135 = arith.mulf %133, %134 : vector<8x8x128xf32>
    %cst_35 = arith.constant dense<0.000000e+00> : vector<8x8xf32>
    %136 = vector.multi_reduction <add>, %135, %cst_35 [2] : vector<8x8x128xf32> to vector<8x8xf32>
    %137 = vector.shape_cast %136 : vector<8x8xf32> to vector<8x8x1xf32>
    %c8_i32 = arith.constant 8 : i32
    %138 = vector.broadcast %c8_i32 : i32 to vector<1x1x128xi32>
    %139 = arith.cmpi eq, %13, %138 : vector<1x1x128xi32>
    %cst_36 = arith.constant 0.000000e+00 : f32
    %140 = vector.shape_cast %139 : vector<1x1x128xi1> to vector<1x1x128xi1>
    %141 = vector.broadcast %140 : vector<1x1x128xi1> to vector<8x8x128xi1>
    %142 = vector.shape_cast %137 : vector<8x8x1xf32> to vector<8x8x1xf32>
    %143 = vector.broadcast %142 : vector<8x8x1xf32> to vector<8x8x128xf32>
    %144 = vector.broadcast %cst_36 : f32 to vector<8x8x128xf32>
    %145 = arith.select %141, %143, %144 : vector<8x8x128xi1>, vector<8x8x128xf32>
    %146 = arith.addf %132, %145 : vector<8x8x128xf32>
    %147 = arith.mulf %135, %12 : vector<8x8x128xf32>
    %cst_37 = arith.constant 2.71828175 : f32
    %148 = vector.broadcast %cst_37 : f32 to vector<8x8x128xf32>
    %149 = arith.mulf %147, %148 : vector<8x8x128xf32>
    %cst_38 = arith.constant dense<0.000000e+00> : vector<8x8xf32>
    %150 = vector.multi_reduction <add>, %149, %cst_38 [2] : vector<8x8x128xf32> to vector<8x8xf32>
    %151 = vector.shape_cast %150 : vector<8x8xf32> to vector<8x8x1xf32>
    %c9_i32 = arith.constant 9 : i32
    %152 = vector.broadcast %c9_i32 : i32 to vector<1x1x128xi32>
    %153 = arith.cmpi eq, %13, %152 : vector<1x1x128xi32>
    %cst_39 = arith.constant 0.000000e+00 : f32
    %154 = vector.shape_cast %153 : vector<1x1x128xi1> to vector<1x1x128xi1>
    %155 = vector.broadcast %154 : vector<1x1x128xi1> to vector<8x8x128xi1>
    %156 = vector.shape_cast %151 : vector<8x8x1xf32> to vector<8x8x1xf32>
    %157 = vector.broadcast %156 : vector<8x8x1xf32> to vector<8x8x128xf32>
    %158 = vector.broadcast %cst_39 : f32 to vector<8x8x128xf32>
    %159 = arith.select %155, %157, %158 : vector<8x8x128xi1>, vector<8x8x128xf32>
    %160 = arith.addf %146, %159 : vector<8x8x128xf32>
    %cst_40 = arith.constant 5.000000e-02 : f32
    %161 = vector.broadcast %cst_40 : f32 to vector<8x8x128xf32>
    %162 = arith.subf %9, %161 : vector<8x8x128xf32>
    %163 = arith.mulf %162, %162 : vector<8x8x128xf32>
    %cst_41 = arith.constant -5.000000e+01 : f32
    %164 = vector.broadcast %cst_41 : f32 to vector<8x8x128xf32>
    %165 = arith.mulf %164, %163 : vector<8x8x128xf32>
    %166 = math.exp %165 : vector<8x8x128xf32>
    %cst_42 = arith.constant dense<0.000000e+00> : vector<8x8xf32>
    %167 = vector.multi_reduction <add>, %166, %cst_42 [2] : vector<8x8x128xf32> to vector<8x8xf32>
    %168 = vector.shape_cast %167 : vector<8x8xf32> to vector<8x8x1xf32>
    %c10_i32 = arith.constant 10 : i32
    %169 = vector.broadcast %c10_i32 : i32 to vector<1x1x128xi32>
    %170 = arith.cmpi eq, %13, %169 : vector<1x1x128xi32>
    %cst_43 = arith.constant 0.000000e+00 : f32
    %171 = vector.shape_cast %170 : vector<1x1x128xi1> to vector<1x1x128xi1>
    %172 = vector.broadcast %171 : vector<1x1x128xi1> to vector<8x8x128xi1>
    %173 = vector.shape_cast %168 : vector<8x8x1xf32> to vector<8x8x1xf32>
    %174 = vector.broadcast %173 : vector<8x8x1xf32> to vector<8x8x128xf32>
    %175 = vector.broadcast %cst_43 : f32 to vector<8x8x128xf32>
    %176 = arith.select %172, %174, %175 : vector<8x8x128xi1>, vector<8x8x128xf32>
    %177 = arith.addf %160, %176 : vector<8x8x128xf32>
    %178 = arith.mulf %166, %12 : vector<8x8x128xf32>
    %cst_44 = arith.constant 0.36787945 : f32
    %179 = vector.broadcast %cst_44 : f32 to vector<8x8x128xf32>
    %180 = arith.mulf %178, %179 : vector<8x8x128xf32>
    %cst_45 = arith.constant dense<0.000000e+00> : vector<8x8xf32>
    %181 = vector.multi_reduction <add>, %180, %cst_45 [2] : vector<8x8x128xf32> to vector<8x8xf32>
    %182 = vector.shape_cast %181 : vector<8x8xf32> to vector<8x8x1xf32>
    %c11_i32 = arith.constant 11 : i32
    %183 = vector.broadcast %c11_i32 : i32 to vector<1x1x128xi32>
    %184 = arith.cmpi eq, %13, %183 : vector<1x1x128xi32>
    %cst_46 = arith.constant 0.000000e+00 : f32
    %185 = vector.shape_cast %184 : vector<1x1x128xi1> to vector<1x1x128xi1>
    %186 = vector.broadcast %185 : vector<1x1x128xi1> to vector<8x8x128xi1>
    %187 = vector.shape_cast %182 : vector<8x8x1xf32> to vector<8x8x1xf32>
    %188 = vector.broadcast %187 : vector<8x8x1xf32> to vector<8x8x128xf32>
    %189 = vector.broadcast %cst_46 : f32 to vector<8x8x128xf32>
    %190 = arith.select %186, %188, %189 : vector<8x8x128xi1>, vector<8x8x128xf32>
    %191 = arith.addf %177, %190 : vector<8x8x128xf32>
    %192 = arith.mulf %180, %12 : vector<8x8x128xf32>
    %cst_47 = arith.constant 0.135335281 : f32
    %193 = vector.broadcast %cst_47 : f32 to vector<8x8x128xf32>
    %194 = arith.mulf %192, %193 : vector<8x8x128xf32>
    %cst_48 = arith.constant dense<0.000000e+00> : vector<8x8xf32>
    %195 = vector.multi_reduction <add>, %194, %cst_48 [2] : vector<8x8x128xf32> to vector<8x8xf32>
    %196 = vector.shape_cast %195 : vector<8x8xf32> to vector<8x8x1xf32>
    %c12_i32_49 = arith.constant 12 : i32
    %197 = vector.broadcast %c12_i32_49 : i32 to vector<1x1x128xi32>
    %198 = arith.cmpi eq, %13, %197 : vector<1x1x128xi32>
    %cst_50 = arith.constant 0.000000e+00 : f32
    %199 = vector.shape_cast %198 : vector<1x1x128xi1> to vector<1x1x128xi1>
    %200 = vector.broadcast %199 : vector<1x1x128xi1> to vector<8x8x128xi1>
    %201 = vector.shape_cast %196 : vector<8x8x1xf32> to vector<8x8x1xf32>
    %202 = vector.broadcast %201 : vector<8x8x1xf32> to vector<8x8x128xf32>
    %203 = vector.broadcast %cst_50 : f32 to vector<8x8x128xf32>
    %204 = arith.select %200, %202, %203 : vector<8x8x128xi1>, vector<8x8x128xf32>
    %205 = arith.addf %191, %204 : vector<8x8x128xf32>
    %206 = arith.mulf %194, %12 : vector<8x8x128xf32>
    %cst_51 = arith.constant 0.0497870669 : f32
    %207 = vector.broadcast %cst_51 : f32 to vector<8x8x128xf32>
    %208 = arith.mulf %206, %207 : vector<8x8x128xf32>
    %cst_52 = arith.constant dense<0.000000e+00> : vector<8x8xf32>
    %209 = vector.multi_reduction <add>, %208, %cst_52 [2] : vector<8x8x128xf32> to vector<8x8xf32>
    %210 = vector.shape_cast %209 : vector<8x8xf32> to vector<8x8x1xf32>
    %c13_i32 = arith.constant 13 : i32
    %211 = vector.broadcast %c13_i32 : i32 to vector<1x1x128xi32>
    %212 = arith.cmpi eq, %13, %211 : vector<1x1x128xi32>
    %cst_53 = arith.constant 0.000000e+00 : f32
    %213 = vector.shape_cast %212 : vector<1x1x128xi1> to vector<1x1x128xi1>
    %214 = vector.broadcast %213 : vector<1x1x128xi1> to vector<8x8x128xi1>
    %215 = vector.shape_cast %210 : vector<8x8x1xf32> to vector<8x8x1xf32>
    %216 = vector.broadcast %215 : vector<8x8x1xf32> to vector<8x8x128xf32>
    %217 = vector.broadcast %cst_53 : f32 to vector<8x8x128xf32>
    %218 = arith.select %214, %216, %217 : vector<8x8x128xi1>, vector<8x8x128xf32>
    %219 = arith.addf %205, %218 : vector<8x8x128xf32>
    %220 = arith.mulf %208, %12 : vector<8x8x128xf32>
    %cst_54 = arith.constant 0.0183156393 : f32
    %221 = vector.broadcast %cst_54 : f32 to vector<8x8x128xf32>
    %222 = arith.mulf %220, %221 : vector<8x8x128xf32>
    %cst_55 = arith.constant dense<0.000000e+00> : vector<8x8xf32>
    %223 = vector.multi_reduction <add>, %222, %cst_55 [2] : vector<8x8x128xf32> to vector<8x8xf32>
    %224 = vector.shape_cast %223 : vector<8x8xf32> to vector<8x8x1xf32>
    %c14_i32 = arith.constant 14 : i32
    %225 = vector.broadcast %c14_i32 : i32 to vector<1x1x128xi32>
    %226 = arith.cmpi eq, %13, %225 : vector<1x1x128xi32>
    %cst_56 = arith.constant 0.000000e+00 : f32
    %227 = vector.shape_cast %226 : vector<1x1x128xi1> to vector<1x1x128xi1>
    %228 = vector.broadcast %227 : vector<1x1x128xi1> to vector<8x8x128xi1>
    %229 = vector.shape_cast %224 : vector<8x8x1xf32> to vector<8x8x1xf32>
    %230 = vector.broadcast %229 : vector<8x8x1xf32> to vector<8x8x128xf32>
    %231 = vector.broadcast %cst_56 : f32 to vector<8x8x128xf32>
    %232 = arith.select %228, %230, %231 : vector<8x8x128xi1>, vector<8x8x128xf32>
    %233 = arith.addf %219, %232 : vector<8x8x128xf32>
    %cst_57 = arith.constant 5.500000e-01 : f32
    %234 = vector.broadcast %cst_57 : f32 to vector<8x8x128xf32>
    %235 = arith.subf %9, %234 : vector<8x8x128xf32>
    %236 = arith.mulf %235, %235 : vector<8x8x128xf32>
    %cst_58 = arith.constant -5.000000e+01 : f32
    %237 = vector.broadcast %cst_58 : f32 to vector<8x8x128xf32>
    %238 = arith.mulf %237, %236 : vector<8x8x128xf32>
    %239 = math.exp %238 : vector<8x8x128xf32>
    %cst_59 = arith.constant dense<0.000000e+00> : vector<8x8xf32>
    %240 = vector.multi_reduction <add>, %239, %cst_59 [2] : vector<8x8x128xf32> to vector<8x8xf32>
    %241 = vector.shape_cast %240 : vector<8x8xf32> to vector<8x8x1xf32>
    %c15_i32 = arith.constant 15 : i32
    %242 = vector.broadcast %c15_i32 : i32 to vector<1x1x128xi32>
    %243 = arith.cmpi eq, %13, %242 : vector<1x1x128xi32>
    %cst_60 = arith.constant 0.000000e+00 : f32
    %244 = vector.shape_cast %243 : vector<1x1x128xi1> to vector<1x1x128xi1>
    %245 = vector.broadcast %244 : vector<1x1x128xi1> to vector<8x8x128xi1>
    %246 = vector.shape_cast %241 : vector<8x8x1xf32> to vector<8x8x1xf32>
    %247 = vector.broadcast %246 : vector<8x8x1xf32> to vector<8x8x128xf32>
    %248 = vector.broadcast %cst_60 : f32 to vector<8x8x128xf32>
    %249 = arith.select %245, %247, %248 : vector<8x8x128xi1>, vector<8x8x128xf32>
    %250 = arith.addf %233, %249 : vector<8x8x128xf32>
    %251 = arith.mulf %239, %12 : vector<8x8x128xf32>
    %cst_61 = arith.constant 0.00247875229 : f32
    %252 = vector.broadcast %cst_61 : f32 to vector<8x8x128xf32>
    %253 = arith.mulf %251, %252 : vector<8x8x128xf32>
    %cst_62 = arith.constant dense<0.000000e+00> : vector<8x8xf32>
    %254 = vector.multi_reduction <add>, %253, %cst_62 [2] : vector<8x8x128xf32> to vector<8x8xf32>
    %255 = vector.shape_cast %254 : vector<8x8xf32> to vector<8x8x1xf32>
    %c16_i32 = arith.constant 16 : i32
    %256 = vector.broadcast %c16_i32 : i32 to vector<1x1x128xi32>
    %257 = arith.cmpi eq, %13, %256 : vector<1x1x128xi32>
    %cst_63 = arith.constant 0.000000e+00 : f32
    %258 = vector.shape_cast %257 : vector<1x1x128xi1> to vector<1x1x128xi1>
    %259 = vector.broadcast %258 : vector<1x1x128xi1> to vector<8x8x128xi1>
    %260 = vector.shape_cast %255 : vector<8x8x1xf32> to vector<8x8x1xf32>
    %261 = vector.broadcast %260 : vector<8x8x1xf32> to vector<8x8x128xf32>
    %262 = vector.broadcast %cst_63 : f32 to vector<8x8x128xf32>
    %263 = arith.select %259, %261, %262 : vector<8x8x128xi1>, vector<8x8x128xf32>
    %264 = arith.addf %250, %263 : vector<8x8x128xf32>
    %265 = arith.mulf %253, %12 : vector<8x8x128xf32>
    %cst_64 = arith.constant 9.118820e-04 : f32
    %266 = vector.broadcast %cst_64 : f32 to vector<8x8x128xf32>
    %267 = arith.mulf %265, %266 : vector<8x8x128xf32>
    %cst_65 = arith.constant dense<0.000000e+00> : vector<8x8xf32>
    %268 = vector.multi_reduction <add>, %267, %cst_65 [2] : vector<8x8x128xf32> to vector<8x8xf32>
    %269 = vector.shape_cast %268 : vector<8x8xf32> to vector<8x8x1xf32>
    %c17_i32 = arith.constant 17 : i32
    %270 = vector.broadcast %c17_i32 : i32 to vector<1x1x128xi32>
    %271 = arith.cmpi eq, %13, %270 : vector<1x1x128xi32>
    %cst_66 = arith.constant 0.000000e+00 : f32
    %272 = vector.shape_cast %271 : vector<1x1x128xi1> to vector<1x1x128xi1>
    %273 = vector.broadcast %272 : vector<1x1x128xi1> to vector<8x8x128xi1>
    %274 = vector.shape_cast %269 : vector<8x8x1xf32> to vector<8x8x1xf32>
    %275 = vector.broadcast %274 : vector<8x8x1xf32> to vector<8x8x128xf32>
    %276 = vector.broadcast %cst_66 : f32 to vector<8x8x128xf32>
    %277 = arith.select %273, %275, %276 : vector<8x8x128xi1>, vector<8x8x128xf32>
    %278 = arith.addf %264, %277 : vector<8x8x128xf32>
    %279 = arith.mulf %267, %12 : vector<8x8x128xf32>
    %cst_67 = arith.constant 3.35462624E-4 : f32
    %280 = vector.broadcast %cst_67 : f32 to vector<8x8x128xf32>
    %281 = arith.mulf %279, %280 : vector<8x8x128xf32>
    %cst_68 = arith.constant dense<0.000000e+00> : vector<8x8xf32>
    %282 = vector.multi_reduction <add>, %281, %cst_68 [2] : vector<8x8x128xf32> to vector<8x8xf32>
    %283 = vector.shape_cast %282 : vector<8x8xf32> to vector<8x8x1xf32>
    %c18_i32 = arith.constant 18 : i32
    %284 = vector.broadcast %c18_i32 : i32 to vector<1x1x128xi32>
    %285 = arith.cmpi eq, %13, %284 : vector<1x1x128xi32>
    %cst_69 = arith.constant 0.000000e+00 : f32
    %286 = vector.shape_cast %285 : vector<1x1x128xi1> to vector<1x1x128xi1>
    %287 = vector.broadcast %286 : vector<1x1x128xi1> to vector<8x8x128xi1>
    %288 = vector.shape_cast %283 : vector<8x8x1xf32> to vector<8x8x1xf32>
    %289 = vector.broadcast %288 : vector<8x8x1xf32> to vector<8x8x128xf32>
    %290 = vector.broadcast %cst_69 : f32 to vector<8x8x128xf32>
    %291 = arith.select %287, %289, %290 : vector<8x8x128xi1>, vector<8x8x128xf32>
    %292 = arith.addf %278, %291 : vector<8x8x128xf32>
    %293 = arith.mulf %281, %12 : vector<8x8x128xf32>
    %cst_70 = arith.constant 1.23409802E-4 : f32
    %294 = vector.broadcast %cst_70 : f32 to vector<8x8x128xf32>
    %295 = arith.mulf %293, %294 : vector<8x8x128xf32>
    %cst_71 = arith.constant dense<0.000000e+00> : vector<8x8xf32>
    %296 = vector.multi_reduction <add>, %295, %cst_71 [2] : vector<8x8x128xf32> to vector<8x8xf32>
    %297 = vector.shape_cast %296 : vector<8x8xf32> to vector<8x8x1xf32>
    %c19_i32 = arith.constant 19 : i32
    %298 = vector.broadcast %c19_i32 : i32 to vector<1x1x128xi32>
    %299 = arith.cmpi eq, %13, %298 : vector<1x1x128xi32>
    %cst_72 = arith.constant 0.000000e+00 : f32
    %300 = vector.shape_cast %299 : vector<1x1x128xi1> to vector<1x1x128xi1>
    %301 = vector.broadcast %300 : vector<1x1x128xi1> to vector<8x8x128xi1>
    %302 = vector.shape_cast %297 : vector<8x8x1xf32> to vector<8x8x1xf32>
    %303 = vector.broadcast %302 : vector<8x8x1xf32> to vector<8x8x128xf32>
    %304 = vector.broadcast %cst_72 : f32 to vector<8x8x128xf32>
    %305 = arith.select %301, %303, %304 : vector<8x8x128xi1>, vector<8x8x128xf32>
    %306 = arith.addf %292, %305 : vector<8x8x128xf32>
    %cst_73 = arith.constant 1.000000e+00 : f32
    %307 = vector.broadcast %cst_73 : f32 to vector<8x8x128xf32>
    %308 = arith.subf %9, %307 : vector<8x8x128xf32>
    %309 = arith.mulf %308, %308 : vector<8x8x128xf32>
    %cst_74 = arith.constant -5.000000e+05 : f32
    %310 = vector.broadcast %cst_74 : f32 to vector<8x8x128xf32>
    %311 = arith.mulf %310, %309 : vector<8x8x128xf32>
    %312 = math.exp %311 : vector<8x8x128xf32>
    %cst_75 = arith.constant dense<0.000000e+00> : vector<8x8xf32>
    %313 = vector.multi_reduction <add>, %312, %cst_75 [2] : vector<8x8x128xf32> to vector<8x8xf32>
    %314 = vector.shape_cast %313 : vector<8x8xf32> to vector<8x8x1xf32>
    %c20_i32 = arith.constant 20 : i32
    %315 = vector.broadcast %c20_i32 : i32 to vector<1x1x128xi32>
    %316 = arith.cmpi eq, %13, %315 : vector<1x1x128xi32>
    %cst_76 = arith.constant 0.000000e+00 : f32
    %317 = vector.shape_cast %316 : vector<1x1x128xi1> to vector<1x1x128xi1>
    %318 = vector.broadcast %317 : vector<1x1x128xi1> to vector<8x8x128xi1>
    %319 = vector.shape_cast %314 : vector<8x8x1xf32> to vector<8x8x1xf32>
    %320 = vector.broadcast %319 : vector<8x8x1xf32> to vector<8x8x128xf32>
    %321 = vector.broadcast %cst_76 : f32 to vector<8x8x128xf32>
    %322 = arith.select %318, %320, %321 : vector<8x8x128xi1>, vector<8x8x128xf32>
    %323 = arith.addf %306, %322 : vector<8x8x128xf32>
    %324 = math.log1p %323 : vector<8x8x128xf32>
    %cst_77 = arith.constant dense<0.000000e+00> : vector<8x128xf32>
    %325 = vector.multi_reduction <add>, %324, %cst_77 [1] : vector<8x8x128xf32> to vector<8x128xf32>
    %c0_78 = arith.constant 0 : index
    %c0_79 = arith.constant 0 : index
    %326 = vector.load %arg3[%c0_78, %c0_79] : memref<8x128xf32, #tpu.memory_space<vmem>>, vector<8x128xf32>
    tpu.vector_store %arg3[%c0_78, %c0_79], %325 {strides = array<i32>} : memref<8x128xf32, #tpu.memory_space<vmem>>, vector<8x128xf32>,
    return
  }
  func.func @transform_0(%arg0: i32) -> (i32, i32, i32) {
    %c0_i32 = arith.constant 0 : i32
    %c0_i32_0 = arith.constant 0 : i32
    %c0_i32_1 = arith.constant 0 : i32
    return %arg0, %c0_i32, %c0_i32_0 : i32, i32, i32
  }
  func.func @transform_1(%arg0: i32) -> (i32, i32, i32) {
    %c0_i32 = arith.constant 0 : i32
    %c0_i32_0 = arith.constant 0 : i32
    %c0_i32_1 = arith.constant 0 : i32
    return %arg0, %c0_i32, %c0_i32_0 : i32, i32, i32
  }
  func.func @transform_2(%arg0: i32) -> (i32, i32) {
    %c0_i32 = arith.constant 0 : i32
    %c0_i32_0 = arith.constant 0 : i32
    return %arg0, %c0_i32 : i32, i32
  }
}

</mosaic_0001>

<bundles_post_ra>
// kernel: tpu_custom_call.1
= control target key start
LH: loop header
LB: loop body
LE: loop exit
PB: predicated region body
PF: predicated region fallthrough
CT: control target
= control target key end

     0   :  { %vm148_vm0 = vcmask 261120   ;;  %v3491_v3 = vmov 0.0|0.0   ;;  %vm3492_vm2 = vmmov 0   ;;  %v3493_v8 = vmov 0.0   ;;  %s5250_s0 = inlined_call_operand.vmem [shape: f32[8,8,32], index: 0, kind: input, shape index: {}]   ;;  %s5251_s1 = inlined_call_operand.vmem [shape: f32[8,128,32], index: 1, kind: input, shape index: {}]   ;;  %s5252_s2 = inlined_call_operand.hbm [shape: f32[8,128], index: 2, kind: output, shape index: {}]  }
   0x1   :  { %v20_v0 = vld [vmem:[%s5251_s1] sm:$0xff]  ;;  %v21_v1 = vld [vmem:[%s5251_s1 + $0x8] sm:$0xff]  ;;  %3095 = vmatprep.subr.bf16.mxu0 %v3491_v3  ;;  %3127 = vmatprep.subr.bf16.mxu1 %v3491_v3  ;;  %vm3523_vm1 = vmpackc.low %vm148_vm0, %vm148_vm0 }
   0x2   :  { %v36_v2 = vld [vmem:[%s5251_s1 + $0x80] sm:$0xff]  ;;  %v3096_v4 = vpack.c.bf16 %v21_v1, %v20_v0  ;;  %v37_v6 = vld [vmem:[%s5251_s1 + $0x88] sm:$0xff]  ;;  %2847 = vmatprep.mubr.msk.f32.mxu0 %vm3492_vm2, %v3493_v8  ;;  %2882 = vmatprep.mubr.msk.f32.mxu1 %vm3492_vm2, %v3493_v8  ;;  %v22_v9 = vld [vmem:[%s5251_s1 + $0x10] sm:$0xff] }
   0x3   :  { %v3128_v7 = vpack.c.bf16 %v37_v6, %v36_v2  ;;  %v23_v10 = vld [vmem:[%s5251_s1 + $0x18] sm:$0xff]  ;;  %v38_v11 = vld [vmem:[%s5251_s1 + $0x90] sm:$0xff]  ;;  %v24_v15 = vld [vmem:[%s5251_s1 + $0x20] sm:$0xff] }
   0x4   :  { %3098 = vmatpush3.bf16.xpose.msk.msra.mxu0 %vm3523_vm1, %v3096_v4  ;;  %v39_v12 = vld [vmem:[%s5251_s1 + $0x98] sm:$0xff]  ;;  %v3100_v13 = vpack.c.bf16 %v23_v10, %v22_v9  ;;  %v25_v16 = vld [vmem:[%s5251_s1 + $0x28] sm:$0xff]  ;;  %v40_v17 = vld [vmem:[%s5251_s1 + $0xa0] sm:$0xff] }
   0x5   :  { %3130 = vmatpush3.bf16.xpose.msk.msra.mxu1 %vm3523_vm1, %v3128_v7  ;;  %3099 = vmatprep.subr.bf16.mxu0 %v3491_v3  ;;  %v3132_v14 = vpack.c.bf16 %v39_v12, %v38_v11  ;;  %v41_v18 = vld [vmem:[%s5251_s1 + $0xa8] sm:$0xff]  ;;  %v3104_v19 = vpack.c.bf16 %v25_v16, %v24_v15  ;;  %v26_v21 = vld [vmem:[%s5251_s1 + $0x30] sm:$0xff]  ;;  %v27_v22 = vld [vmem:[%s5251_s1 + $0x38] sm:$0xff] }
   0x6   :  { %3131 = vmatprep.subr.bf16.mxu1 %v3491_v3  ;;  %v3136_v20 = vpack.c.bf16 %v41_v18, %v40_v17  ;;  %v42_v23 = vld [vmem:[%s5251_s1 + $0xb0] sm:$0xff]  ;;  %v43_v24 = vld [vmem:[%s5251_s1 + $0xb8] sm:$0xff]  ;;  %v3108_v25 = vpack.c.bf16 %v27_v22, %v26_v21 }
   0x7   :  { %v3140_v26 = vpack.c.bf16 %v43_v24, %v42_v23 }
   0xc   :  { %3102 = vmatpush3.bf16.xpose.msk.msra.mxu0 %vm3523_vm1, %v3100_v13 }
   0xd   :  { %3134 = vmatpush3.bf16.xpose.msk.msra.mxu1 %vm3523_vm1, %v3132_v14  ;;  %3103 = vmatprep.subr.bf16.mxu0 %v3491_v3 }
   0xe   :  { %3135 = vmatprep.subr.bf16.mxu1 %v3491_v3 }
  0x14   :  { %3106 = vmatpush3.bf16.xpose.msk.msra.mxu0 %vm3523_vm1, %v3104_v19 }
  0x15   :  { %3138 = vmatpush3.bf16.xpose.msk.msra.mxu1 %vm3523_vm1, %v3136_v20  ;;  %3107 = vmatprep.subr.bf16.mxu0 %v3491_v3 }
  0x16   :  { %3139 = vmatprep.subr.bf16.mxu1 %v3491_v3 }
  0x1c   :  { %3110 = vmatpush3.bf16.xpose.msk.msra.mxu0 %vm3523_vm1, %v3108_v25 }
  0x1d   :  { %7 = vsyncpa [#allocation3], 0  ;;  %3142 = vmatpush3.bf16.xpose.msk.msra.mxu1 %vm3523_vm1, %v3140_v26  ;;  %3111 = vmatprep.subr.bf16.mxu0 %v3491_v3  ;;  %v28_v27 = vld [vmem:[%s5251_s1 + $0x40] sm:$0xff]  ;;  %v29_v28 = vld [vmem:[%s5251_s1 + $0x48] sm:$0xff] }
  0x1e   :  { %3143 = vmatprep.subr.bf16.mxu1 %v3491_v3  ;;  %v44_v29 = vld [vmem:[%s5251_s1 + $0xc0] sm:$0xff]  ;;  %v45_v30 = vld [vmem:[%s5251_s1 + $0xc8] sm:$0xff]  ;;  %v3112_v31 = vpack.c.bf16 %v29_v28, %v28_v27  ;;  %v30_v33 = vld [vmem:[%s5251_s1 + $0x50] sm:$0xff] }
  0x1f   :  { %v3144_v32 = vpack.c.bf16 %v45_v30, %v44_v29  ;;  %v31_v34 = vld [vmem:[%s5251_s1 + $0x58] sm:$0xff]  ;;  %v46_v35 = vld [vmem:[%s5251_s1 + $0xd0] sm:$0xff]  ;;  %v32_v39 = vld [vmem:[%s5251_s1 + $0x60] sm:$0xff] }
  0x20   :  { %v47_v36 = vld [vmem:[%s5251_s1 + $0xd8] sm:$0xff]  ;;  %v3116_v37 = vpack.c.bf16 %v31_v34, %v30_v33  ;;  %v33_v40 = vld [vmem:[%s5251_s1 + $0x68] sm:$0xff]  ;;  %v48_v41 = vld [vmem:[%s5251_s1 + $0xe0] sm:$0xff] }
  0x21   :  { %v3148_v38 = vpack.c.bf16 %v47_v36, %v46_v35  ;;  %v49_v42 = vld [vmem:[%s5251_s1 + $0xe8] sm:$0xff]  ;;  %v3120_v43 = vpack.c.bf16 %v33_v40, %v32_v39  ;;  %v34_v45 = vld [vmem:[%s5251_s1 + $0x70] sm:$0xff]  ;;  %v35_v46 = vld [vmem:[%s5251_s1 + $0x78] sm:$0xff] }
  0x22   :  { %v3152_v44 = vpack.c.bf16 %v49_v42, %v48_v41  ;;  %v50_v47 = vld [vmem:[%s5251_s1 + $0xf0] sm:$0xff]  ;;  %v51_v48 = vld [vmem:[%s5251_s1 + $0xf8] sm:$0xff]  ;;  %v3124_v49 = vpack.c.bf16 %v35_v46, %v34_v45  ;;  %v52_v51 = vld [vmem:[%s5251_s1 + $0x100] sm:$0xff] }
  0x23   :  { %v3156_v50 = vpack.c.bf16 %v51_v48, %v50_v47  ;;  %v53_v52 = vld [vmem:[%s5251_s1 + $0x108] sm:$0xff]  ;;  %v68_v53 = vld [vmem:[%s5251_s1 + $0x180] sm:$0xff]  ;;  %v54_v59 = vld [vmem:[%s5251_s1 + $0x110] sm:$0xff] }
  0x24   :  { %3114 = vmatpush3.bf16.xpose.msk.msra.mxu0 %vm3523_vm1, %v3112_v31  ;;  %v69_v54 = vld [vmem:[%s5251_s1 + $0x188] sm:$0xff]  ;;  %v12_v55 = vld [vmem:[%s5250_s0] sm:$0xff]  ;;  %v3160_v56 = vpack.c.bf16 %v53_v52, %v52_v51  ;;  %v55_v60 = vld [vmem:[%s5251_s1 + $0x118] sm:$0xff] }
  0x25   :  { %3146 = vmatpush3.bf16.xpose.msk.msra.mxu1 %vm3523_vm1, %v3144_v32  ;;  %3115 = vmatprep.subr.bf16.mxu0 %v3491_v3  ;;  %v13_v57 = vld [vmem:[%s5250_s0 + $0x8] sm:$0xff]  ;;  %v3192_v58 = vpack.c.bf16 %v69_v54, %v68_v53  ;;  %v70_v61 = vld [vmem:[%s5251_s1 + $0x190] sm:$0xff]  ;;  %v71_v62 = vld [vmem:[%s5251_s1 + $0x198] sm:$0xff]  ;;  %v3164_v63 = vpack.c.bf16 %v55_v60, %v54_v59 }
  0x26   :  { %3147 = vmatprep.subr.bf16.mxu1 %v3491_v3  ;;  %v3196_v0 = vpack.c.bf16 %v71_v62, %v70_v61  ;;  %v56_v1 = vld [vmem:[%s5251_s1 + $0x120] sm:$0xff]  ;;  %v57_v2 = vld [vmem:[%s5251_s1 + $0x128] sm:$0xff]  ;;  %v58_v10 = vld [vmem:[%s5251_s1 + $0x130] sm:$0xff] }
  0x27   :  { %v72_v4 = vld [vmem:[%s5251_s1 + $0x1a0] sm:$0xff]  ;;  %v73_v6 = vld [vmem:[%s5251_s1 + $0x1a8] sm:$0xff]  ;;  %v3168_v7 = vpack.c.bf16 %v57_v2, %v56_v1  ;;  %v59_v11 = vld [vmem:[%s5251_s1 + $0x138] sm:$0xff] }
  0x28   :  { %v3200_v9 = vpack.c.bf16 %v73_v6, %v72_v4  ;;  %v74_v12 = vld [vmem:[%s5251_s1 + $0x1b0] sm:$0xff]  ;;  %v75_v13 = vld [vmem:[%s5251_s1 + $0x1b8] sm:$0xff]  ;;  %v3172_v14 = vpack.c.bf16 %v59_v11, %v58_v10  ;;  %v60_v16 = vld [vmem:[%s5251_s1 + $0x140] sm:$0xff] }
  0x29   :  { %v3204_v15 = vpack.c.bf16 %v75_v13, %v74_v12  ;;  %v61_v17 = vld [vmem:[%s5251_s1 + $0x148] sm:$0xff]  ;;  %v76_v18 = vld [vmem:[%s5251_s1 + $0x1c0] sm:$0xff]  ;;  %v62_v22 = vld [vmem:[%s5251_s1 + $0x150] sm:$0xff] }
  0x2a   :  { %v77_v19 = vld [vmem:[%s5251_s1 + $0x1c8] sm:$0xff]  ;;  %v3176_v20 = vpack.c.bf16 %v61_v17, %v60_v16  ;;  %v63_v23 = vld [vmem:[%s5251_s1 + $0x158] sm:$0xff]  ;;  %v78_v24 = vld [vmem:[%s5251_s1 + $0x1d0] sm:$0xff] }
  0x2b   :  { %v3208_v21 = vpack.c.bf16 %v77_v19, %v76_v18  ;;  %v79_v25 = vld [vmem:[%s5251_s1 + $0x1d8] sm:$0xff]  ;;  %v3180_v26 = vpack.c.bf16 %v63_v23, %v62_v22  ;;  %v64_v28 = vld [vmem:[%s5251_s1 + $0x160] sm:$0xff]  ;;  %v65_v29 = vld [vmem:[%s5251_s1 + $0x168] sm:$0xff] }
  0x2c   :  { %3118 = vmatpush3.bf16.xpose.msk.msra.mxu0 %vm3523_vm1, %v3116_v37  ;;  %v3212_v27 = vpack.c.bf16 %v79_v25, %v78_v24  ;;  %v80_v30 = vld [vmem:[%s5251_s1 + $0x1e0] sm:$0xff]  ;;  %v81_v31 = vld [vmem:[%s5251_s1 + $0x1e8] sm:$0xff]  ;;  %v3184_v32 = vpack.c.bf16 %v65_v29, %v64_v28  ;;  %v66_v34 = vld [vmem:[%s5251_s1 + $0x170] sm:$0xff] }
  0x2d   :  { %3150 = vmatpush3.bf16.xpose.msk.msra.mxu1 %vm3523_vm1, %v3148_v38  ;;  %3119 = vmatprep.subr.bf16.mxu0 %v3491_v3  ;;  %v3216_v33 = vpack.c.bf16 %v81_v31, %v80_v30  ;;  %v67_v35 = vld [vmem:[%s5251_s1 + $0x178] sm:$0xff]  ;;  %v82_v36 = vld [vmem:[%s5251_s1 + $0x1f0] sm:$0xff]  ;;  %v84_v40 = vld [vmem:[%s5251_s1 + $0x200] sm:$0xff] }
  0x2e   :  { %3151 = vmatprep.subr.bf16.mxu1 %v3491_v3  ;;  %v83_v37 = vld [vmem:[%s5251_s1 + $0x1f8] sm:$0xff]  ;;  %v3188_v38 = vpack.c.bf16 %v67_v35, %v66_v34  ;;  %v85_v41 = vld [vmem:[%s5251_s1 + $0x208] sm:$0xff]  ;;  %v100_v42 = vld [vmem:[%s5251_s1 + $0x280] sm:$0xff] }
  0x2f   :  { %v3220_v39 = vpack.c.bf16 %v83_v37, %v82_v36  ;;  %v3224_v45 = vpack.c.bf16 %v85_v41, %v84_v40  ;;  %v15_v46 = vld [vmem:[%s5250_s0 + $0x18] sm:$0xff]  ;;  %v86_v48 = vld [vmem:[%s5251_s1 + $0x210] sm:$0xff]  ;;  %v88_v54 = vld [vmem:[%s5251_s1 + $0x220] sm:$0xff] }
  0x30   :  { %v103_v51 = vld [vmem:[%s5251_s1 + $0x298] sm:$0xff]  ;;  %v90_v60 = vld [vmem:[%s5251_s1 + $0x230] sm:$0xff]  ;;  %v92_v2 = vld [vmem:[%s5251_s1 + $0x240] sm:$0xff] }
  0x31   :  { %v91_v61 = vld [vmem:[%s5251_s1 + $0x238] sm:$0xff]  ;;  %v106_v62 = vld [vmem:[%s5251_s1 + $0x2b0] sm:$0xff]  ;;  %v93_v4 = vld [vmem:[%s5251_s1 + $0x248] sm:$0xff] }
  0x32   :  { %v108_v6 = vld [vmem:[%s5251_s1 + $0x2c0] sm:$0xff]  ;;  %v94_v11 = vld [vmem:[%s5251_s1 + $0x250] sm:$0xff]  ;;  %v95_v12 = vld [vmem:[%s5251_s1 + $0x258] sm:$0xff] }
  0x33   :  { %v110_v13 = vld [vmem:[%s5251_s1 + $0x2d0] sm:$0xff]  ;;  %v96_v17 = vld [vmem:[%s5251_s1 + $0x260] sm:$0xff]  ;;  %v97_v18 = vld [vmem:[%s5251_s1 + $0x268] sm:$0xff] }
  0x34   :  { %3122 = vmatpush3.bf16.xpose.msk.msra.mxu0 %vm3523_vm1, %v3120_v43  ;;  %v101_v43 = vld [vmem:[%s5251_s1 + $0x288] sm:$0xff]  ;;  %v112_v19 = vld [vmem:[%s5251_s1 + $0x2e0] sm:$0xff]  ;;  %v98_v23 = vld [vmem:[%s5251_s1 + $0x270] sm:$0xff] }
  0x35   :  { %3154 = vmatpush3.bf16.xpose.msk.msra.mxu1 %vm3523_vm1, %v3152_v44  ;;  %3123 = vmatprep.subr.bf16.mxu0 %v3491_v3  ;;  %v14_v44 = vld [vmem:[%s5250_s0 + $0x10] sm:$0xff]  ;;  %v3256_v47 = vpack.c.bf16 %v101_v43, %v100_v42  ;;  %v99_v24 = vld [vmem:[%s5251_s1 + $0x278] sm:$0xff]  ;;  %v116_v29 = vld [vmem:[%s5251_s1 + $0x300] sm:$0xff] }
  0x36   :  { %3155 = vmatprep.subr.bf16.mxu1 %v3491_v3  ;;  %v114_v25 = vld [vmem:[%s5251_s1 + $0x2f0] sm:$0xff]  ;;  %v117_v30 = vld [vmem:[%s5251_s1 + $0x308] sm:$0xff]  ;;  %v132_v31 = vld [vmem:[%s5251_s1 + $0x380] sm:$0xff] }
  0x37   :  { %v3288_v34 = vpack.c.bf16 %v117_v30, %v116_v29  ;;  %v17_v35 = vld [vmem:[%s5250_s0 + $0x28] sm:$0xff]  ;;  %v118_v37 = vld [vmem:[%s5251_s1 + $0x310] sm:$0xff]  ;;  %v135_v40 = vld [vmem:[%s5251_s1 + $0x398] sm:$0xff] }
  0x38   :  { %v120_v43 = vld [vmem:[%s5251_s1 + $0x320] sm:$0xff] }
  0x3c   :  { %3126 = vmatpush3.bf16.xpose.msk.msra.mxu0 %vm3523_vm1, %v3124_v49  ;;  %v87_v49 = vld [vmem:[%s5251_s1 + $0x218] sm:$0xff] }
  0x3d   :  { %3158 = vmatpush3.bf16.xpose.msk.msra.mxu1 %vm3523_vm1, %v3156_v50  ;;  %3159 = vmatprep.subr.bf16.mxu0 %v3491_v3  ;;  %v102_v50 = vld [vmem:[%s5251_s1 + $0x290] sm:$0xff]  ;;  %v3228_v52 = vpack.c.bf16 %v87_v49, %v86_v48  ;;  %v123_v49 = vld [vmem:[%s5251_s1 + $0x338] sm:$0xff] }
  0x3e   :  { %3191 = vmatprep.subr.bf16.mxu1 %v3491_v3  ;;  %v3260_v53 = vpack.c.bf16 %v103_v51, %v102_v50  ;;  %v122_v48 = vld [vmem:[%s5251_s1 + $0x330] sm:$0xff]  ;;  %v139_v51 = vld [vmem:[%s5251_s1 + $0x3b8] sm:$0xff] }
  0x3f   :  { %v138_v50 = vld [vmem:[%s5251_s1 + $0x3b0] sm:$0xff] }
  0x43   :  { %2848 = vmatmul.mubr.msk.f32.vlgmr.msra.gmra.mrb[0].mxu0 %vm148_vm0, %v12_v55  ;;  %v89_v55 = vld [vmem:[%s5251_s1 + $0x228] sm:$0xff] }
  0x44   :  { %2883 = vmatmul.mubr.msk.f32.vlgmr.msra.gmra.mrb[0].mxu1 %vm148_vm0, %v13_v57  ;;  %3162 = vmatpush3.bf16.xpose.msk.msra.mxu0 %vm3523_vm1, %v3160_v56  ;;  %v104_v56 = vld [vmem:[%s5251_s1 + $0x2a0] sm:$0xff]  ;;  %v105_v57 = vld [vmem:[%s5251_s1 + $0x2a8] sm:$0xff] }
  0x45   :  { %3194 = vmatpush3.bf16.xpose.msk.msra.mxu1 %vm3523_vm1, %v3192_v58  ;;  %3163 = vmatprep.subr.bf16.mxu0 %v3491_v3  ;;  %v3232_v58 = vpack.c.bf16 %v89_v55, %v88_v54  ;;  %v3264_v59 = vpack.c.bf16 %v105_v57, %v104_v56  ;;  %v124_v54 = vld [vmem:[%s5251_s1 + $0x340] sm:$0xff]  ;;  %v125_v55 = vld [vmem:[%s5251_s1 + $0x348] sm:$0xff] }
  0x46   :  { %3195 = vmatprep.subr.bf16.mxu1 %v3491_v3  ;;  %2917 = vmatprep.mubr.msk.f32.mxu0 %vm3492_vm2, %v3493_v8  ;;  %v140_v56 = vld [vmem:[%s5251_s1 + $0x3c0] sm:$0xff]  ;;  %v141_v57 = vld [vmem:[%s5251_s1 + $0x3c8] sm:$0xff] }
  0x47   :  { %2952 = vmatprep.mubr.msk.f32.mxu1 %vm3492_vm2, %v3493_v8 }
  0x4c   :  { %3166 = vmatpush3.bf16.xpose.msk.msra.mxu0 %vm3523_vm1, %v3164_v63  ;;  %v107_v63 = vld [vmem:[%s5251_s1 + $0x2b8] sm:$0xff] }
  0x4d   :  { %3198 = vmatpush3.bf16.xpose.msk.msra.mxu1 %vm3523_vm1, %v3196_v0  ;;  %3167 = vmatprep.subr.bf16.mxu0 %v3491_v3  ;;  %v3236_v0 = vpack.c.bf16 %v91_v61, %v90_v60  ;;  %v3268_v1 = vpack.c.bf16 %v107_v63, %v106_v62  ;;  %v126_v60 = vld [vmem:[%s5251_s1 + $0x350] sm:$0xff]  ;;  %v127_v61 = vld [vmem:[%s5251_s1 + $0x358] sm:$0xff] }
  0x4e   :  { %3199 = vmatprep.subr.bf16.mxu1 %v3491_v3  ;;  %v142_v62 = vld [vmem:[%s5251_s1 + $0x3d0] sm:$0xff]  ;;  %v143_v63 = vld [vmem:[%s5251_s1 + $0x3d8] sm:$0xff] }
  0x54   :  { %3170 = vmatpush3.bf16.xpose.msk.msra.mxu0 %vm3523_vm1, %v3168_v7  ;;  %v109_v7 = vld [vmem:[%s5251_s1 + $0x2c8] sm:$0xff] }
  0x55   :  { %3202 = vmatpush3.bf16.xpose.msk.msra.mxu1 %vm3523_vm1, %v3200_v9  ;;  %3171 = vmatprep.subr.bf16.mxu0 %v3491_v3  ;;  %v3240_v9 = vpack.c.bf16 %v93_v4, %v92_v2  ;;  %v3272_v10 = vpack.c.bf16 %v109_v7, %v108_v6  ;;  %v128_v2 = vld [vmem:[%s5251_s1 + $0x360] sm:$0xff]  ;;  %v129_v4 = vld [vmem:[%s5251_s1 + $0x368] sm:$0xff] }
  0x56   :  { %3203 = vmatprep.subr.bf16.mxu1 %v3491_v3  ;;  %v144_v6 = vld [vmem:[%s5251_s1 + $0x3e0] sm:$0xff]  ;;  %v145_v7 = vld [vmem:[%s5251_s1 + $0x3e8] sm:$0xff] }
  0x5c   :  { %3174 = vmatpush3.bf16.xpose.msk.msra.mxu0 %vm3523_vm1, %v3172_v14  ;;  %v111_v14 = vld [vmem:[%s5251_s1 + $0x2d8] sm:$0xff] }
  0x5d   :  { %3206 = vmatpush3.bf16.xpose.msk.msra.mxu1 %vm3523_vm1, %v3204_v15  ;;  %3175 = vmatprep.subr.bf16.mxu0 %v3491_v3  ;;  %v3244_v15 = vpack.c.bf16 %v95_v12, %v94_v11  ;;  %v3276_v16 = vpack.c.bf16 %v111_v14, %v110_v13  ;;  %v130_v11 = vld [vmem:[%s5251_s1 + $0x370] sm:$0xff]  ;;  %v131_v12 = vld [vmem:[%s5251_s1 + $0x378] sm:$0xff] }
  0x5e   :  { %3207 = vmatprep.subr.bf16.mxu1 %v3491_v3  ;;  %v146_v13 = vld [vmem:[%s5251_s1 + $0x3f0] sm:$0xff]  ;;  %v147_v14 = vld [vmem:[%s5251_s1 + $0x3f8] sm:$0xff] }
  0x64   :  { %3178 = vmatpush3.bf16.xpose.msk.msra.mxu0 %vm3523_vm1, %v3176_v20  ;;  %v113_v20 = vld [vmem:[%s5251_s1 + $0x2e8] sm:$0xff] }
  0x65   :  { %3210 = vmatpush3.bf16.xpose.msk.msra.mxu1 %vm3523_vm1, %v3208_v21  ;;  %3179 = vmatprep.subr.bf16.mxu0 %v3491_v3  ;;  %v3248_v21 = vpack.c.bf16 %v97_v18, %v96_v17  ;;  %v3280_v22 = vpack.c.bf16 %v113_v20, %v112_v19  ;;  %v19_v17 = vld [vmem:[%s5250_s0 + $0x38] sm:$0xff]  ;;  %v1117_v18 = vlaneseq }
  0x66   :  { %3211 = vmatprep.subr.bf16.mxu1 %v3491_v3 }
  0x67   :  { %v4140_v19 = vand.u32 127, %v1117_v18 }
  0x69   :  { %vm1119_vm3 = vcmp.lt.s32.totalorder %v4140_v19, 12  ;;  %vm1261_vm4 = vcmp.eq.s32.totalorder %v4140_v19, 1  ;;  %vm1210_vm5 = vcmp.eq.s32.totalorder %v4140_v19, 0  ;;  %vm1312_vm6 = vcmp.eq.s32.totalorder %v4140_v19, 2 }
  0x6a   :  { %vm1363_vm7 = vcmp.eq.s32.totalorder %v4140_v19, 3  ;;  %vm1414_vm8 = vcmp.eq.s32.totalorder %v4140_v19, 4  ;;  %vm1489_vm9 = vcmp.eq.s32.totalorder %v4140_v19, 5  ;;  %vm1540_vm10 = vcmp.eq.s32.totalorder %v4140_v19, 6 }
  0x6b   :  { %vm5265_vm11 = vcmp.eq.s32.totalorder %v4140_v19, 10  ;;  %vm1591_vm12 = vcmp.eq.s32.totalorder %v4140_v19, 7  ;;  %vm5272_vm13 = vcmp.eq.s32.totalorder %v4140_v19, 8  ;;  %vm5264_vm14 = vcmp.eq.s32.totalorder %v4140_v19, 11 }
  0x6c   :  { %3182 = vmatpush3.bf16.xpose.msk.msra.mxu0 %vm3523_vm1, %v3180_v26  ;;  %v115_v26 = vld [vmem:[%s5251_s1 + $0x2f8] sm:$0xff]  ;;  %vm1870_vm15 = vcmp.eq.s32.totalorder %v4140_v19, 12 }
  0x6d   :  { %3214 = vmatpush3.bf16.xpose.msk.msra.mxu1 %vm3523_vm1, %v3212_v27  ;;  %3183 = vmatprep.subr.bf16.mxu0 %v3491_v3  ;;  %v3252_v27 = vpack.c.bf16 %v99_v24, %v98_v23  ;;  %v3284_v28 = vpack.c.bf16 %v115_v26, %v114_v25 }
  0x6e   :  { %3215 = vmatprep.subr.bf16.mxu1 %v3491_v3 }
  0x74   :  { %3186 = vmatpush3.bf16.xpose.msk.msra.mxu0 %vm3523_vm1, %v3184_v32  ;;  %v133_v32 = vld [vmem:[%s5251_s1 + $0x388] sm:$0xff] }
  0x75   :  { %3218 = vmatpush3.bf16.xpose.msk.msra.mxu1 %vm3523_vm1, %v3216_v33  ;;  %3187 = vmatprep.subr.bf16.mxu0 %v3491_v3  ;;  %v16_v33 = vld [vmem:[%s5250_s0 + $0x20] sm:$0xff]  ;;  %v3320_v36 = vpack.c.bf16 %v133_v32, %v132_v31 }
  0x76   :  { %3219 = vmatprep.subr.bf16.mxu1 %v3491_v3 }
  0x7c   :  { %3190 = vmatpush3.bf16.xpose.msk.msra.mxu0 %vm3523_vm1, %v3188_v38  ;;  %v119_v38 = vld [vmem:[%s5251_s1 + $0x318] sm:$0xff] }
  0x7d   :  { %3222 = vmatpush3.bf16.xpose.msk.msra.mxu1 %vm3523_vm1, %v3220_v39  ;;  %3223 = vmatprep.subr.bf16.mxu0 %v3491_v3  ;;  %v134_v39 = vld [vmem:[%s5251_s1 + $0x390] sm:$0xff]  ;;  %v3292_v41 = vpack.c.bf16 %v119_v38, %v118_v37 }
  0x7e   :  { %3255 = vmatprep.subr.bf16.mxu1 %v3491_v3  ;;  %v3324_v42 = vpack.c.bf16 %v135_v40, %v134_v39 }
  0x83   :  { %2918 = vmatmul.mubr.msk.f32.vlgmr.msra.gmra.mrb[2].mxu0 %vm148_vm0, %v14_v44  ;;  %v121_v44 = vld [vmem:[%s5251_s1 + $0x328] sm:$0xff] }
  0x84   :  { %2953 = vmatmul.mubr.msk.f32.vlgmr.msra.gmra.mrb[2].mxu1 %vm148_vm0, %v15_v46  ;;  %3226 = vmatpush3.bf16.xpose.msk.msra.mxu0 %vm3523_vm1, %v3224_v45  ;;  %v137_v45 = vld [vmem:[%s5251_s1 + $0x3a8] sm:$0xff]  ;;  %v3296_v46 = vpack.c.bf16 %v121_v44, %v120_v43 }
  0x85   :  { %3227 = vmatprep.subr.bf16.mxu0 %v3491_v3  ;;  %3258 = vmatpush3.bf16.xpose.msk.msra.mxu1 %vm3523_vm1, %v3256_v47 }
  0x86   :  { %3259 = vmatprep.subr.bf16.mxu1 %v3491_v3  ;;  %2987 = vmatprep.mubr.msk.f32.mxu0 %vm3492_vm2, %v3493_v8 }
  0x87   :  { %3022 = vmatprep.mubr.msk.f32.mxu1 %vm3492_vm2, %v3493_v8 }
  0x8c   :  { %3230 = vmatpush3.bf16.xpose.msk.msra.mxu0 %vm3523_vm1, %v3228_v52  ;;  %v3300_v52 = vpack.c.bf16 %v123_v49, %v122_v48 }
  0x8d   :  { %3231 = vmatprep.subr.bf16.mxu0 %v3491_v3  ;;  %3262 = vmatpush3.bf16.xpose.msk.msra.mxu1 %vm3523_vm1, %v3260_v53  ;;  %v3332_v53 = vpack.c.bf16 %v139_v51, %v138_v50 }
  0x8e   :  { %3263 = vmatprep.subr.bf16.mxu1 %v3491_v3 }
  0x94   :  { %3234 = vmatpush3.bf16.xpose.msk.msra.mxu0 %vm3523_vm1, %v3232_v58  ;;  %v3304_v58 = vpack.c.bf16 %v125_v55, %v124_v54 }
  0x95   :  { %3235 = vmatprep.subr.bf16.mxu0 %v3491_v3  ;;  %3266 = vmatpush3.bf16.xpose.msk.msra.mxu1 %vm3523_vm1, %v3264_v59  ;;  %v3336_v59 = vpack.c.bf16 %v141_v57, %v140_v56 }
  0x96   :  { %3267 = vmatprep.subr.bf16.mxu1 %v3491_v3 }
  0x9c   :  { %3238 = vmatpush3.bf16.xpose.msk.msra.mxu0 %vm3523_vm1, %v3236_v0  ;;  %v3308_v0 = vpack.c.bf16 %v127_v61, %v126_v60 }
  0x9d   :  { %3239 = vmatprep.subr.bf16.mxu0 %v3491_v3  ;;  %3270 = vmatpush3.bf16.xpose.msk.msra.mxu1 %vm3523_vm1, %v3268_v1  ;;  %v3340_v1 = vpack.c.bf16 %v143_v63, %v142_v62 }
  0x9e   :  { %3271 = vmatprep.subr.bf16.mxu1 %v3491_v3 }
  0xa4   :  { %3242 = vmatpush3.bf16.xpose.msk.msra.mxu0 %vm3523_vm1, %v3240_v9  ;;  %v3312_v9 = vpack.c.bf16 %v129_v4, %v128_v2 }
  0xa5   :  { %3243 = vmatprep.subr.bf16.mxu0 %v3491_v3  ;;  %3274 = vmatpush3.bf16.xpose.msk.msra.mxu1 %vm3523_vm1, %v3272_v10  ;;  %v3344_v10 = vpack.c.bf16 %v145_v7, %v144_v6 }
  0xa6   :  { %3275 = vmatprep.subr.bf16.mxu1 %v3491_v3 }
  0xac   :  { %3246 = vmatpush3.bf16.xpose.msk.msra.mxu0 %vm3523_vm1, %v3244_v15  ;;  %v3316_v15 = vpack.c.bf16 %v131_v12, %v130_v11 }
  0xad   :  { %3247 = vmatprep.subr.bf16.mxu0 %v3491_v3  ;;  %3278 = vmatpush3.bf16.xpose.msk.msra.mxu1 %vm3523_vm1, %v3276_v16  ;;  %v3348_v16 = vpack.c.bf16 %v147_v14, %v146_v13 }
  0xae   :  { %3279 = vmatprep.subr.bf16.mxu1 %v3491_v3 }
  0xb4   :  { %3250 = vmatpush3.bf16.xpose.msk.msra.mxu0 %vm3523_vm1, %v3248_v21 }
  0xb5   :  { %3251 = vmatprep.subr.bf16.mxu0 %v3491_v3  ;;  %3282 = vmatpush3.bf16.xpose.msk.msra.mxu1 %vm3523_vm1, %v3280_v22 }
  0xb6   :  { %3283 = vmatprep.subr.bf16.mxu1 %v3491_v3 }
  0xbc   :  { %3254 = vmatpush3.bf16.xpose.msk.msra.mxu0 %vm3523_vm1, %v3252_v27 }
  0xbd   :  { %3286 = vmatpush3.bf16.xpose.msk.msra.mxu1 %vm3523_vm1, %v3284_v28  ;;  %3287 = vmatprep.subr.bf16.mxu0 %v3491_v3 }
  0xbe   :  { %3319 = vmatprep.subr.bf16.mxu1 %v3491_v3 }
  0xc3   :  { %2988 = vmatmul.mubr.msk.f32.vlgmr.msra.gmra.mrb[4].mxu0 %vm148_vm0, %v16_v33 }
  0xc4   :  { %3023 = vmatmul.mubr.msk.f32.vlgmr.msra.gmra.mrb[4].mxu1 %vm148_vm0, %v17_v35  ;;  %3290 = vmatpush3.bf16.xpose.msk.msra.mxu0 %vm3523_vm1, %v3288_v34 }
  0xc5   :  { %3322 = vmatpush3.bf16.xpose.msk.msra.mxu1 %vm3523_vm1, %v3320_v36  ;;  %3291 = vmatprep.subr.bf16.mxu0 %v3491_v3 }
  0xc6   :  { %3323 = vmatprep.subr.bf16.mxu1 %v3491_v3  ;;  %3057 = vmatprep.mubr.msk.f32.mxu0 %vm3492_vm2, %v3493_v8 }
  0xc7   :  { %3092 = vmatprep.mubr.msk.f32.mxu1 %vm3492_vm2, %v3493_v8  ;;  %v136_v8 = vld [vmem:[%s5251_s1 + $0x3a0] sm:$0xff]  ;;  %vm5268_vm2 = vcmp.eq.s32.totalorder %v4140_v19, 15 }
  0xc8   :  { %v3328_v47 = vpack.c.bf16 %v137_v45, %v136_v8 }
  0xcc   :  { %3294 = vmatpush3.bf16.xpose.msk.msra.mxu0 %vm3523_vm1, %v3292_v41 }
  0xcd   :  { %3326 = vmatpush3.bf16.xpose.msk.msra.mxu1 %vm3523_vm1, %v3324_v42  ;;  %3295 = vmatprep.subr.bf16.mxu0 %v3491_v3 }
  0xce   :  { %3327 = vmatprep.subr.bf16.mxu1 %v3491_v3 }
  0xd4   :  { %3298 = vmatpush3.bf16.xpose.msk.msra.mxu0 %vm3523_vm1, %v3296_v46 }
  0xd5   :  { %3330 = vmatpush3.bf16.xpose.msk.msra.mxu1 %vm3523_vm1, %v3328_v47  ;;  %3299 = vmatprep.subr.bf16.mxu0 %v3491_v3 }
  0xd6   :  { %3331 = vmatprep.subr.bf16.mxu1 %v3491_v3 }
  0xdc   :  { %3302 = vmatpush3.bf16.xpose.msk.msra.mxu0 %vm3523_vm1, %v3300_v52 }
  0xdd   :  { %3334 = vmatpush3.bf16.xpose.msk.msra.mxu1 %vm3523_vm1, %v3332_v53  ;;  %3303 = vmatprep.subr.bf16.mxu0 %v3491_v3 }
  0xde   :  { %3335 = vmatprep.subr.bf16.mxu1 %v3491_v3 }
  0xe4   :  { %3306 = vmatpush3.bf16.xpose.msk.msra.mxu0 %vm3523_vm1, %v3304_v58 }
  0xe5   :  { %3338 = vmatpush3.bf16.xpose.msk.msra.mxu1 %vm3523_vm1, %v3336_v59  ;;  %3307 = vmatprep.subr.bf16.mxu0 %v3491_v3 }
  0xe6   :  { %3339 = vmatprep.subr.bf16.mxu1 %v3491_v3 }
  0xec   :  { %3310 = vmatpush3.bf16.xpose.msk.msra.mxu0 %vm3523_vm1, %v3308_v0 }
  0xed   :  { %3342 = vmatpush3.bf16.xpose.msk.msra.mxu1 %vm3523_vm1, %v3340_v1  ;;  %3311 = vmatprep.subr.bf16.mxu0 %v3491_v3 }
  0xee   :  { %3343 = vmatprep.subr.bf16.mxu1 %v3491_v3 }
  0xf4   :  { %3314 = vmatpush3.bf16.xpose.msk.msra.mxu0 %vm3523_vm1, %v3312_v9 }
  0xf5   :  { %3346 = vmatpush3.bf16.xpose.msk.msra.mxu1 %vm3523_vm1, %v3344_v10  ;;  %3315 = vmatprep.subr.bf16.mxu0 %v3491_v3 }
  0xf6   :  { %3347 = vmatprep.subr.bf16.mxu1 %v3491_v3  ;;  %v18_v3 = vld [vmem:[%s5250_s0 + $0x30] sm:$0xff]  ;;  %s3494_s0 = smov [#allocation2]  }
  0xf7   :  { %s2495_s1 = sshll.u32 %s3494_s0, 4  ;;  %s2496_s1 = int_to_ptr.vmem [resolvable:$true] %s2495_s1 }
  0xf8   :  { %s3467_s29 = scalar_lea.vmem %s2496_s1, 128  ;;  %p3472_p1 = scmp.lt.s32.totalorder %s2496_s1, %s2496_s1 }
  0xf9   :  { %p3468_p0 = scmp.ne.s32.totalorder %s2496_s1, %s3467_s29  ;;  %p3473_p2 = scmp.lt.s32.totalorder %s3467_s29, %s3467_s29 }
  0xfb   :  { %p3474_p3 = por %p3473_p2, %p3472_p1 }
  0xfc   :  { %3318 = vmatpush3.bf16.xpose.msk.msra.mxu0 %vm3523_vm1, %v3316_v15 }
  0xfd   :  { %3350 = vmatpush3.bf16.xpose.msk.msra.mxu1 %vm3523_vm1, %v3348_v16  ;;  %vm5266_vm1 = vcmp.eq.s32.totalorder %v4140_v19, 13  ;;  %p3475_p4 = pnand %p3474_p3, %p3468_p0 }
 0x103   :  { %3058 = vmatmul.mubr.msk.f32.vlgmr.msra.gmra.mrb[6].mxu0 %vm148_vm0, %v18_v3 }
 0x104   :  { %3093 = vmatmul.mubr.msk.f32.vlgmr.msra.gmra.mrb[6].mxu1 %vm148_vm0, %v19_v17  ;;  %vm5271_vm0 = vcmp.eq.s32.totalorder %v4140_v19, 9 }
 0x116   :  { %v266_v20 = vpop.f32.mrb[0].mxu0 }
 0x117   :  { %v1122_v5 = vsel %vm1119_vm3, %v266_v20, -100.0  ;;  %v387_v21 = vpop.f32.mrb[0].mxu1  ;;  %v2849_v22 = vpop.f32.mrb[1].mxu0 }
 0x118   :  { %v1130_v23 = vmul.f32 10.0, %v1122_v5  ;;  %v2639_v24 = vadd.f32 0.95, %v1122_v5  ;;  %v2647_v25 = vadd.f32 0.45, %v1122_v5  ;;  %v1123_v28 = vsel %vm1119_vm3, %v387_v21, -100.0 }
 0x119   :  { %v2655_v26 = vadd.f32 -0.05, %v1122_v5  ;;  %v2663_v27 = vadd.f32 -0.55, %v1122_v5  ;;  %v2884_v29 = vpop.f32.mrb[1].mxu1  ;;  %v1131_v34 = vmul.f32 10.0, %v1123_v28 }
 0x11a   :  { %v1138_v30 = vmul.f32 1.442695, %v1130_v23  ;;  %v1162_v31 = vmul.f32 %v2639_v24, %v2639_v24  ;;  %v2640_v35 = vadd.f32 0.95, %v1123_v28  ;;  %v1441_v37 = vmul.f32 %v2647_v25, %v2647_v25 }
 0x11b   :  { %v1720_v32 = vmul.f32 %v2655_v26, %v2655_v26  ;;  %v1999_v33 = vmul.f32 %v2663_v27, %v2663_v27  ;;  %v1140_v39 = vmul.f32 1.442695, %v1131_v34  ;;  %v2648_v41 = vadd.f32 0.45, %v1123_v28 }
 0x11c   :  { %v1170_v36 = vmul.f32 -50.0, %v1162_v31  ;;  %v1163_v40 = vmul.f32 %v2640_v35, %v2640_v35  ;;  %v2656_v42 = vadd.f32 -0.05, %v1123_v28  ;;  %v2664_v43 = vadd.f32 -0.55, %v1123_v28 }
 0x11d   :  { %v1728_v38 = vmul.f32 -50.0, %v1720_v32  ;;  %3355 = vpow2.f32 %v1138_v30  ;;  %v2007_v44 = vmul.f32 -50.0, %v1999_v33  ;;  %v1442_v46 = vmul.f32 %v2648_v41, %v2648_v41 }
 0x11e   :  { %v1171_v8 = vmul.f32 -50.0, %v1163_v40  ;;  %v1178_v45 = vmul.f32 1.442695, %v1170_v36  ;;  %3357 = vpow2.f32 %v1140_v39  ;;  %v1721_v47 = vmul.f32 %v2656_v42, %v2656_v42 }
 0x11f   :  { %v2000_v48 = vmul.f32 %v2664_v43, %v2664_v43  ;;  %v1449_v49 = vmul.f32 -50.0, %v1441_v37  ;;  %v1736_v51 = vmul.f32 1.442695, %v1728_v38  ;;  %v1450_v52 = vmul.f32 -50.0, %v1442_v46 }
 0x120   :  { %3359 = vpow2.f32 %v1178_v45  ;;  %v1180_v50 = vmul.f32 1.442695, %v1171_v8  ;;  %v1729_v53 = vmul.f32 -50.0, %v1721_v47  ;;  %v2672_v55 = vadd.f32 -1.0, %v1123_v28 }
 0x121   :  { %v2008_v54 = vmul.f32 -50.0, %v2000_v48  ;;  %v2015_v56 = vmul.f32 1.442695, %v2007_v44  ;;  %v1459_v57 = vmul.f32 1.442695, %v1450_v52  ;;  %v2671_v60 = vadd.f32 -1.0, %v1122_v5 }
 0x122   :  { %3361 = vpow2.f32 %v1180_v50  ;;  %v1738_v58 = vmul.f32 1.442695, %v1729_v53  ;;  %v1457_v61 = vmul.f32 1.442695, %v1449_v49  ;;  %v2279_v62 = vmul.f32 %v2672_v55, %v2672_v55 }
 0x123   :  { %v2017_v59 = vmul.f32 1.442695, %v2008_v54  ;;  %3363 = vpow2.f32 %v1736_v51  ;;  %v2278_v0 = vmul.f32 %v2671_v60, %v2671_v60 }
 0x124   :  { %3365 = vpow2.f32 %v2015_v56  ;;  %v2287_v2 = vmul.f32 -500000.0, %v2279_v62 }
 0x125   :  { %3367 = vpow2.f32 %v1459_v57  ;;  %v2286_v7 = vmul.f32 -500000.0, %v2278_v0 }
 0x126   :  { %3369 = vpow2.f32 %v1738_v58  ;;  %v2296_v10 = vmul.f32 1.442695, %v2287_v2 }
 0x127   :  { %3371 = vpow2.f32 %v2017_v59  ;;  %v4147_v63 = vpop.eup %3355  ;;  %v2294_v16 = vmul.f32 1.442695, %v2286_v7 }
 0x128   :  { %3373 = vpow2.f32 %v1457_v61  ;;  %v4149_v1 = vpop.eup %3357 }
 0x129   :  { %3375 = vpow2.f32 %v2296_v10 }
 0x12a   :  { %v3360_v4 = vpop.eup %3359  ;;  %3377 = vpow2.f32 %v2294_v16 }
 0x12b   :  { %1194 = vadd.xlane.f32.xlu0 %v3360_v4  ;;  %v1229_v44 = vmul.f32 %v3360_v4, %v4147_v63 }
 0x12c   :  { %v3362_v6 = vpop.eup %3361 }
 0x12d   :  { %v3364_v9 = vpop.eup %3363  ;;  %v1230_v37 = vmul.f32 %v3362_v6, %v4149_v1  ;;  %v1237_v49 = vmul.f32 8103.084, %v1229_v44 }
 0x12e   :  { %v3366_v11 = vpop.eup %3365  ;;  %v1787_v12 = vmul.f32 %v3364_v9, %v4147_v63 }
 0x12f   :  { %v3368_v13 = vpop.eup %3367  ;;  %1196 = vadd.xlane.f32.xlu0 %v3362_v6  ;;  %v2066_v14 = vmul.f32 %v3366_v11, %v4147_v63  ;;  %v1238_v46 = vmul.f32 8103.084, %v1230_v37  ;;  %v1280_v54 = vmul.f32 %v4147_v63, %v1237_v49 }
 0x130   :  { %v3370_v15 = vpop.eup %3369  ;;  %1475 = vadd.xlane.f32.xlu1 %v3368_v13  ;;  %v1795_v3 = vmul.f32 0.36787945, %v1787_v12  ;;  %v1509_v47 = vmul.f32 %v3368_v13, %v4149_v1 }
 0x131   :  { %v3372_v17 = vpop.eup %3371  ;;  %v1788_v18 = vmul.f32 %v3370_v15, %v4149_v1  ;;  %v2074_v20 = vmul.f32 0.0024787523, %v2066_v14  ;;  %v1281_v53 = vmul.f32 %v4149_v1, %v1238_v46  ;;  %v1288_v57 = vmul.f32 2980.958, %v1280_v54 }
 0x132   :  { %v3374_v5 = vpop.eup %3373  ;;  %v2067_v21 = vmul.f32 %v3372_v17, %v4149_v1  ;;  %v1838_v22 = vmul.f32 %v4147_v63, %v1795_v3  ;;  %v1517_v51 = vmul.f32 54.59815, %v1509_v47 }
 0x133   :  { %1473 = vadd.xlane.f32.xlu0 %v3374_v5  ;;  %v1796_v23 = vmul.f32 0.36787945, %v1788_v18  ;;  %v2117_v24 = vmul.f32 %v4147_v63, %v2074_v20  ;;  %v3376_v40 = vpop.eup %3375  ;;  %v1508_v50 = vmul.f32 %v3374_v5, %v4147_v63  ;;  %v1289_v55 = vmul.f32 2980.958, %v1281_v53 }
 0x134   :  { %1754 = vadd.xlane.f32.xlu1 %v3370_v15  ;;  %v2075_v25 = vmul.f32 0.0024787523, %v2067_v21  ;;  %v4157_v26 = vmul.f32 0.13533528, %v1838_v22  ;;  %v3378_v45 = vpop.eup %3377  ;;  %v1560_v56 = vmul.f32 %v4149_v1, %v1517_v51  ;;  %v1331_v14 = vmul.f32 %v4147_v63, %v1288_v57 }
 0x135   :  { %v1839_v27 = vmul.f32 %v4149_v1, %v1796_v23  ;;  %v4160_v28 = vmul.f32 0.000911882, %v2117_v24  ;;  %v1516_v52 = vmul.f32 54.59815, %v1508_v50 }
 0x136   :  { %v2118_v29 = vmul.f32 %v4149_v1, %v2075_v25  ;;  %v1889_v30 = vmul.f32 %v4147_v63, %v4157_v26  ;;  %v1568_v59 = vmul.f32 20.085537, %v1560_v56  ;;  %v1339_v24 = vmul.f32 1096.6332, %v1331_v14 }
 0x137   :  { %1752 = vadd.xlane.f32.xlu0 %v3364_v9  ;;  %v1847_v31 = vmul.f32 0.13533528, %v1839_v27  ;;  %v2168_v32 = vmul.f32 %v4147_v63, %v4160_v28  ;;  %v1559_v58 = vmul.f32 %v4147_v63, %v1516_v52 }
 0x138   :  { %2033 = vadd.xlane.f32.xlu1 %v3372_v17  ;;  %v2126_v33 = vmul.f32 0.000911882, %v2118_v29  ;;  %v4167_v34 = vmul.f32 0.049787067, %v1889_v30  ;;  %v1611_v5 = vmul.f32 %v4149_v1, %v1568_v59 }
 0x139   :  { %v1890_v35 = vmul.f32 %v4149_v1, %v1847_v31  ;;  %v4170_v36 = vmul.f32 0.00033546262, %v2168_v32  ;;  %v1567_v60 = vmul.f32 20.085537, %v1559_v58 }
 0x13a   :  { %v2169_v38 = vmul.f32 %v4149_v1, %v2126_v33  ;;  %v4176_v39 = vmul.f32 %v4147_v63, %v4167_v34 }
 0x13b   :  { %2031 = vadd.xlane.f32.xlu0 %v3366_v11  ;;  %v4178_v41 = vmul.f32 0.049787067, %v1890_v35  ;;  %v4182_v42 = vmul.f32 %v4147_v63, %v4170_v36  ;;  %v1332_v11 = vmul.f32 %v4149_v1, %v1289_v55  ;;  %v1610_v27 = vmul.f32 %v4147_v63, %v1567_v60 }
 0x13c   :  { %2312 = vadd.xlane.f32.xlu1 %v3376_v40  ;;  %v4184_v43 = vmul.f32 0.00033546262, %v2169_v38 }
 0x13d   :  { %v4189_v8 = vmul.f32 %v4149_v1, %v4178_v41  ;;  %v1340_v18 = vmul.f32 1096.6332, %v1332_v11 }
 0x13e   :  { %v4194_v48 = vmul.f32 %v4149_v1, %v4184_v43 }
 0x13f   :  { %2310 = vadd.xlane.f32.xlu0 %v3378_v45  ;;  %v1383_v45 = vmul.f32 %v4149_v1, %v1340_v18 }
 0x140   :  { %1247 = vadd.xlane.f32.xlu1 %v1238_v46 }
 0x143   :  { %1245 = vadd.xlane.f32.xlu0 %v1237_v49 }
 0x144   :  { %1526 = vadd.xlane.f32.xlu1 %v1517_v51 }
 0x147   :  { %1524 = vadd.xlane.f32.xlu0 %v1516_v52  ;;  %v1382_v52 = vmul.f32 %v4147_v63, %v1339_v24 }
 0x148   :  { %1805 = vadd.xlane.f32.xlu1 %v1796_v23 }
 0x14b   :  { %1803 = vadd.xlane.f32.xlu0 %v1795_v3 }
 0x14c   :  { %2084 = vadd.xlane.f32.xlu1 %v2075_v25 }
 0x14f   :  { %2082 = vadd.xlane.f32.xlu0 %v2074_v20 }
 0x150   :  { %1298 = vadd.xlane.f32.xlu1 %v1289_v55 }
 0x153   :  { %1296 = vadd.xlane.f32.xlu0 %v1288_v57 }
 0x154   :  { %1577 = vadd.xlane.f32.xlu1 %v1568_v59 }
 0x156   :  { %v508_v61 = vpop.f32.mrb[2].mxu0 }
 0x157   :  { %v4203_v62 = vsel %vm1119_vm3, %v508_v61, -100.0  ;;  %v629_v0 = vpop.f32.mrb[2].mxu1  ;;  %v2919_v2 = vpop.f32.mrb[3].mxu0  ;;  %1575 = vadd.xlane.f32.xlu0 %v1567_v60  ;;  %v1390_v60 = vmul.f32 403.4288, %v1382_v52 }
 0x158   :  { %5275 = vst [vmem:[#allocation5_spill] sm:$0xff] %v4203_v62  ;;  %1856 = vadd.xlane.f32.xlu1 %v1847_v31  ;;  %v2657_v4 = vadd.f32 -0.05, %v4203_v62  ;;  %v2665_v6 = vadd.f32 -0.55, %v4203_v62  ;;  %v2954_v7 = vpop.f32.mrb[3].mxu1 }
 0x159   :  { %v1132_v9 = vmul.f32 10.0, %v4203_v62  ;;  %v4211_v12 = vsel %vm1119_vm3, %v629_v0, -100.0  ;;  %v1619_v31 = vmul.f32 7.389056, %v1611_v5  ;;  %v2641_v35 = vadd.f32 0.95, %v4203_v62 }
 0x15a   :  { %v1722_v10 = vmul.f32 %v2657_v4, %v2657_v4  ;;  %5276 = vst [vmem:[#allocation6_spill] sm:$0xff] %v4211_v12  ;;  %v2001_v13 = vmul.f32 %v2665_v6, %v2665_v6  ;;  %v1133_v16 = vmul.f32 10.0, %v4211_v12  ;;  %v2658_v3 = vadd.f32 -0.05, %v4211_v12 }
 0x15b   :  { %1854 = vadd.xlane.f32.xlu0 %v4157_v26  ;;  %v1142_v17 = vmul.f32 1.442695, %v1132_v9  ;;  %v2666_v20 = vadd.f32 -0.55, %v4211_v12  ;;  %v2649_v38 = vadd.f32 0.45, %v4203_v62  ;;  %v1164_v44 = vmul.f32 %v2641_v35, %v2641_v35 }
 0x15c   :  { %2135 = vadd.xlane.f32.xlu1 %v2126_v33  ;;  %v1730_v15 = vmul.f32 -50.0, %v1722_v10  ;;  %v1723_v21 = vmul.f32 %v2658_v3, %v2658_v3  ;;  %v2009_v22 = vmul.f32 -50.0, %v2001_v13  ;;  %v1144_v25 = vmul.f32 1.442695, %v1133_v16 }
 0x15d   :  { %v2002_v23 = vmul.f32 %v2666_v20, %v2666_v20  ;;  %3379 = vpow2.f32 %v1142_v17  ;;  %v2642_v40 = vadd.f32 0.95, %v4211_v12  ;;  %v1443_v47 = vmul.f32 %v2649_v38, %v2649_v38 }
 0x15e   :  { %v1731_v26 = vmul.f32 -50.0, %v1723_v21  ;;  %v1740_v29 = vmul.f32 1.442695, %v1730_v15  ;;  %v2019_v33 = vmul.f32 1.442695, %v2009_v22  ;;  %v1172_v50 = vmul.f32 -50.0, %v1164_v44 }
 0x15f   :  { %2133 = vadd.xlane.f32.xlu0 %v4160_v28  ;;  %v2010_v30 = vmul.f32 -50.0, %v2002_v23  ;;  %v1618_v28 = vmul.f32 7.389056, %v1610_v27  ;;  %v1165_v49 = vmul.f32 %v2642_v40, %v2642_v40  ;;  %v2650_v51 = vadd.f32 0.45, %v4211_v12 }
 0x160   :  { %1349 = vadd.xlane.f32.xlu1 %v1340_v18  ;;  %v1742_v32 = vmul.f32 1.442695, %v1731_v26  ;;  %3381 = vpow2.f32 %v1740_v29  ;;  %v1662_v54 = vmul.f32 %v4149_v1, %v1619_v31  ;;  %v1182_v61 = vmul.f32 1.442695, %v1172_v50 }
 0x161   :  { %3383 = vpow2.f32 %v1144_v25  ;;  %v2021_v37 = vmul.f32 1.442695, %v2010_v30  ;;  %v1173_v57 = vmul.f32 -50.0, %v1165_v49  ;;  %v1444_v59 = vmul.f32 %v2650_v51, %v2650_v51 }
 0x162   :  { %3385 = vpow2.f32 %v1742_v32  ;;  %v1670_v2 = vmul.f32 2.7182817, %v1662_v54  ;;  %v1949_v3 = vmul.f32 0.01831564, %v4189_v8  ;;  %v1948_v21 = vmul.f32 0.01831564, %v4176_v39 }
 0x163   :  { %1347 = vadd.xlane.f32.xlu0 %v1339_v24  ;;  %3387 = vpow2.f32 %v2019_v33  ;;  %v1184_v9 = vmul.f32 1.442695, %v1173_v57  ;;  %v1452_v14 = vmul.f32 -50.0, %v1444_v59  ;;  %v2228_v26 = vmul.f32 0.0001234098, %v4194_v48 }
 0x164   :  { %1628 = vadd.xlane.f32.xlu1 %v1619_v31  ;;  %3389 = vpow2.f32 %v2021_v37  ;;  %v2227_v48 = vmul.f32 0.0001234098, %v4182_v42 }
 0x165   :  { %3391 = vpow2.f32 %v1182_v61  ;;  %v1463_v23 = vmul.f32 1.442695, %v1452_v14 }
 0x167   :  { %1626 = vadd.xlane.f32.xlu0 %v1618_v28  ;;  %v4227_v46 = vpop.eup %3379 }
 0x168   :  { %1907 = vadd.xlane.f32.xlu1 %v4178_v41  ;;  %v1391_v41 = vmul.f32 403.4288, %v1383_v45 }
 0x16a   :  { %v4232_v53 = vpop.eup %3381 }
 0x16b   :  { %1905 = vadd.xlane.f32.xlu0 %v4167_v34  ;;  %v4235_v55 = vpop.eup %3383  ;;  %v1661_v34 = vmul.f32 %v4147_v63, %v1618_v28  ;;  %v1789_v56 = vmul.f32 %v4232_v53, %v4227_v46 }
 0x16c   :  { %2186 = vadd.xlane.f32.xlu1 %v4184_v43  ;;  %v1451_v43 = vmul.f32 -50.0, %v1443_v47  ;;  %v4241_v58 = vpop.eup %3385 }
 0x16d   :  { %v4243_v0 = vmul.f32 0.36787945, %v1789_v56  ;;  %v3388_v1 = vpop.eup %3387  ;;  %v1669_v63 = vmul.f32 2.7182817, %v1661_v34 }
 0x16e   :  { %v3390_v4 = vpop.eup %3389  ;;  %v2068_v6 = vmul.f32 %v3388_v1, %v4227_v46  ;;  %v1461_v10 = vmul.f32 1.442695, %v1451_v43 }
 0x16f   :  { %2184 = vadd.xlane.f32.xlu0 %v4170_v36  ;;  %v1790_v36 = vmul.f32 %v4241_v58, %v4235_v55  ;;  %v1840_v7 = vmul.f32 %v4227_v46, %v4243_v0  ;;  %v2069_v13 = vmul.f32 %v3390_v4, %v4235_v55  ;;  %v3392_v37 = vpop.eup %3391 }
 0x170   :  { %1400 = vadd.xlane.f32.xlu1 %v1391_v41  ;;  %v4253_v15 = vmul.f32 0.0024787523, %v2068_v6  ;;  %3393 = vpow2.f32 %v1461_v10  ;;  %v1231_v47 = vmul.f32 %v3392_v37, %v4227_v46 }
 0x171   :  { %v4250_v11 = vmul.f32 0.36787945, %v1790_v36  ;;  %v4255_v16 = vmul.f32 0.13533528, %v1840_v7  ;;  %v4258_v17 = vmul.f32 0.0024787523, %v2069_v13  ;;  %3395 = vpow2.f32 %v1184_v9 }
 0x172   :  { %v2119_v20 = vmul.f32 %v4227_v46, %v4253_v15  ;;  %3397 = vpow2.f32 %v1463_v23  ;;  %v1239_v49 = vmul.f32 8103.084, %v1231_v47 }
 0x173   :  { %1398 = vadd.xlane.f32.xlu0 %v1390_v60  ;;  %v1841_v18 = vmul.f32 %v4235_v55, %v4250_v11  ;;  %v1891_v5 = vmul.f32 %v4227_v46, %v4255_v16  ;;  %v2120_v8 = vmul.f32 %v4235_v55, %v4258_v17 }
 0x174   :  { %1679 = vadd.xlane.f32.xlu1 %v1670_v2  ;;  %v4271_v24 = vmul.f32 0.000911882, %v2119_v20 }
 0x175   :  { %v4267_v22 = vmul.f32 0.13533528, %v1841_v18  ;;  %v4273_v25 = vmul.f32 0.049787067, %v1891_v5  ;;  %v4276_v27 = vmul.f32 0.000911882, %v2120_v8 }
 0x176   :  { %v2170_v39 = vmul.f32 %v4227_v46, %v4271_v24 }
 0x177   :  { %1677 = vadd.xlane.f32.xlu0 %v1669_v63  ;;  %v1892_v29 = vmul.f32 %v4235_v55, %v4267_v22  ;;  %v4284_v30 = vmul.f32 %v4227_v46, %v4273_v25  ;;  %v2171_v32 = vmul.f32 %v4235_v55, %v4276_v27 }
 0x178   :  { %1958 = vadd.xlane.f32.xlu1 %v1949_v3  ;;  %v4291_v33 = vmul.f32 0.00033546262, %v2170_v39 }
 0x179   :  { %v4286_v31 = vmul.f32 0.049787067, %v1892_v29  ;;  %v4293_v35 = vmul.f32 0.00033546262, %v2171_v32 }
 0x17a   :  { %v4301_v38 = vmul.f32 %v4227_v46, %v4291_v33  ;;  %v3394_v42 = vpop.eup %3393 }
 0x17b   :  { %1956 = vadd.xlane.f32.xlu0 %v1948_v21  ;;  %v4297_v28 = vmul.f32 %v4235_v55, %v4286_v31  ;;  %v4305_v40 = vmul.f32 %v4235_v55, %v4293_v35  ;;  %v3396_v44 = vpop.eup %3395  ;;  %v1510_v50 = vmul.f32 %v3394_v42, %v4227_v46 }
 0x17c   :  { %2237 = vadd.xlane.f32.xlu1 %v2228_v26  ;;  %v3398_v45 = vpop.eup %3397  ;;  %v1232_v51 = vmul.f32 %v3396_v44, %v4235_v55 }
 0x17d   :  { %v1518_v52 = vmul.f32 54.59815, %v1510_v50  ;;  %v1511_v54 = vmul.f32 %v3398_v45, %v4235_v55 }
 0x17e   :  { %v1240_v41 = vmul.f32 8103.084, %v1232_v51 }
 0x17f   :  { %2235 = vadd.xlane.f32.xlu0 %v2227_v48  ;;  %v1519_v34 = vmul.f32 54.59815, %v1511_v54 }
 0x180   :  { %1198 = vadd.xlane.f32.xlu1 %v3392_v37  ;;  %v1283_v9 = vmul.f32 %v4235_v55, %v1240_v41 }
 0x182   :  { %v1291_v3 = vmul.f32 2980.958, %v1283_v9 }
 0x183   :  { %1477 = vadd.xlane.f32.xlu0 %v3394_v42 }
 0x184   :  { %1200 = vadd.xlane.f32.xlu1 %v3396_v44 }
 0x187   :  { %1756 = vadd.xlane.f32.xlu0 %v4232_v53 }
 0x188   :  { %1479 = vadd.xlane.f32.xlu1 %v3398_v45 }
 0x18b   :  { %2035 = vadd.xlane.f32.xlu0 %v3388_v1  ;;  %v1282_v1 = vmul.f32 %v4227_v46, %v1239_v49 }
 0x18c   :  { %1758 = vadd.xlane.f32.xlu1 %v4241_v58 }
 0x18d   :  { %v1290_v6 = vmul.f32 2980.958, %v1282_v1 }
 0x18f   :  { %1249 = vadd.xlane.f32.xlu0 %v1239_v49  ;;  %v1333_v18 = vmul.f32 %v4227_v46, %v1290_v6 }
 0x190   :  { %2037 = vadd.xlane.f32.xlu1 %v3390_v4 }
 0x191   :  { %v1341_v5 = vmul.f32 1096.6332, %v1333_v18 }
 0x193   :  { %1528 = vadd.xlane.f32.xlu0 %v1518_v52 }
 0x194   :  { %1251 = vadd.xlane.f32.xlu1 %v1240_v41 }
 0x196   :  { %v750_v53 = vpop.f32.mrb[4].mxu0 }
 0x197   :  { %v4315_v56 = vsel %vm1119_vm3, %v750_v53, -100.0  ;;  %v4317_v43 = vpop.f32.mrb[4].mxu1  ;;  %v2989_v57 = vpop.f32.mrb[5].mxu0  ;;  %1807 = vadd.xlane.f32.xlu0 %v4243_v0  ;;  %v1561_v0 = vmul.f32 %v4227_v46, %v1518_v52  ;;  %v1384_v53 = vmul.f32 %v4227_v46, %v1341_v5 }
 0x198   :  { %5277 = vst [vmem:[#allocation7_spill] sm:$0xff] %v4315_v56  ;;  %v2651_v58 = vadd.f32 0.45, %v4315_v56  ;;  %1530 = vadd.xlane.f32.xlu1 %v1519_v34  ;;  %v1134_v59 = vmul.f32 10.0, %v4315_v56  ;;  %v2659_v60 = vadd.f32 -0.05, %v4315_v56 }
 0x199   :  { %v3024_v61 = vpop.f32.mrb[5].mxu1  ;;  %v1569_v13 = vmul.f32 20.085537, %v1561_v0  ;;  %v2643_v29 = vadd.f32 0.95, %v4315_v56  ;;  %v4373_v54 = vsel %vm1119_vm3, %v4317_v43, -100.0 }
 0x19a   :  { %v1445_v2 = vmul.f32 %v2651_v58, %v2651_v58  ;;  %v1724_v36 = vmul.f32 %v2659_v60, %v2659_v60  ;;  %v1146_v4 = vmul.f32 1.442695, %v1134_v59  ;;  %5278 = vst [vmem:[#allocation8_spill] sm:$0xff] %v4373_v54  ;;  %v2668_v57 = vadd.f32 -0.55, %v4373_v54 }
 0x19b   :  { %2086 = vadd.xlane.f32.xlu0 %v4253_v15  ;;  %v1562_v15 = vmul.f32 %v4235_v55, %v1519_v34  ;;  %v1612_v21 = vmul.f32 %v4227_v46, %v1569_v13  ;;  %v1166_v45 = vmul.f32 %v2643_v29, %v2643_v29  ;;  %v2644_v60 = vadd.f32 0.95, %v4373_v54 }
 0x19c   :  { %1809 = vadd.xlane.f32.xlu1 %v4250_v11  ;;  %v1453_v63 = vmul.f32 -50.0, %v1445_v2  ;;  %v1732_v7 = vmul.f32 -50.0, %v1724_v36  ;;  %3399 = vpow2.f32 %v1146_v4  ;;  %v1392_v1 = vmul.f32 403.4288, %v1384_v53 }
 0x19d   :  { %v1570_v11 = vmul.f32 20.085537, %v1562_v15  ;;  %v1174_v52 = vmul.f32 -50.0, %v1166_v45  ;;  %v1167_v4 = vmul.f32 %v2644_v60, %v2644_v60  ;;  %v2229_v15 = vmul.f32 0.0001234098, %v4301_v38 }
 0x19e   :  { %v1465_v10 = vmul.f32 1.442695, %v1453_v63  ;;  %v1744_v14 = vmul.f32 1.442695, %v1732_v7  ;;  %v2652_v63 = vadd.f32 0.45, %v4373_v54 }
 0x19f   :  { %1300 = vadd.xlane.f32.xlu0 %v1290_v6  ;;  %v1613_v37 = vmul.f32 %v4235_v55, %v1570_v11  ;;  %v1186_v59 = vmul.f32 1.442695, %v1174_v52  ;;  %v2667_v18 = vadd.f32 -0.55, %v4315_v56 }
 0x1a0   :  { %2088 = vadd.xlane.f32.xlu1 %v4258_v17  ;;  %3401 = vpow2.f32 %v1465_v10 }
 0x1a1   :  { %3403 = vpow2.f32 %v1744_v14  ;;  %v1621_v49 = vmul.f32 7.389056, %v1613_v37  ;;  %v1446_v14 = vmul.f32 %v2652_v63, %v2652_v63  ;;  %v2003_v38 = vmul.f32 %v2667_v18, %v2667_v18 }
 0x1a2   :  { %3405 = vpow2.f32 %v1186_v59 }
 0x1a3   :  { %1579 = vadd.xlane.f32.xlu0 %v1569_v13  ;;  %v1664_v9 = vmul.f32 %v4235_v55, %v1621_v49  ;;  %v1175_v13 = vmul.f32 -50.0, %v1167_v4  ;;  %v2011_v52 = vmul.f32 -50.0, %v2003_v38 }
 0x1a4   :  { %1302 = vadd.xlane.f32.xlu1 %v1291_v3 }
 0x1a6   :  { %v4332_v20 = vpop.eup %3399 }
 0x1a7   :  { %1858 = vadd.xlane.f32.xlu0 %v4255_v16  ;;  %v1334_v16 = vmul.f32 %v4235_v55, %v1291_v3 }
 0x1a8   :  { %1581 = vadd.xlane.f32.xlu1 %v1570_v11  ;;  %v1672_v11 = vmul.f32 2.7182817, %v1664_v9 }
 0x1a9   :  { %v1342_v48 = vmul.f32 1096.6332, %v1334_v16 }
 0x1aa   :  { %v4335_v17 = vpop.eup %3401 }
 0x1ab   :  { %2137 = vadd.xlane.f32.xlu0 %v4271_v24  ;;  %v1512_v8 = vmul.f32 %v4335_v17, %v4332_v20  ;;  %v4341_v23 = vpop.eup %3403  ;;  %v1385_v36 = vmul.f32 %v4235_v55, %v1342_v48 }
 0x1ac   :  { %1860 = vadd.xlane.f32.xlu1 %v4267_v22  ;;  %v1791_v24 = vmul.f32 %v4341_v23, %v4332_v20  ;;  %v1620_v22 = vmul.f32 7.389056, %v1612_v21  ;;  %v1454_v21 = vmul.f32 -50.0, %v1446_v14  ;;  %v3406_v29 = vpop.eup %3405 }
 0x1ad   :  { %v4344_v26 = vmul.f32 54.59815, %v1512_v8  ;;  %v1393_v7 = vmul.f32 403.4288, %v1385_v36 }
 0x1ae   :  { %v4352_v32 = vmul.f32 0.36787945, %v1791_v24  ;;  %v1663_v2 = vmul.f32 %v4227_v46, %v1620_v22  ;;  %v1188_v24 = vmul.f32 1.442695, %v1175_v13  ;;  %v1467_v45 = vmul.f32 1.442695, %v1454_v21 }
 0x1af   :  { %1351 = vadd.xlane.f32.xlu0 %v1341_v5  ;;  %v1563_v39 = vmul.f32 %v4332_v20, %v4344_v26 }
 0x1b0   :  { %2139 = vadd.xlane.f32.xlu1 %v4276_v27  ;;  %v1842_v42 = vmul.f32 %v4332_v20, %v4352_v32  ;;  %v1671_v0 = vmul.f32 2.7182817, %v1663_v2 }
 0x1b1   :  { %v4357_v44 = vmul.f32 20.085537, %v1563_v39  ;;  %v1135_v39 = vmul.f32 10.0, %v4373_v54 }
 0x1b2   :  { %v4359_v47 = vmul.f32 0.13533528, %v1842_v42 }
 0x1b3   :  { %1630 = vadd.xlane.f32.xlu0 %v1620_v22  ;;  %v1614_v27 = vmul.f32 %v4332_v20, %v4357_v44  ;;  %v1950_v22 = vmul.f32 0.01831564, %v4284_v30  ;;  %v1148_v53 = vmul.f32 1.442695, %v1135_v39 }
 0x1b4   :  { %1353 = vadd.xlane.f32.xlu1 %v1342_v48  ;;  %v1893_v51 = vmul.f32 %v4332_v20, %v4359_v47 }
 0x1b5   :  { %v4364_v50 = vmul.f32 7.389056, %v1614_v27 }
 0x1b7   :  { %1909 = vadd.xlane.f32.xlu0 %v4273_v25  ;;  %v4378_v34 = vmul.f32 %v4332_v20, %v4364_v50  ;;  %v4380_v25 = vmul.f32 0.049787067, %v1893_v51 }
 0x1b8   :  { %1632 = vadd.xlane.f32.xlu1 %v1621_v49  ;;  %v4368_v41 = vpop.xlane.xlu0 %1194  ;;  %v1951_v49 = vmul.f32 0.01831564, %v4297_v28  ;;  %v2230_v28 = vmul.f32 0.0001234098, %v4305_v40 }
 0x1b9   :  { %v4387_v43 = vmul.f32 %v4332_v20, %v4380_v25  ;;  %v1213_v59 = vsel %vm1210_vm5, %v4368_v41, 0.0  ;;  %v1233_v41 = vmul.f32 %v3406_v29, %v4332_v20 }
 0x1bb   :  { %2188 = vadd.xlane.f32.xlu0 %v4291_v33  ;;  %v2004_v33 = vmul.f32 %v2668_v57, %v2668_v57 }
 0x1bc   :  { %1911 = vadd.xlane.f32.xlu1 %v4286_v31  ;;  %v1197_v58 = vpop.xlane.xlu0 %1196 }
 0x1bd   :  { %v4390_v61 = vpop.xlane.xlu1 %1475  ;;  %v2012_v46 = vmul.f32 -50.0, %v2004_v33  ;;  %v1214_v27 = vsel %vm1210_vm5, %v1197_v58, 0.0  ;;  %v2023_v33 = vmul.f32 1.442695, %v2011_v52 }
 0x1bf   :  { %1402 = vadd.xlane.f32.xlu0 %v1392_v1  ;;  %v2025_v55 = vmul.f32 1.442695, %v2012_v46 }
 0x1c0   :  { %2190 = vadd.xlane.f32.xlu1 %v4293_v35  ;;  %v4395_v31 = vpop.xlane.xlu0 %1473  ;;  %v2660_v35 = vadd.f32 -0.05, %v4373_v54 }
 0x1c1   :  { %v4398_v6 = vpop.xlane.xlu1 %1754  ;;  %3407 = vpow2.f32 %v2025_v55 }
 0x1c2   :  { %v1725_v8 = vmul.f32 %v2660_v35, %v2660_v35  ;;  %3409 = vpow2.f32 %v1188_v24 }
 0x1c3   :  { %1681 = vadd.xlane.f32.xlu0 %v1671_v0  ;;  %3411 = vpow2.f32 %v1467_v45 }
 0x1c4   :  { %1404 = vadd.xlane.f32.xlu1 %v1393_v7  ;;  %v4401_v10 = vpop.xlane.xlu0 %1752  ;;  %v1733_v37 = vmul.f32 -50.0, %v1725_v8  ;;  %3413 = vpow2.f32 %v1148_v53 }
 0x1c5   :  { %v4404_v3 = vpop.xlane.xlu1 %2033 }
 0x1c6   :  { %v1746_v1 = vmul.f32 1.442695, %v1733_v37 }
 0x1c7   :  { %2239 = vadd.xlane.f32.xlu0 %v2229_v15 }
 0x1c8   :  { %1683 = vadd.xlane.f32.xlu1 %v1672_v11  ;;  %v4408_v5 = vpop.xlane.xlu0 %2031  ;;  %3415 = vpow2.f32 %v1746_v1  ;;  %v1241_v11 = vmul.f32 8103.084, %v1233_v41 }
 0x1c9   :  { %v4410_v16 = vpop.xlane.xlu1 %2312  ;;  %3417 = vpow2.f32 %v2023_v33 }
 0x1cb   :  { %1202 = vadd.xlane.f32.xlu0 %v3406_v29  ;;  %v3408_v63 = vpop.eup %3407 }
 0x1cc   :  { %1960 = vadd.xlane.f32.xlu1 %v1950_v22  ;;  %v4415_v48 = vpop.xlane.xlu0 %2310  ;;  %v3410_v9 = vpop.eup %3409 }
 0x1cd   :  { %v1248_v42 = vpop.xlane.xlu1 %1247  ;;  %v3412_v21 = vpop.eup %3411 }
 0x1ce   :  { %v1265_v30 = vsel %vm1261_vm4, %v1248_v42, 0.0  ;;  %v4456_v37 = vpop.eup %3413 }
 0x1cf   :  { %v1273_v51 = vadd.f32 %v1265_v30, %v1214_v27  ;;  %1481 = vadd.xlane.f32.xlu0 %v4335_v17  ;;  %v2071_v1 = vmul.f32 %v4456_v37, %v3408_v63 }
 0x1d0   :  { %1962 = vadd.xlane.f32.xlu1 %v1951_v49  ;;  %v1246_v57 = vpop.xlane.xlu0 %1245 }
 0x1d1   :  { %v4427_v60 = vpop.xlane.xlu1 %1526  ;;  %v1264_v58 = vsel %vm1261_vm4, %v1246_v57, 0.0 }
 0x1d2   :  { %v1272_v2 = vadd.f32 %v1264_v58, %v1213_v59  ;;  %v3416_v30 = vpop.eup %3415 }
 0x1d3   :  { %1760 = vadd.xlane.f32.xlu0 %v4341_v23  ;;  %v3418_v41 = vpop.eup %3417 }
 0x1d4   :  { %2241 = vadd.xlane.f32.xlu1 %v2230_v28  ;;  %v4433_v17 = vpop.xlane.xlu0 %1524 }
 0x1d5   :  { %v4435_v36 = vpop.xlane.xlu1 %1805 }
 0x1d6   :  { %v992_v4 = vpop.f32.mrb[6].mxu0 }
 0x1d7   :  { %v4440_v0 = vsel %vm1119_vm3, %v992_v4, -100.0  ;;  %v1113_v40 = vpop.f32.mrb[6].mxu1  ;;  %v3059_v7 = vpop.f32.mrb[7].mxu0  ;;  %2041 = vadd.xlane.f32.xlu0 %v3408_v63  ;;  %v1284_v63 = vmul.f32 %v4332_v20, %v1241_v11 }
 0x1d8   :  { %v1136_v23 = vmul.f32 10.0, %v4440_v0  ;;  %1204 = vadd.xlane.f32.xlu1 %v3410_v9  ;;  %v4443_v46 = vpop.xlane.xlu0 %1803  ;;  %v2661_v13 = vadd.f32 -0.05, %v4440_v0  ;;  %v2669_v14 = vadd.f32 -0.55, %v4440_v0  ;;  %v3094_v35 = vpop.f32.mrb[7].mxu1 }
 0x1d9   :  { %v4447_v15 = vpop.xlane.xlu1 %2084  ;;  %v4454_v39 = vsel %vm1119_vm3, %v1113_v40, -100.0  ;;  %vm5267_vm3 = vcmp.eq.s32.totalorder %v4140_v19, 14 }
 0x1da   :  { %v1726_v18 = vmul.f32 %v2661_v13, %v2661_v13  ;;  %v2005_v55 = vmul.f32 %v2669_v14, %v2669_v14  ;;  %v1150_v8 = vmul.f32 1.442695, %v1136_v23  ;;  %v1137_v53 = vmul.f32 10.0, %v4454_v39 }
 0x1db   :  { %1253 = vadd.xlane.f32.xlu0 %v1241_v11  ;;  %v2662_v57 = vadd.f32 -0.05, %v4454_v39  ;;  %v2670_v28 = vadd.f32 -0.55, %v4454_v39  ;;  %v2079_v13 = vmul.f32 0.0024787523, %v2071_v1  ;;  %v1792_v11 = vmul.f32 %v3416_v30, %v4456_v37 }
 0x1dc   :  { %1483 = vadd.xlane.f32.xlu1 %v3412_v21  ;;  %v4450_v24 = vpop.xlane.xlu0 %2082  ;;  %v1734_v29 = vmul.f32 -50.0, %v1726_v18  ;;  %v2013_v22 = vmul.f32 -50.0, %v2005_v55  ;;  %3419 = vpow2.f32 %v1150_v8  ;;  %v1152_v7 = vmul.f32 1.442695, %v1137_v53 }
 0x1dd   :  { %v1299_v38 = vpop.xlane.xlu1 %1298  ;;  %v1727_v33 = vmul.f32 %v2662_v57, %v2662_v57  ;;  %v2006_v4 = vmul.f32 %v2670_v28, %v2670_v28  ;;  %v1800_v57 = vmul.f32 0.36787945, %v1792_v11 }
 0x1de   :  { %v1316_v42 = vsel %vm1312_vm6, %v1299_v38, 0.0  ;;  %v1748_v45 = vmul.f32 1.442695, %v1734_v29  ;;  %v2027_v27 = vmul.f32 1.442695, %v2013_v22 }
 0x1df   :  { %v1324_v49 = vadd.f32 %v1316_v42, %v1273_v51  ;;  %1532 = vadd.xlane.f32.xlu0 %v4344_v26  ;;  %v1234_v26 = vmul.f32 %v4456_v37, %v3410_v9  ;;  %v1735_v14 = vmul.f32 -50.0, %v1727_v33  ;;  %v2014_v9 = vmul.f32 -50.0, %v2006_v4 }
 0x1e0   :  { %1762 = vadd.xlane.f32.xlu1 %v3416_v30  ;;  %v1297_v52 = vpop.xlane.xlu0 %1296  ;;  %3421 = vpow2.f32 %v1748_v45  ;;  %v1292_v22 = vmul.f32 2980.958, %v1284_v63  ;;  %v1843_v54 = vmul.f32 %v4456_v37, %v1800_v57 }
 0x1e1   :  { %v4463_v59 = vpop.xlane.xlu1 %1577  ;;  %v1315_v58 = vsel %vm1312_vm6, %v1297_v52, 0.0  ;;  %3423 = vpow2.f32 %v2027_v27  ;;  %v1242_v35 = vmul.f32 8103.084, %v1234_v26  ;;  %v1750_v18 = vmul.f32 1.442695, %v1735_v14 }
 0x1e2   :  { %v1323_v51 = vadd.f32 %v1315_v58, %v1272_v2  ;;  %v1513_v2 = vmul.f32 %v4456_v37, %v3412_v21  ;;  %3425 = vpow2.f32 %v1152_v7  ;;  %v2029_v55 = vmul.f32 1.442695, %v2014_v9 }
 0x1e3   :  { %1811 = vadd.xlane.f32.xlu0 %v4352_v32  ;;  %3427 = vpow2.f32 %v1750_v18  ;;  %v2070_v58 = vmul.f32 %v3418_v41, %v4332_v20  ;;  %v2122_v7 = vmul.f32 %v4456_v37, %v2079_v13 }
 0x1e4   :  { %2039 = vadd.xlane.f32.xlu1 %v3418_v41  ;;  %v4471_v40 = vpop.xlane.xlu0 %1575  ;;  %v1521_v38 = vmul.f32 54.59815, %v1513_v2  ;;  %3429 = vpow2.f32 %v2029_v55 }
 0x1e5   :  { %v4473_v23 = vpop.xlane.xlu1 %1856  ;;  %v2078_v2 = vmul.f32 0.0024787523, %v2070_v58 }
 0x1e6   :  { %v4479_v8 = vpop.eup %3419 }
 0x1e7   :  { %2092 = vadd.xlane.f32.xlu0 %v2079_v13 }
 0x1e8   :  { %1255 = vadd.xlane.f32.xlu1 %v1242_v35  ;;  %v4477_v32 = vpop.xlane.xlu0 %1854 }
 0x1e9   :  { %v4481_v29 = vpop.xlane.xlu1 %2135 }
 0x1ea   :  { %v4484_v42 = vpop.eup %3421 }
 0x1eb   :  { %1304 = vadd.xlane.f32.xlu0 %v1292_v22  ;;  %v4487_v21 = vpop.eup %3423  ;;  %v1793_v27 = vmul.f32 %v4484_v42, %v4479_v8 }
 0x1ec   :  { %1534 = vadd.xlane.f32.xlu1 %v1521_v38  ;;  %v4489_v45 = vpop.xlane.xlu0 %2133  ;;  %v2072_v53 = vmul.f32 %v4487_v21, %v4479_v8 }
 0x1ed   :  { %v1350_v52 = vpop.xlane.xlu1 %1349  ;;  %v4498_v1 = vmul.f32 0.36787945, %v1793_v27 }
 0x1ee   :  { %v1367_v30 = vsel %vm1363_vm7, %v1350_v52, 0.0  ;;  %v4501_v26 = vmul.f32 0.0024787523, %v2072_v53  ;;  %v2130_v53 = vmul.f32 0.000911882, %v2122_v7 }
 0x1ef   :  { %v1375_v28 = vadd.f32 %v1367_v30, %v1324_v49  ;;  %1583 = vadd.xlane.f32.xlu0 %v4357_v44  ;;  %v1844_v4 = vmul.f32 %v4479_v8, %v4498_v1  ;;  %v4512_v49 = vpop.eup %3425  ;;  %v1285_v44 = vmul.f32 %v4456_v37, %v1242_v35  ;;  %v1335_v35 = vmul.f32 %v4332_v20, %v1292_v22 }
 0x1f0   :  { %1813 = vadd.xlane.f32.xlu1 %v1800_v57  ;;  %v1348_v33 = vpop.xlane.xlu0 %1347  ;;  %v2123_v41 = vmul.f32 %v4479_v8, %v4501_v26  ;;  %v4522_v55 = vpop.eup %3427  ;;  %v1564_v30 = vmul.f32 %v4456_v37, %v1521_v38 }
 0x1f1   :  { %v4506_v63 = vpop.xlane.xlu1 %1628  ;;  %v1366_v14 = vsel %vm1363_vm7, %v1348_v33, 0.0  ;;  %v4517_v18 = vmul.f32 0.13533528, %v1844_v4  ;;  %v4528_v52 = vpop.eup %3429  ;;  %v1293_v58 = vmul.f32 2980.958, %v1285_v44 }
 0x1f2   :  { %v4515_v9 = vadd.f32 %v1366_v14, %v1323_v51  ;;  %v4520_v13 = vmul.f32 0.000911882, %v2123_v41  ;;  %v2073_v33 = vmul.f32 %v4528_v52, %v4512_v49  ;;  %v4551_v44 = vmul.f32 1096.6332, %v1335_v35 }
 0x1f3   :  { %5279 = vst [vmem:[#allocation9_spill] sm:$0xff] %v4517_v18  ;;  %1862 = vadd.xlane.f32.xlu0 %v4359_v47  ;;  %v1895_v27 = vmul.f32 %v4479_v8, %v4517_v18  ;;  %v1794_v47 = vmul.f32 %v4522_v55, %v4512_v49 }
 0x1f4   :  { %5280 = vst [vmem:[#allocation10_spill] sm:$0xff] %v4520_v13  ;;  %2090 = vadd.xlane.f32.xlu1 %v2078_v2  ;;  %v4524_v11 = vpop.xlane.xlu0 %1626  ;;  %v2174_v22 = vmul.f32 %v4479_v8, %v4520_v13  ;;  %v4546_v7 = vmul.f32 0.0024787523, %v2073_v33  ;;  %v1851_v13 = vmul.f32 0.13533528, %v1843_v54 }
 0x1f5   :  { %v4531_v51 = vpop.xlane.xlu1 %1907  ;;  %v4538_v4 = vmul.f32 0.36787945, %v1794_v47  ;;  %v4540_v14 = vmul.f32 0.049787067, %v1895_v27  ;;  %v1572_v27 = vmul.f32 20.085537, %v1564_v30 }
 0x1f6   :  { %v4555_v56 = vmul.f32 0.00033546262, %v2174_v22  ;;  %v2124_v12 = vmul.f32 %v4512_v49, %v4546_v7 }
 0x1f7   :  { %2143 = vadd.xlane.f32.xlu0 %v2130_v53  ;;  %5281 = vst [vmem:[#allocation11_spill] sm:$0xff] %v4540_v14  ;;  %v1845_v47 = vmul.f32 %v4512_v49, %v4538_v4  ;;  %v4565_v57 = vmul.f32 %v4479_v8, %v4540_v14 }
 0x1f8   :  { %1306 = vadd.xlane.f32.xlu1 %v1293_v58  ;;  %v4544_v41 = vpop.xlane.xlu0 %1905  ;;  %5282 = vst [vmem:[#allocation12_spill] sm:$0xff] %v4555_v56  ;;  %v4569_v35 = vmul.f32 %v4479_v8, %v4555_v56  ;;  %v4573_v30 = vmul.f32 0.000911882, %v2124_v12  ;;  %v2121_v56 = vmul.f32 %v4332_v20, %v2078_v2  ;;  %v2645_v2 = vadd.f32 0.95, %v4440_v0 }
 0x1f9   :  { %v4549_v38 = vpop.xlane.xlu1 %2186  ;;  %v4561_v33 = vmul.f32 0.13533528, %v1845_v47  ;;  %5284 = vst [vmem:[#allocation14_spill] sm:$0xff] %v4565_v57 }
 0x1fa   :  { %5285 = vst [vmem:[#allocation15_spill] sm:$0xff] %v4569_v35  ;;  %5286 = vst [vmem:[#allocation16_spill] sm:$0xff] %v4573_v30  ;;  %v2175_v35 = vmul.f32 %v4512_v49, %v4573_v30  ;;  %v1336_v30 = vmul.f32 %v4456_v37, %v1293_v58  ;;  %v2129_v58 = vmul.f32 0.000911882, %v2121_v56  ;;  %v1595_v56 = vsel %vm1591_vm12, %v4463_v59, 0.0 }
 0x1fb   :  { %1355 = vadd.xlane.f32.xlu0 %v4551_v44  ;;  %5283 = vst [vmem:[#allocation13_spill] sm:$0xff] %v4561_v33  ;;  %v1896_v47 = vmul.f32 %v4512_v49, %v4561_v33  ;;  %v1646_v59 = vsel %vm5272_vm13, %v4506_v63, 0.0 }
 0x1fc   :  { %1585 = vadd.xlane.f32.xlu1 %v1572_v27  ;;  %v4571_v22 = vpop.xlane.xlu0 %2184  ;;  %v4595_v33 = vmul.f32 0.00033546262, %v2175_v35 }
 0x1fd   :  { %v1401_v62 = vpop.xlane.xlu1 %1400  ;;  %v4588_v54 = vmul.f32 0.049787067, %v1896_v47  ;;  %v1544_v47 = vsel %vm1540_vm10, %v4427_v60, 0.0  ;;  %v2173_v60 = vmul.f32 %v4456_v37, %v2130_v53 }
 0x1fe   :  { %v1418_v57 = vsel %vm1414_vm8, %v1401_v62, 0.0  ;;  %v1493_v62 = vsel %vm1489_vm9, %v4390_v61, 0.0  ;;  %5287 = vst [vmem:[#allocation17_spill] sm:$0xff] %v4595_v33 }
 0x1ff   :  { %v1426_v12 = vadd.f32 %v1418_v57, %v1375_v28  ;;  %1634 = vadd.xlane.f32.xlu0 %v4364_v50  ;;  %v1894_v57 = vmul.f32 %v4456_v37, %v1851_v13  ;;  %v4603_v61 = vmul.f32 %v4512_v49, %v4588_v54 }
 0x200   :  { %1864 = vadd.xlane.f32.xlu1 %v1851_v13  ;;  %v1399_v14 = vpop.xlane.xlu0 %1398 }
 0x201   :  { %v1501_v18 = vadd.f32 %v1493_v62, %v1426_v12  ;;  %v1680_v28 = vpop.xlane.xlu1 %1679  ;;  %v1417_v50 = vsel %vm1414_vm8, %v1399_v14, 0.0  ;;  %5288 = vst [vmem:[#allocation18_spill] sm:$0xff] %v4603_v61  ;;  %v4611_v12 = vmul.f32 %v4512_v49, %v4595_v33  ;;  %v1492_v14 = vsel %vm1489_vm9, %v4395_v31, 0.0 }
 0x202   :  { %v1425_v35 = vadd.f32 %v1417_v50, %v4515_v9  ;;  %v1168_v9 = vmul.f32 %v2645_v2, %v2645_v2  ;;  %v2653_v62 = vadd.f32 0.45, %v4440_v0  ;;  %v1543_v31 = vsel %vm1540_vm10, %v4433_v17, 0.0 }
 0x203   :  { %5289 = vst [vmem:[#allocation19_spill] sm:$0xff] %v4611_v12  ;;  %v1552_v13 = vadd.f32 %v1544_v47, %v1501_v18  ;;  %1913 = vadd.xlane.f32.xlu0 %v4380_v25  ;;  %v2646_v25 = vadd.f32 0.95, %v4454_v39  ;;  %v1902_v47 = vmul.f32 0.049787067, %v1894_v57  ;;  %v1594_v17 = vsel %vm1591_vm12, %v4471_v40, 0.0 }
 0x204   :  { %2141 = vadd.xlane.f32.xlu1 %v2129_v58  ;;  %v1500_v50 = vadd.f32 %v1492_v14, %v1425_v35  ;;  %v1678_v12 = vpop.xlane.xlu0 %1677  ;;  %v1344_v61 = vmul.f32 1096.6332, %v1336_v30  ;;  %v1615_v35 = vmul.f32 %v4456_v37, %v1572_v27  ;;  %v4638_v33 = vmul.f32 0.00033546262, %v2173_v60 }
 0x205   :  { %v1603_v18 = vadd.f32 %v1595_v56, %v1552_v13  ;;  %v4629_v53 = vpop.xlane.xlu1 %1958  ;;  %v1386_v13 = vmul.f32 %v4332_v20, %v4551_v44  ;;  %v1176_v57 = vmul.f32 -50.0, %v1168_v9  ;;  %v1447_v56 = vmul.f32 %v2653_v62, %v2653_v62 }
 0x206   :  { %v1551_v2 = vadd.f32 %v1543_v31, %v1500_v50  ;;  %v1697_v63 = vsel %vm5271_vm0, %v1680_v28, 0.0  ;;  %v1645_v40 = vsel %vm5272_vm13, %v4524_v11, 0.0  ;;  %v1169_v27 = vmul.f32 %v2646_v25, %v2646_v25 }
 0x207   :  { %v1654_v14 = vadd.f32 %v1646_v59, %v1603_v18  ;;  %1915 = vadd.xlane.f32.xlu0 %v1902_v47  ;;  %v2654_v60 = vadd.f32 0.45, %v4454_v39  ;;  %v1772_v28 = vsel %vm5265_vm11, %v4398_v6, 0.0  ;;  %v1623_v62 = vmul.f32 7.389056, %v1615_v35 }
 0x208   :  { %1357 = vadd.xlane.f32.xlu1 %v1344_v61  ;;  %v1602_v30 = vadd.f32 %v1594_v17, %v1551_v2  ;;  %v4644_v50 = vpop.xlane.xlu0 %1956  ;;  %v2172_v18 = vmul.f32 %v4332_v20, %v2129_v58  ;;  %v1696_v11 = vsel %vm5271_vm0, %v1678_v12, 0.0  ;;  %v1394_v25 = vmul.f32 403.4288, %v1386_v13 }
 0x209   :  { %v1705_v31 = vadd.f32 %v1697_v63, %v1654_v14  ;;  %v4651_v44 = vpop.xlane.xlu1 %2237  ;;  %v1823_v2 = vsel %vm5264_vm14, %v4435_v36, 0.0  ;;  %v1190_v17 = vmul.f32 1.442695, %v1176_v57  ;;  %v1455_v14 = vmul.f32 -50.0, %v1447_v56 }
 0x20a   :  { %v1653_v9 = vadd.f32 %v1645_v40, %v1602_v30  ;;  %v1771_v58 = vsel %vm5265_vm11, %v4401_v10, 0.0  ;;  %v1177_v63 = vmul.f32 -50.0, %v1169_v27  ;;  %v1448_v30 = vmul.f32 %v2654_v60, %v2654_v60 }
 0x20b   :  { %v1780_v59 = vadd.f32 %v1772_v28, %v1705_v31  ;;  %2194 = vadd.xlane.f32.xlu0 %v4638_v33  ;;  %v1874_v13 = vsel %vm1870_vm15, %v4473_v23, 0.0  ;;  %v4674_v57 = vmul.f32 0.00033546262, %v2172_v18  ;;  %v1387_v56 = vmul.f32 %v4456_v37, %v1344_v61 }
 0x20c   :  { %v1704_v6 = vadd.f32 %v1696_v11, %v1653_v9  ;;  %1636 = vadd.xlane.f32.xlu1 %v1623_v62  ;;  %v4664_v35 = vpop.xlane.xlu0 %2235  ;;  %v1822_v31 = vsel %vm5264_vm14, %v4443_v46, 0.0  ;;  %v1673_v10 = vmul.f32 2.7182817, %v4378_v34  ;;  %v1945_v27 = vmul.f32 %v4456_v37, %v1902_v47 }
 0x20d   :  { %v1831_v12 = vadd.f32 %v1823_v2, %v1780_v59  ;;  %v4669_v40 = vpop.xlane.xlu1 %1198  ;;  %v1925_v60 = vsel %vm5266_vm1, %v4531_v51, 0.0  ;;  %3431 = vpow2.f32 %v1190_v17  ;;  %v1469_v23 = vmul.f32 1.442695, %v1455_v14 }
 0x20e   :  { %v1779_v36 = vadd.f32 %v1771_v58, %v1704_v6  ;;  %v1873_v46 = vsel %vm1870_vm15, %v4477_v32, 0.0  ;;  %v1192_v18 = vmul.f32 1.442695, %v1177_v63  ;;  %v1456_v59 = vmul.f32 -50.0, %v1448_v30 }
 0x20f   :  { %v1882_v28 = vadd.f32 %v1874_v13, %v1831_v12  ;;  %1406 = vadd.xlane.f32.xlu0 %v1394_v25  ;;  %v1976_v51 = vsel %vm5267_vm3, %v4629_v53, 0.0  ;;  %v1395_v25 = vmul.f32 403.4288, %v1387_v56  ;;  %v1666_v2 = vmul.f32 %v4456_v37, %v1623_v62 }
 0x210   :  { %v1830_v9 = vadd.f32 %v1822_v31, %v1779_v36  ;;  %2192 = vadd.xlane.f32.xlu1 %v4674_v57  ;;  %v4686_v61 = vpop.xlane.xlu0 %1477  ;;  %vm2098_vm14 = vcmp.eq.s32.totalorder %v4140_v19, 16  ;;  %vm2149_vm11 = vcmp.eq.s32.totalorder %v4140_v19, 17  ;;  %v1924_v32 = vsel %vm5266_vm1, %v4544_v41, 0.0 }
 0x211   :  { %v1933_v34 = vadd.f32 %v1925_v60, %v1882_v28  ;;  %v4691_v11 = vpop.xlane.xlu1 %1200  ;;  %v2051_v14 = vsel %vm5268_vm2, %v4404_v3, 0.0  ;;  %3433 = vpow2.f32 %v1469_v23  ;;  %v1953_v62 = vmul.f32 0.01831564, %v1945_v27 }
 0x212   :  { %v1881_v47 = vadd.f32 %v1873_v46, %v1830_v9  ;;  %3435 = vpow2.f32 %v1192_v18  ;;  %v1471_v58 = vmul.f32 1.442695, %v1456_v59  ;;  %v1975_v30 = vsel %vm5267_vm3, %v4644_v50, 0.0 }
 0x213   :  { %v1984_v17 = vadd.f32 %v1976_v51, %v1933_v34  ;;  %1685 = vadd.xlane.f32.xlu0 %v1673_v10  ;;  %v2102_v12 = vsel %vm2098_vm14, %v4447_v15, 0.0  ;;  %v1674_v13 = vmul.f32 2.7182817, %v1666_v2  ;;  %v2050_v36 = vsel %vm5268_vm2, %v4408_v5, 0.0 }
 0x214   :  { %v1932_v53 = vadd.f32 %v1924_v32, %v1881_v47  ;;  %1408 = vadd.xlane.f32.xlu1 %v1395_v25  ;;  %v4705_v6 = vpop.xlane.xlu0 %1756  ;;  %vm2200_vm1 = vcmp.eq.s32.totalorder %v4140_v19, 18  ;;  %v2153_v50 = vsel %vm2149_vm11, %v4481_v29, 0.0  ;;  %v2101_v15 = vsel %vm2098_vm14, %v4450_v24, 0.0 }
 0x215   :  { %v2059_v63 = vadd.f32 %v2051_v14, %v1984_v17  ;;  %v4710_v41 = vpop.xlane.xlu1 %1479  ;;  %3437 = vpow2.f32 %v1471_v58  ;;  %vm5270_vm3 = vcmp.eq.s32.totalorder %v4140_v19, 19  ;;  %v2204_v60 = vsel %vm2200_vm1, %v4549_v38, 0.0 }
 0x216   :  { %v1983_v3 = vadd.f32 %v1975_v30, %v1932_v53  ;;  %v1952_v23 = vmul.f32 0.01831564, %v4387_v43  ;;  %vm5269_vm2 = vcmp.eq.s32.totalorder %v4140_v19, 20  ;;  %v2152_v24 = vsel %vm2149_vm11, %v4489_v45, 0.0 }
 0x217   :  { %v2110_v56 = vadd.f32 %v2102_v12, %v2059_v63  ;;  %1966 = vadd.xlane.f32.xlu0 %v1953_v62  ;;  %v3432_v27 = vpop.eup %3431  ;;  %v2255_v46 = vsel %vm5270_vm3, %v4651_v44, 0.0  ;;  %v2203_v38 = vsel %vm2200_vm1, %v4571_v22, 0.0  ;;  %v1215_v34 = vsel %vm1210_vm5, %v4669_v40, 0.0 }
 0x218   :  { %v2058_v31 = vadd.f32 %v2050_v36, %v1983_v3  ;;  %1687 = vadd.xlane.f32.xlu1 %v1674_v13  ;;  %v4722_v28 = vpop.xlane.xlu0 %2035  ;;  %v2330_v44 = vsel %vm5269_vm2, %v4410_v16, 0.0  ;;  %v2254_v22 = vsel %vm5270_vm3, %v4664_v35, 0.0  ;;  %v2329_v53 = vsel %vm5269_vm2, %v4415_v48, 0.0 }
 0x219   :  { %v2161_v5 = vadd.f32 %v2153_v50, %v2110_v56  ;;  %v4728_v10 = vpop.xlane.xlu1 %1758  ;;  %v1216_v63 = vsel %vm1210_vm5, %v4691_v11, 0.0  ;;  %v1235_v36 = vmul.f32 %v3432_v27, %v4479_v8 }
 0x21a   :  { %v2109_v29 = vadd.f32 %v2101_v15, %v2058_v31 }
 0x21b   :  { %v2212_v9 = vadd.f32 %v2204_v60, %v2161_v5  ;;  %1206 = vadd.xlane.f32.xlu0 %v3432_v27  ;;  %v3434_v47 = vpop.eup %3433  ;;  %v1243_v5 = vmul.f32 8103.084, %v1235_v36 }
 0x21c   :  { %v2160_v18 = vadd.f32 %v2152_v24, %v2109_v29  ;;  %1964 = vadd.xlane.f32.xlu1 %v1952_v23  ;;  %v1250_v59 = vpop.xlane.xlu0 %1249  ;;  %v3436_v32 = vpop.eup %3435  ;;  %v1514_v50 = vmul.f32 %v3434_v47, %v4479_v8 }
 0x21d   :  { %v2263_v43 = vadd.f32 %v2255_v46, %v2212_v9  ;;  %v4747_v51 = vpop.xlane.xlu1 %2037  ;;  %v1266_v45 = vsel %vm1261_vm4, %v1250_v59, 0.0  ;;  %v1236_v15 = vmul.f32 %v3436_v32, %v4512_v49 }
 0x21e   :  { %v2211_v25 = vadd.f32 %v2203_v38, %v2160_v18  ;;  %v1274_v2 = vadd.f32 %v1266_v45, %v1215_v34  ;;  %v1522_v23 = vmul.f32 54.59815, %v1514_v50 }
 0x21f   :  { %v2338_v17 = vadd.f32 %v2330_v44, %v2263_v43  ;;  %1485 = vadd.xlane.f32.xlu0 %v3434_v47  ;;  %v3438_v35 = vpop.eup %3437  ;;  %v1244_v9 = vmul.f32 8103.084, %v1236_v15 }
 0x220   :  { %v2262_v40 = vadd.f32 %v2254_v22, %v2211_v25  ;;  %1208 = vadd.xlane.f32.xlu1 %v3436_v32  ;;  %v4757_v14 = vpop.xlane.xlu0 %1528  ;;  %v1515_v18 = vmul.f32 %v3438_v35, %v4512_v49  ;;  %v1565_v15 = vmul.f32 %v4479_v8, %v1522_v23 }
 0x221   :  { %v2354_v62 = vadd.f32 1.0, %v2338_v17  ;;  %v1252_v58 = vpop.xlane.xlu1 %1251  ;;  %v2357_v56 = vmul.f32 -0.5, %v2338_v17  ;;  %v2360_v29 = vand.u32 2147483647, %v2338_v17 }
 0x222   :  { %v2337_v16 = vadd.f32 %v2329_v53, %v2262_v40  ;;  %v1267_v30 = vsel %vm1261_vm4, %v1252_v58, 0.0  ;;  %v1523_v53 = vmul.f32 54.59815, %v1515_v18 }
 0x223   :  { %3439 = vlog2.f32 %v2354_v62  ;;  %v1275_v12 = vadd.f32 %v1267_v30, %v1216_v63  ;;  %1764 = vadd.xlane.f32.xlu0 %v4484_v42  ;;  %v2358_v60 = vadd.f32 1.0, %v2357_v56  ;;  %vm2361_vm2 = vcmp.lt.f32.partialorder %v2360_v29, 0.0004427343 }
 0x224   :  { %v2345_v3 = vadd.f32 1.0, %v2337_v16  ;;  %1487 = vadd.xlane.f32.xlu1 %v3438_v35  ;;  %v4768_v13 = vpop.xlane.xlu0 %1807  ;;  %v2348_v31 = vmul.f32 -0.5, %v2337_v16  ;;  %v2351_v43 = vand.u32 2147483647, %v2337_v16 }
 0x225   :  { %v4770_v48 = vpop.xlane.xlu1 %1530  ;;  %v2359_v38 = vmul.f32 %v2358_v60, %v2338_v17 }
 0x226   :  { %3441 = vlog2.f32 %v2345_v3  ;;  %v2349_v24 = vadd.f32 1.0, %v2348_v31  ;;  %vm2352_vm3 = vcmp.lt.f32.partialorder %v2351_v43, 0.0004427343 }
 0x227   :  { %2043 = vadd.xlane.f32.xlu0 %v4487_v21 }
 0x228   :  { %1766 = vadd.xlane.f32.xlu1 %v4522_v55  ;;  %v4775_v11 = vpop.xlane.xlu0 %2086  ;;  %v2350_v32 = vmul.f32 %v2349_v24, %v2337_v16  ;;  %v1286_v16 = vmul.f32 %v4479_v8, %v1243_v5  ;;  %v1573_v24 = vmul.f32 20.085537, %v1565_v15 }
 0x229   :  { %v4778_v42 = vpop.xlane.xlu1 %1809 }
 0x22a   :  { %v1294_v31 = vmul.f32 2980.958, %v1286_v16 }
 0x22b   :  { %1257 = vadd.xlane.f32.xlu0 %v1243_v5 }
 0x22c   :  { %2045 = vadd.xlane.f32.xlu1 %v4528_v52  ;;  %v1301_v27 = vpop.xlane.xlu0 %1300 }
 0x22d   :  { %v3440_v21 = vpop.eup %3439  ;;  %v4782_v55 = vpop.xlane.xlu1 %2088  ;;  %v1317_v46 = vsel %vm1312_vm6, %v1301_v27, 0.0 }
 0x22e   :  { %v2356_v59 = vmul.f32 0.6931472, %v3440_v21  ;;  %v1325_v34 = vadd.f32 %v1317_v46, %v1274_v2 }
 0x22f   :  { %1536 = vadd.xlane.f32.xlu0 %v1522_v23 }
 0x230   :  { %v3442_v45 = vpop.eup %3441  ;;  %v2362_v52 = vsel %vm2361_vm2, %v2359_v38, %v2356_v59  ;;  %1259 = vadd.xlane.f32.xlu1 %v1244_v9  ;;  %v4787_v47 = vpop.xlane.xlu0 %1579  ;;  %vm2473_vm2 = vcmask 1041409  }
 0x231   :  { %v2423_v44 = vrot.slane %v2362_v52, 4  ;;  %v2347_v25 = vmul.f32 0.6931472, %v3442_v45  ;;  %v1303_v22 = vpop.xlane.xlu1 %1302 }
 0x232   :  { %v1318_v40 = vsel %vm1312_vm6, %v1303_v22, 0.0  ;;  %v5291_v22 = vld [vmem:[#allocation10_spill] sm:$0xff] }
 0x233   :  { %v2424_v62 = vadd.f32 %v2423_v44, %v2362_v52  ;;  %v2353_v17 = vsel %vm2352_vm3, %v2350_v32, %v2347_v25  ;;  %v1326_v58 = vadd.f32 %v1318_v40, %v1275_v12  ;;  %1815 = vadd.xlane.f32.xlu0 %v4498_v1  ;;  %v1287_v1 = vmul.f32 %v4512_v49, %v1244_v9  ;;  %v5290_v44 = vld [vmem:[#allocation9_spill] sm:$0xff] }
 0x234   :  { %v2417_v2 = vrot.slane %v2353_v17, 4  ;;  %1538 = vadd.xlane.f32.xlu1 %v1523_v53  ;;  %v4792_v63 = vpop.xlane.xlu0 %1858  ;;  %v1566_v9 = vmul.f32 %v4512_v49, %v1523_v53  ;;  %v1337_v32 = vmul.f32 %v4479_v8, %v1294_v31  ;;  %v5292_v40 = vld [vmem:[#allocation5_spill] sm:$0xff]  ;;  %vm5298_vm3 = vcmp.eq.s32.totalorder %v4140_v19, 10 }
 0x235   :  { %v2425_v30 = vrot.slane %v2424_v62, 2  ;;  %v4794_v35 = vpop.xlane.xlu1 %1581  ;;  %v1295_v21 = vmul.f32 2980.958, %v1287_v1  ;;  %v2673_v53 = vadd.f32 -1.0, %v5292_v40 }
 0x236   :  { %v2418_v3 = vadd.f32 %v2417_v2, %v2353_v17  ;;  %v1574_v45 = vmul.f32 20.085537, %v1566_v9 }
 0x237   :  { %v2426_v36 = vadd.f32 %v2425_v30, %v2424_v62  ;;  %2094 = vadd.xlane.f32.xlu0 %v4501_v26  ;;  %v5293_v62 = vld [vmem:[#allocation13_spill] sm:$0xff]  ;;  %v1616_v30 = vmul.f32 %v4479_v8, %v1573_v24  ;;  %v1338_v16 = vmul.f32 %v4512_v49, %v1295_v21 }
 0x238   :  { %v2419_v56 = vrot.slane %v2418_v3, 2  ;;  %1817 = vadd.xlane.f32.xlu1 %v4538_v4  ;;  %v4799_v50 = vpop.xlane.xlu0 %2137 }
 0x239   :  { %v4801_v12 = vpop.xlane.xlu1 %1860  ;;  %v2427_v60 = vrot.slane %v2426_v36, 1  ;;  %v1624_v15 = vmul.f32 7.389056, %v1616_v30  ;;  %v5297_v30 = vld [vmem:[#allocation7_spill] sm:$0xff] }
 0x23a   :  { %v2420_v29 = vadd.f32 %v2419_v56, %v2418_v3  ;;  %v2280_v3 = vmul.f32 %v2673_v53, %v2673_v53 }
 0x23b   :  { %1308 = vadd.xlane.f32.xlu0 %v1294_v31  ;;  %v2428_v23 = vadd.f32 %v2427_v60, %v2426_v36  ;;  %v5294_v36 = vld [vmem:[#allocation16_spill] sm:$0xff]  ;;  %v1346_v60 = vmul.f32 1096.6332, %v1338_v16  ;;  %v2675_v16 = vadd.f32 -1.0, %v5297_v30 }
 0x23c   :  { %v2421_v5 = vrot.slane %v2420_v29, 1  ;;  %2096 = vadd.xlane.f32.xlu1 %v4546_v7  ;;  %v1352_v27 = vpop.xlane.xlu0 %1351 }
 0x23d   :  { %v4806_v26 = vpop.xlane.xlu1 %2139  ;;  %v1368_v4 = vsel %vm1363_vm7, %v1352_v27, 0.0  ;;  %v1494_v27 = vsel %vm1489_vm9, %v4686_v61, 0.0  ;;  %v1596_v61 = vsel %vm1591_vm12, %v4787_v47, 0.0 }
 0x23e   :  { %v1376_v46 = vadd.f32 %v1368_v4, %v1325_v34  ;;  %v2422_v18 = vadd.f32 %v2421_v5, %v2420_v29  ;;  %v1617_v5 = vmul.f32 %v4512_v49, %v1574_v45  ;;  %v5295_v4 = vld [vmem:[#allocation6_spill] sm:$0xff] }
 0x23f   :  { %1587 = vadd.xlane.f32.xlu0 %v1573_v24  ;;  %v2674_v24 = vadd.f32 -1.0, %v5295_v4 }
 0x240   :  { %1310 = vadd.xlane.f32.xlu1 %v1295_v21  ;;  %v1631_v59 = vpop.xlane.xlu0 %1630  ;;  %v4811_v38 = vsel %vm2473_vm2, %v2428_v23, %v2422_v18  ;;  %v2288_v21 = vmul.f32 -500000.0, %v2280_v3  ;;  %v1545_v23 = vsel %vm1540_vm10, %v4757_v14, 0.0  ;;  %v1495_v14 = vsel %vm1489_vm9, %v4710_v41, 0.0 }
 0x241   :  { %v1354_v7 = vpop.xlane.xlu1 %1353  ;;  %v2281_v53 = vmul.f32 %v2674_v24, %v2674_v24  ;;  %v1647_v3 = vsel %vm5272_vm13, %v1631_v59, 0.0  ;;  %v1597_v59 = vsel %vm1591_vm12, %v4794_v35, 0.0  ;;  %vm5300_vm2 = vcmp.eq.s32.totalorder %v4140_v19, 11 }
 0x242   :  { %v1369_v43 = vsel %vm1363_vm7, %v1354_v7, 0.0  ;;  %v2298_v40 = vmul.f32 1.442695, %v2288_v21 }
 0x243   :  { %v1377_v52 = vadd.f32 %v1369_v43, %v1326_v58  ;;  %1866 = vadd.xlane.f32.xlu0 %v5290_v44  ;;  %v1345_v58 = vmul.f32 1096.6332, %v1337_v32  ;;  %v1625_v44 = vmul.f32 7.389056, %v1617_v5 }
 0x244   :  { %1589 = vadd.xlane.f32.xlu1 %v1574_v45  ;;  %v4816_v25 = vpop.xlane.xlu0 %1909  ;;  %3443 = vpow2.f32 %v2298_v40 }
 0x245   :  { %v4818_v34 = vpop.xlane.xlu1 %1632  ;;  %v1668_v30 = vmul.f32 %v4512_v49, %v1625_v44 }
 0x247   :  { %2145 = vadd.xlane.f32.xlu0 %v5291_v22  ;;  %v5296_v22 = vld [vmem:[#allocation11_spill] sm:$0xff] }
 0x248   :  { %1868 = vadd.xlane.f32.xlu1 %v5293_v62  ;;  %v4824_v17 = vpop.xlane.xlu0 %2188 }
 0x249   :  { %v4826_v2 = vpop.xlane.xlu1 %1911 }
 0x24b   :  { %1359 = vadd.xlane.f32.xlu0 %v1345_v58 }
 0x24c   :  { %2147 = vadd.xlane.f32.xlu1 %v5294_v36  ;;  %v1403_v56 = vpop.xlane.xlu0 %1402 }
 0x24d   :  { %v4831_v1 = vpop.xlane.xlu1 %2190  ;;  %v1419_v31 = vsel %vm1414_vm8, %v1403_v56, 0.0  ;;  %v1546_v56 = vsel %vm1540_vm10, %v4770_v48, 0.0  ;;  %v2282_v48 = vmul.f32 %v2675_v16, %v2675_v16 }
 0x24e   :  { %v1427_v29 = vadd.f32 %v1419_v31, %v1376_v46  ;;  %v1388_v46 = vmul.f32 %v4479_v8, %v1345_v58 }
 0x24f   :  { %1638 = vadd.xlane.f32.xlu0 %v1624_v15 }
 0x250   :  { %1361 = vadd.xlane.f32.xlu1 %v1346_v60  ;;  %v1502_v9 = vadd.f32 %v1494_v27, %v1427_v29  ;;  %v1682_v18 = vpop.xlane.xlu0 %1681  ;;  %v1389_v29 = vmul.f32 %v4512_v49, %v1346_v60  ;;  %v2289_v27 = vmul.f32 -500000.0, %v2281_v53  ;;  %v1773_v60 = vsel %vm5298_vm3, %v4705_v6, 0.0 }
 0x251   :  { %v1405_v7 = vpop.xlane.xlu1 %1404  ;;  %v1698_v5 = vsel %vm5271_vm0, %v1682_v18, 0.0  ;;  %v1667_v18 = vmul.f32 %v4479_v8, %v1624_v15  ;;  %v1824_v6 = vsel %vm5300_vm2, %v4768_v13, 0.0  ;;  %v1774_v13 = vsel %vm5298_vm3, %v4728_v10, 0.0 }
 0x252   :  { %v1420_v43 = vsel %vm1414_vm8, %v1405_v7, 0.0  ;;  %v1553_v45 = vadd.f32 %v1545_v23, %v1502_v9  ;;  %v1648_v23 = vsel %vm5272_vm13, %v4818_v34, 0.0  ;;  %v1397_v35 = vmul.f32 403.4288, %v1389_v29  ;;  %v3444_v29 = vpop.eup %3443 }
 0x253   :  { %v1428_v32 = vadd.f32 %v1420_v43, %v1377_v52  ;;  %1917 = vadd.xlane.f32.xlu0 %v5296_v22  ;;  %v1396_v52 = vmul.f32 403.4288, %v1388_v46  ;;  %v5299_v46 = vld [vmem:[#allocation8_spill] sm:$0xff]  ;;  %v2300_v8 = vmul.f32 1.442695, %v2289_v27  ;;  %vm5302_vm2 = vcmp.eq.s32.totalorder %v4140_v19, 13 }
 0x254   :  { %1640 = vadd.xlane.f32.xlu1 %v1625_v44  ;;  %v1604_v62 = vadd.f32 %v1596_v61, %v1553_v45  ;;  %v4853_v58 = vpop.xlane.xlu0 %2239  ;;  %v2676_v43 = vadd.f32 -1.0, %v5299_v46  ;;  %v2677_v45 = vadd.f32 -1.0, %v4440_v0  ;;  %v1875_v0 = vsel %vm1870_vm15, %v4792_v63, 0.0 }
 0x255   :  { %v1503_v36 = vadd.f32 %v1495_v14, %v1428_v32  ;;  %v1684_v47 = vpop.xlane.xlu1 %1683  ;;  %v5301_v32 = vld [vmem:[#allocation12_spill] sm:$0xff]  ;;  %v1675_v53 = vmul.f32 2.7182817, %v1667_v18  ;;  %v2678_v63 = vadd.f32 -1.0, %v4454_v39  ;;  %3445 = vpow2.f32 %v2300_v8 }
 0x256   :  { %v1655_v31 = vadd.f32 %v1647_v3, %v1604_v62  ;;  %v1699_v34 = vsel %vm5271_vm0, %v1684_v47, 0.0  ;;  %v2283_v16 = vmul.f32 %v2676_v43, %v2676_v43  ;;  %v2284_v3 = vmul.f32 %v2677_v45, %v2677_v45 }
 0x257   :  { %v1554_v41 = vadd.f32 %v1546_v56, %v1503_v36  ;;  %1410 = vadd.xlane.f32.xlu0 %v1396_v52  ;;  %v1926_v36 = vsel %vm5302_vm2, %v4816_v25, 0.0  ;;  %vm5303_vm0 = vcmp.eq.s32.totalorder %v4140_v19, 11  ;;  %vm5304_vm3 = vcmp.eq.s32.totalorder %v4140_v19, 14 }
 0x258   :  { %v1706_v21 = vadd.f32 %v1698_v5, %v1655_v31  ;;  %1919 = vadd.xlane.f32.xlu1 %v4588_v54  ;;  %v4868_v4 = vpop.xlane.xlu0 %1202  ;;  %v2223_v54 = vmul.f32 %v4332_v20, %v4674_v57  ;;  %v2290_v20 = vmul.f32 -500000.0, %v2282_v48  ;;  %v1825_v52 = vsel %vm5303_vm0, %v4778_v42, 0.0 }
 0x259   :  { %v1605_v24 = vadd.f32 %v1597_v59, %v1554_v41  ;;  %v1961_v9 = vpop.xlane.xlu1 %1960  ;;  %v2224_v25 = vmul.f32 %v4456_v37, %v4638_v33  ;;  %v1876_v39 = vsel %vm1870_vm15, %v4801_v12, 0.0  ;;  %v1676_v5 = vmul.f32 2.7182817, %v1668_v30 }
 0x25a   :  { %v1781_v7 = vadd.f32 %v1773_v60, %v1706_v21  ;;  %v2231_v62 = vmul.f32 0.0001234098, %v2223_v54  ;;  %v1977_v44 = vsel %vm5304_vm3, %v1961_v9, 0.0  ;;  %v2302_v41 = vmul.f32 1.442695, %v2290_v20 }
 0x25b   :  { %v1656_v61 = vadd.f32 %v1648_v23, %v1605_v24  ;;  %2196 = vadd.xlane.f32.xlu0 %v5301_v32  ;;  %v2291_v27 = vmul.f32 -500000.0, %v2283_v16  ;;  %v2292_v59 = vmul.f32 -500000.0, %v2284_v3  ;;  %vm5305_vm0 = vcmp.eq.s32.totalorder %v4140_v19, 15  ;;  %v5307_v32 = vld [vmem:[#allocation14_spill] sm:$0xff] }
 0x25c   :  { %v1832_v15 = vadd.f32 %v1824_v6, %v1781_v7  ;;  %1412 = vadd.xlane.f32.xlu1 %v1397_v35  ;;  %v4887_v22 = vpop.xlane.xlu0 %1481  ;;  %v2052_v21 = vsel %vm5305_vm0, %v4722_v28, 0.0  ;;  %v2285_v60 = vmul.f32 %v2678_v63, %v2678_v63  ;;  %v1927_v37 = vsel %vm5302_vm2, %v4826_v2, 0.0  ;;  %v5306_v6 = vld [vmem:[#allocation17_spill] sm:$0xff]  ;;  %v5309_v3 = vld [vmem:[#allocation15_spill] sm:$0xff] }
 0x25d   :  { %v1707_v57 = vadd.f32 %v1699_v34, %v1656_v61  ;;  %v1963_v40 = vpop.xlane.xlu1 %1962  ;;  %v2103_v12 = vsel %vm2098_vm14, %v4775_v11, 0.0  ;;  %v2232_v23 = vmul.f32 0.0001234098, %v2224_v25  ;;  %3447 = vpow2.f32 %v2302_v41 }
 0x25e   :  { %v1883_v14 = vadd.f32 %v1875_v0, %v1832_v15  ;;  %v1978_v7 = vsel %vm5304_vm3, %v1963_v40, 0.0  ;;  %v2304_v35 = vmul.f32 1.442695, %v2291_v27  ;;  %v2306_v54 = vmul.f32 1.442695, %v2292_v59 }
 0x25f   :  { %v1782_v47 = vadd.f32 %v1774_v13, %v1707_v57  ;;  %1689 = vadd.xlane.f32.xlu0 %v1675_v53  ;;  %v2154_v2 = vsel %vm2149_vm11, %v4799_v50, 0.0  ;;  %v2293_v43 = vmul.f32 -500000.0, %v2285_v60  ;;  %v2053_v11 = vsel %vm5305_vm0, %v4747_v51, 0.0  ;;  %v3446_v53 = vpop.eup %3445 }
 0x260   :  { %v1934_v56 = vadd.f32 %v1926_v36, %v1883_v14  ;;  %2243 = vadd.xlane.f32.xlu1 %v2231_v62  ;;  %v4903_v10 = vpop.xlane.xlu0 %1760  ;;  %v1954_v8 = vmul.f32 0.01831564, %v5307_v32  ;;  %v2205_v34 = vsel %vm2200_vm1, %v4824_v17, 0.0  ;;  %v1217_v50 = vsel %vm1210_vm5, %v4868_v4, 0.0 }
 0x261   :  { %v1833_v49 = vadd.f32 %v1825_v52, %v1782_v47  ;;  %v2242_v31 = vpop.xlane.xlu1 %2241  ;;  %v2104_v0 = vsel %vm2098_vm14, %v4782_v55, 0.0  ;;  %vm5308_vm2 = vcmp.eq.s32.totalorder %v4140_v19, 19  ;;  %3449 = vpow2.f32 %v2306_v54  ;;  %v5310_v47 = vld [vmem:[#allocation18_spill] sm:$0xff] }
 0x262   :  { %v1985_v42 = vadd.f32 %v1977_v44, %v1934_v56  ;;  %v2256_v17 = vsel %vm5308_vm2, %v4853_v58, 0.0  ;;  %v2155_v4 = vsel %vm2149_vm11, %v4806_v26, 0.0  ;;  %3451 = vpow2.f32 %v2304_v35  ;;  %vm5311_vm3 = vmmov %vm5308_vm2 }
 0x263   :  { %v1884_v48 = vadd.f32 %v1876_v39, %v1833_v49  ;;  %2314 = vadd.xlane.f32.xlu0 %v3444_v29  ;;  %v2308_v55 = vmul.f32 1.442695, %v2293_v43  ;;  %v2233_v36 = vmul.f32 0.0001234098, %v5309_v3  ;;  %v2206_v58 = vsel %vm2200_vm1, %v4831_v1, 0.0  ;;  %v5312_v29 = vld [vmem:[#allocation19_spill] sm:$0xff] }
 0x264   :  { %v2060_v33 = vadd.f32 %v2052_v21, %v1985_v42  ;;  %1691 = vadd.xlane.f32.xlu1 %v1676_v5  ;;  %v4918_v24 = vpop.xlane.xlu0 %2041  ;;  %v1955_v63 = vmul.f32 0.01831564, %v5310_v47  ;;  %v2257_v56 = vsel %vm5311_vm3, %v2242_v31, 0.0  ;;  %v2234_v41 = vmul.f32 0.0001234098, %v5312_v29 }
 0x265   :  { %v1935_v9 = vadd.f32 %v1927_v37, %v1884_v48  ;;  %v1205_v18 = vpop.xlane.xlu1 %1204  ;;  %3453 = vpow2.f32 %v2308_v55  ;;  %vm5313_vm0 = vcmp.eq.s32.totalorder %v4140_v19, 9  ;;  %vm5314_vm2 = vcmp.eq.s32.totalorder %v4140_v19, 10 }
 0x266   :  { %v2111_v28 = vadd.f32 %v2103_v12, %v2060_v33  ;;  %v1218_v5 = vsel %vm1210_vm5, %v1205_v18, 0.0  ;;  %vm5315_vm3 = vcmp.eq.s32.totalorder %v4140_v19, 11 }
 0x267   :  { %v1986_v46 = vadd.f32 %v1978_v7, %v1935_v9  ;;  %2245 = vadd.xlane.f32.xlu0 %v2232_v23  ;;  %v3448_v26 = vpop.eup %3447 }
 0x268   :  { %v2162_v45 = vadd.f32 %v2154_v2, %v2111_v28  ;;  %2198 = vadd.xlane.f32.xlu1 %v5306_v6  ;;  %v1254_v61 = vpop.xlane.xlu0 %1253 }
 0x269   :  { %v2061_v15 = vadd.f32 %v2053_v11, %v1986_v46  ;;  %v4939_v20 = vpop.xlane.xlu1 %1483  ;;  %v1268_v51 = vsel %vm1261_vm4, %v1254_v61, 0.0 }
 0x26a   :  { %v2213_v57 = vadd.f32 %v2205_v34, %v2162_v45  ;;  %v1276_v40 = vadd.f32 %v1268_v51, %v1217_v50 }
 0x26b   :  { %v2112_v13 = vadd.f32 %v2104_v0, %v2061_v15  ;;  %1968 = vadd.xlane.f32.xlu0 %v1954_v8  ;;  %v3450_v42 = vpop.eup %3449 }
 0x26c   :  { %v4952_v14 = vadd.f32 %v2256_v17, %v2213_v57  ;;  %2316 = vadd.xlane.f32.xlu1 %v3446_v53  ;;  %v4954_v62 = vpop.xlane.xlu0 %1532  ;;  %v3452_v27 = vpop.eup %3451 }
 0x26d   :  { %v2163_v30 = vadd.f32 %v2155_v4, %v2112_v13  ;;  %v4956_v16 = vpop.xlane.xlu1 %1762  ;;  %v1496_v13 = vsel %vm1489_vm9, %v4887_v22, 0.0 }
 0x26f   :  { %v2214_v52 = vadd.f32 %v2206_v58, %v2163_v30  ;;  %2247 = vadd.xlane.f32.xlu0 %v2233_v36  ;;  %v3454_v33 = vpop.eup %3453  ;;  %v1547_v30 = vsel %vm1540_vm10, %v4954_v62, 0.0 }
 0x270   :  { %1970 = vadd.xlane.f32.xlu1 %v1955_v63  ;;  %v4965_v49 = vpop.xlane.xlu0 %1811 }
 0x271   :  { %v4967_v44 = vadd.f32 %v2257_v56, %v2214_v52  ;;  %v4969_v25 = vpop.xlane.xlu1 %2039  ;;  %v1497_v52 = vsel %vm1489_vm9, %v4939_v20, 0.0 }
 0x273   :  { %2249 = vadd.xlane.f32.xlu0 %v2234_v41 }
 0x274   :  { %2318 = vadd.xlane.f32.xlu1 %v3448_v26  ;;  %v4972_v1 = vpop.xlane.xlu0 %2092 }
 0x275   :  { %v1256_v39 = vpop.xlane.xlu1 %1255 }
 0x276   :  { %v1269_v31 = vsel %vm1261_vm4, %v1256_v39, 0.0 }
 0x277   :  { %v1277_v59 = vadd.f32 %v1269_v31, %v1218_v5  ;;  %2322 = vadd.xlane.f32.xlu0 %v3450_v42 }
 0x278   :  { %2320 = vadd.xlane.f32.xlu1 %v3452_v27  ;;  %v1305_v21 = vpop.xlane.xlu0 %1304 }
 0x279   :  { %v1535_v48 = vpop.xlane.xlu1 %1534  ;;  %v1319_v60 = vsel %vm1312_vm6, %v1305_v21, 0.0 }
 0x27a   :  { %v1327_v37 = vadd.f32 %v1319_v60, %v1276_v40  ;;  %v1548_v41 = vsel %vm1540_vm10, %v1535_v48, 0.0 }
 0x27c   :  { %2324 = vadd.xlane.f32.xlu1 %v3454_v33  ;;  %v1584_v12 = vpop.xlane.xlu0 %1583  ;;  %v1826_v33 = vsel %vm5315_vm3, %v4965_v49, 0.0  ;;  %vm5316_vm3 = vcmp.eq.s32.totalorder %v4140_v19, 13 }
 0x27d   :  { %v4980_v9 = vpop.xlane.xlu1 %1813  ;;  %v1598_v47 = vsel %vm1591_vm12, %v1584_v12, 0.0 }
 0x280   :  { %v1863_v23 = vpop.xlane.xlu0 %1862 }
 0x281   :  { %v4982_v18 = vpop.xlane.xlu1 %2090 }
 0x284   :  { %v4984_v28 = vpop.xlane.xlu0 %2143 }
 0x285   :  { %v1307_v7 = vpop.xlane.xlu1 %1306 }
 0x286   :  { %v1320_v35 = vsel %vm1312_vm6, %v1307_v7, 0.0 }
 0x287   :  { %v1328_v54 = vadd.f32 %v1320_v35, %v1277_v59  ;;  %v1775_v59 = vsel %vm5314_vm2, %v4903_v10, 0.0  ;;  %v1877_v10 = vsel %vm1870_vm15, %v1863_v23, 0.0 }
 0x288   :  { %v1356_v2 = vpop.xlane.xlu0 %1355 }
 0x289   :  { %v1586_v46 = vpop.xlane.xlu1 %1585  ;;  %v1370_v43 = vsel %vm1363_vm7, %v1356_v2, 0.0 }
 0x28a   :  { %v1378_v11 = vadd.f32 %v1370_v43, %v1327_v37  ;;  %v1599_v31 = vsel %vm1591_vm12, %v1586_v46, 0.0  ;;  %v1776_v43 = vsel %vm5314_vm2, %v4956_v16, 0.0  ;;  %vm5319_vm2 = vcmp.eq.s32.totalorder %v4140_v19, 15 }
 0x28c   :  { %v1635_v45 = vpop.xlane.xlu0 %1634 }
 0x28d   :  { %v1865_v6 = vpop.xlane.xlu1 %1864  ;;  %v1649_v56 = vsel %vm5272_vm13, %v1635_v45, 0.0 }
 0x28e   :  { %v1878_v16 = vsel %vm1870_vm15, %v1865_v6, 0.0 }
 0x290   :  { %v1914_v61 = vpop.xlane.xlu0 %1913 }
 0x291   :  { %v4990_v32 = vpop.xlane.xlu1 %2141  ;;  %v1928_v49 = vsel %vm5316_vm3, %v1914_v61, 0.0  ;;  %v2054_v61 = vsel %vm5319_vm2, %v4969_v25, 0.0 }
 0x292   :  { %v2156_v25 = vsel %vm2149_vm11, %v4990_v32, 0.0 }
 0x294   :  { %v1916_v8 = vpop.xlane.xlu0 %1915 }
 0x295   :  { %v1358_v34 = vpop.xlane.xlu1 %1357 }
 0x296   :  { %v1371_v15 = vsel %vm1363_vm7, %v1358_v34, 0.0 }
 0x297   :  { %v1379_v50 = vadd.f32 %v1371_v15, %v1328_v54 }
 0x298   :  { %v4994_v51 = vpop.xlane.xlu0 %2194 }
 0x299   :  { %v1637_v0 = vpop.xlane.xlu1 %1636 }
 0x29a   :  { %v1650_v48 = vsel %vm5272_vm13, %v1637_v0, 0.0  ;;  %vm5318_vm13 = vcmp.eq.s32.totalorder %v4140_v19, 14 }
 0x29c   :  { %v1407_v57 = vpop.xlane.xlu0 %1406 }
 0x29d   :  { %v4996_v40 = vpop.xlane.xlu1 %2192  ;;  %v1421_v53 = vsel %vm1414_vm8, %v1407_v57, 0.0 }
 0x29e   :  { %v1429_v17 = vadd.f32 %v1421_v53, %v1378_v11 }
 0x2a0   :  { %v1504_v4 = vadd.f32 %v1496_v13, %v1429_v17  ;;  %v1686_v55 = vpop.xlane.xlu0 %1685 }
 0x2a1   :  { %v1409_v3 = vpop.xlane.xlu1 %1408  ;;  %v1700_v5 = vsel %vm5313_vm0, %v1686_v55, 0.0  ;;  %v2105_v55 = vsel %vm2098_vm14, %v4982_v18, 0.0  ;;  %v2207_v18 = vsel %vm2200_vm1, %v4996_v40, 0.0  ;;  %v2208_v40 = vsel %vm2200_vm1, %v4994_v51, 0.0 }
 0x2a2   :  { %v1422_v36 = vsel %vm1414_vm8, %v1409_v3, 0.0  ;;  %v1555_v58 = vadd.f32 %v1547_v30, %v1504_v4 }
 0x2a3   :  { %v1430_v63 = vadd.f32 %v1422_v36, %v1379_v50 }
 0x2a4   :  { %v1606_v22 = vadd.f32 %v1598_v47, %v1555_v58  ;;  %v1967_v26 = vpop.xlane.xlu0 %1966 }
 0x2a5   :  { %v1505_v29 = vadd.f32 %v1497_v52, %v1430_v63  ;;  %v1688_v62 = vpop.xlane.xlu1 %1687  ;;  %v1980_v36 = vsel %vm5318_vm13, %v1967_v26, 0.0  ;;  %v2106_v26 = vsel %vm2098_vm14, %v4972_v1, 0.0 }
 0x2a6   :  { %v1657_v39 = vadd.f32 %v1649_v56, %v1606_v22  ;;  %v1701_v7 = vsel %vm5313_vm0, %v1688_v62, 0.0  ;;  %vm5317_vm0 = vcmp.eq.s32.totalorder %v4140_v19, 11 }
 0x2a7   :  { %v1556_v42 = vadd.f32 %v1548_v41, %v1505_v29  ;;  %v1827_v34 = vsel %vm5317_vm0, %v4980_v9, 0.0  ;;  %v1929_v9 = vsel %vm5316_vm3, %v1916_v8, 0.0  ;;  %vm5320_vm0 = vmmov %vm5319_vm2 }
 0x2a8   :  { %v1708_v27 = vadd.f32 %v1700_v5, %v1657_v39  ;;  %v5021_v20 = vpop.xlane.xlu0 %1206  ;;  %v2055_v8 = vsel %vm5320_vm0, %v4918_v24, 0.0  ;;  %v2157_v24 = vsel %vm2149_vm11, %v4984_v28, 0.0 }
 0x2a9   :  { %v1607_v21 = vadd.f32 %v1599_v31, %v1556_v42  ;;  %v1965_v60 = vpop.xlane.xlu1 %1964 }
 0x2aa   :  { %v1783_v37 = vadd.f32 %v1775_v59, %v1708_v27  ;;  %v1979_v0 = vsel %vm5318_vm13, %v1965_v60, 0.0 }
 0x2ab   :  { %v1658_v12 = vadd.f32 %v1650_v48, %v1607_v21 }
 0x2ac   :  { %v1834_v35 = vadd.f32 %v1826_v33, %v1783_v37  ;;  %v5033_v54 = vpop.xlane.xlu0 %1485 }
 0x2ad   :  { %v1709_v2 = vadd.f32 %v1701_v7, %v1658_v12  ;;  %v5037_v46 = vpop.xlane.xlu1 %1208 }
 0x2ae   :  { %v1885_v11 = vadd.f32 %v1877_v10, %v1834_v35 }
 0x2af   :  { %v1784_v45 = vadd.f32 %v1776_v43, %v1709_v2  ;;  %v1219_v2 = vsel %vm1210_vm5, %v5021_v20, 0.0 }
 0x2b0   :  { %v1936_v15 = vadd.f32 %v1928_v49, %v1885_v11  ;;  %v5047_v50 = vpop.xlane.xlu0 %1764 }
 0x2b1   :  { %v1835_v23 = vadd.f32 %v1827_v34, %v1784_v45  ;;  %v5051_v57 = vpop.xlane.xlu1 %1487 }
 0x2b2   :  { %v1987_v53 = vadd.f32 %v1979_v0, %v1936_v15  ;;  %v1220_v0 = vsel %vm1210_vm5, %v5037_v46, 0.0  ;;  %vm5322_vm5 = vcmp.eq.s32.totalorder %v4140_v19, 9 }
 0x2b3   :  { %v1886_v17 = vadd.f32 %v1878_v16, %v1835_v23 }
 0x2b4   :  { %v2062_v13 = vadd.f32 %v2054_v61, %v1987_v53  ;;  %v5060_v4 = vpop.xlane.xlu0 %2043 }
 0x2b5   :  { %v1937_v30 = vadd.f32 %v1929_v9, %v1886_v17  ;;  %v5065_v3 = vpop.xlane.xlu1 %1766 }
 0x2b6   :  { %v2113_v6 = vadd.f32 %v2105_v55, %v2062_v13 }
 0x2b7   :  { %v1988_v58 = vadd.f32 %v1980_v36, %v1937_v30  ;;  %v1498_v30 = vsel %vm1489_vm9, %v5033_v54, 0.0  ;;  %v1499_v54 = vsel %vm1489_vm9, %v5051_v57, 0.0  ;;  %vm5326_vm9 = vcmp.eq.s32.totalorder %v4140_v19, 11 }
 0x2b8   :  { %v1258_v47 = vpop.xlane.xlu0 %1257  ;;  %v2164_v63 = vadd.f32 %v2156_v25, %v2113_v6  ;;  %vm5329_vm2 = vmmov %vm5326_vm9 }
 0x2b9   :  { %v2063_v52 = vadd.f32 %v2055_v8, %v1988_v58  ;;  %v5078_v22 = vpop.xlane.xlu1 %2045  ;;  %v1270_v35 = vsel %vm1261_vm4, %v1258_v47, 0.0 }
 0x2ba   :  { %v5083_v56 = vadd.f32 %v2207_v18, %v2164_v63  ;;  %v1278_v11 = vadd.f32 %v1270_v35, %v1219_v2 }
 0x2bb   :  { %v2114_v32 = vadd.f32 %v2106_v26, %v2063_v52 }
 0x2bc   :  { %v1537_v29 = vpop.xlane.xlu0 %1536 }
 0x2bd   :  { %v1260_v62 = vpop.xlane.xlu1 %1259  ;;  %v2165_v41 = vadd.f32 %v2157_v24, %v2114_v32  ;;  %v1549_v25 = vsel %vm1540_vm10, %v1537_v29, 0.0 }
 0x2be   :  { %v1271_v15 = vsel %vm1261_vm4, %v1260_v62, 0.0  ;;  %vm5321_vm4 = vcmp.eq.s32.totalorder %v4140_v19, 8 }
 0x2bf   :  { %v5091_v39 = vadd.f32 %v2208_v40, %v2165_v41  ;;  %v1279_v61 = vadd.f32 %v1271_v15, %v1220_v0 }
 0x2c0   :  { %v5093_v42 = vpop.xlane.xlu0 %1815 }
 0x2c1   :  { %v1539_v5 = vpop.xlane.xlu1 %1538 }
 0x2c2   :  { %v1550_v41 = vsel %vm1540_vm10, %v1539_v5, 0.0  ;;  %vm5327_vm10 = vmmov %vm5322_vm5 }
 0x2c4   :  { %v5095_v1 = vpop.xlane.xlu0 %2094 }
 0x2c5   :  { %v5097_v31 = vpop.xlane.xlu1 %1817 }
 0x2c8   :  { %v1309_v27 = vpop.xlane.xlu0 %1308 }
 0x2c9   :  { %v5099_v59 = vpop.xlane.xlu1 %2096  ;;  %v1321_v43 = vsel %vm1312_vm6, %v1309_v27, 0.0 }
 0x2ca   :  { %v1329_v23 = vadd.f32 %v1321_v43, %v1278_v11 }
 0x2cc   :  { %v1588_v28 = vpop.xlane.xlu0 %1587 }
 0x2cd   :  { %v1311_v21 = vpop.xlane.xlu1 %1310  ;;  %v1600_v18 = vsel %vm1591_vm12, %v1588_v28, 0.0 }
 0x2ce   :  { %v1322_v20 = vsel %vm1312_vm6, %v1311_v21, 0.0  ;;  %vm5323_vm6 = vcmp.eq.s32.totalorder %v4140_v19, 10 }
 0x2cf   :  { %v1330_v6 = vadd.f32 %v1322_v20, %v1279_v61  ;;  %v1777_v35 = vsel %vm5323_vm6, %v5047_v50, 0.0  ;;  %v1829_v61 = vsel %vm5329_vm2, %v5097_v31, 0.0 }
 0x2d0   :  { %v5101_v60 = vpop.xlane.xlu0 %1866 }
 0x2d1   :  { %v1590_v48 = vpop.xlane.xlu1 %1589 }
 0x2d2   :  { %v1601_v21 = vsel %vm1591_vm12, %v1590_v48, 0.0  ;;  %v1828_v48 = vsel %vm5326_vm9, %v5093_v42, 0.0  ;;  %vm5328_vm12 = vmmov %vm5323_vm6  ;;  %vm5333_vm6 = vcmp.eq.s32.totalorder %v4140_v19, 19 }
 0x2d4   :  { %v5103_v37 = vpop.xlane.xlu0 %2145 }
 0x2d5   :  { %v5105_v51 = vpop.xlane.xlu1 %1868 }
 0x2d8   :  { %v1360_v33 = vpop.xlane.xlu0 %1359 }
 0x2d9   :  { %v5107_v12 = vpop.xlane.xlu1 %2147  ;;  %v1372_v45 = vsel %vm1363_vm7, %v1360_v33, 0.0 }
 0x2da   :  { %v1380_v16 = vadd.f32 %v1372_v45, %v1329_v23 }
 0x2dc   :  { %v1639_v7 = vpop.xlane.xlu0 %1638 }
 0x2dd   :  { %v1362_v10 = vpop.xlane.xlu1 %1361  ;;  %v1651_v24 = vsel %vm5321_vm4, %v1639_v7, 0.0 }
 0x2de   :  { %v1373_v13 = vsel %vm1363_vm7, %v1362_v10, 0.0  ;;  %vm5324_vm7 = vcmp.eq.s32.totalorder %v4140_v19, 20 }
 0x2df   :  { %v1381_v58 = vadd.f32 %v1373_v13, %v1330_v6  ;;  %vm5330_vm0 = vmmov %vm5324_vm7 }
 0x2e0   :  { %v1918_v49 = vpop.xlane.xlu0 %1917  ;;  %vm5340_vm2 = vmmov %vm5330_vm0 }
 0x2e1   :  { %v1641_v34 = vpop.xlane.xlu1 %1640 }
 0x2e4   :  { %v1411_v53 = vpop.xlane.xlu0 %1410 }
 0x2e5   :  { %v1920_v17 = vpop.xlane.xlu1 %1919  ;;  %v1423_v9 = vsel %vm1414_vm8, %v1411_v53, 0.0 }
 0x2e6   :  { %v1431_v55 = vadd.f32 %v1423_v9, %v1380_v16  ;;  %v1930_v9 = vsel %vm5316_vm3, %v1918_v49, 0.0 }
 0x2e8   :  { %v1506_v46 = vadd.f32 %v1498_v30, %v1431_v55  ;;  %v5132_v36 = vpop.xlane.xlu0 %2196 }
 0x2e9   :  { %v1413_v8 = vpop.xlane.xlu1 %1412 }
 0x2ea   :  { %v1424_v47 = vsel %vm1414_vm8, %v1413_v8, 0.0  ;;  %v1557_v63 = vadd.f32 %v1549_v25, %v1506_v46  ;;  %vm5325_vm8 = vmmov %vm5321_vm4  ;;  %vm5331_vm4 = vcmp.eq.s32.totalorder %v4140_v19, 15 }
 0x2eb   :  { %v1432_v52 = vadd.f32 %v1424_v47, %v1381_v58  ;;  %v1652_v5 = vsel %vm5325_vm8, %v1641_v34, 0.0  ;;  %v1778_v34 = vsel %vm5328_vm12, %v5065_v3, 0.0  ;;  %v2056_v8 = vsel %vm5331_vm4, %v5060_v4, 0.0  ;;  %vm5336_vm8 = vmmov %vm5333_vm6 }
 0x2ec   :  { %v1608_v26 = vadd.f32 %v1600_v18, %v1557_v63  ;;  %v1690_v32 = vpop.xlane.xlu0 %1689  ;;  %vm5339_vm12 = vmmov %vm5330_vm0 }
 0x2ed   :  { %v1507_v29 = vadd.f32 %v1499_v54, %v1432_v52  ;;  %v2244_v62 = vpop.xlane.xlu1 %2243  ;;  %v1702_v28 = vsel %vm5322_vm5, %v1690_v32, 0.0  ;;  %vm5332_vm5 = vmmov %vm5316_vm3 }
 0x2ee   :  { %v1659_v40 = vadd.f32 %v1651_v24, %v1608_v26  ;;  %v1931_v47 = vsel %vm5332_vm5, %v1920_v17, 0.0  ;;  %v2258_v18 = vsel %vm5333_vm6, %v2244_v62, 0.0  ;;  %v2107_v17 = vsel %vm2098_vm14, %v5095_v1, 0.0 }
 0x2ef   :  { %v1558_v27 = vadd.f32 %v1550_v41, %v1507_v29  ;;  %v2158_v41 = vsel %vm2149_vm11, %v5103_v37, 0.0 }
 0x2f0   :  { %v1710_v33 = vadd.f32 %v1702_v28, %v1659_v40  ;;  %v2315_v57 = vpop.xlane.xlu0 %2314  ;;  %v2266_v40 = vadd.f32 %v2258_v18, %v5083_v56 }
 0x2f1   :  { %v1609_v7 = vadd.f32 %v1601_v21, %v1558_v27  ;;  %v1692_v10 = vpop.xlane.xlu1 %1691  ;;  %v2331_v2 = vsel %vm5324_vm7, %v2315_v57, 0.0  ;;  %vm5335_vm7 = vmmov %vm5331_vm4  ;;  %vm2477_vm4 = vcmask 1043459  }
 0x2f2   :  { %v1785_v43 = vadd.f32 %v1777_v35, %v1710_v33  ;;  %v2339_v11 = vadd.f32 %v2331_v2, %v4952_v14  ;;  %v1703_v15 = vsel %vm5327_vm10, %v1692_v10, 0.0  ;;  %v1879_v14 = vsel %vm1870_vm15, %v5101_v60, 0.0  ;;  %vm5337_vm10 = vmmov %vm5330_vm0 }
 0x2f3   :  { %v1660_v45 = vadd.f32 %v1652_v5, %v1609_v7  ;;  %v1880_v60 = vsel %vm1870_vm15, %v5105_v51, 0.0  ;;  %vm5334_vm15 = vmmov %vm5318_vm13  ;;  %v2057_v4 = vsel %vm5335_vm7, %v5078_v22, 0.0  ;;  %v2108_v7 = vsel %vm2098_vm14, %v5099_v59, 0.0 }
 0x2f4   :  { %v1836_v50 = vadd.f32 %v1828_v48, %v1785_v43  ;;  %v2363_v23 = vadd.f32 1.0, %v2339_v11  ;;  %v2246_v0 = vpop.xlane.xlu0 %2245  ;;  %v2366_v30 = vmul.f32 -0.5, %v2339_v11  ;;  %v2209_v10 = vsel %vm2200_vm1, %v5132_v36, 0.0  ;;  %vm5338_vm14 = vmmov %vm5333_vm6 }
 0x2f5   :  { %v1711_v20 = vadd.f32 %v1703_v15, %v1660_v45  ;;  %v5164_v16 = vpop.xlane.xlu1 %2198  ;;  %v2259_v27 = vsel %vm5336_vm8, %v2246_v0, 0.0  ;;  %vm2479_vm7 = vcmask 1044484   ;;  %vm2481_vm8 = vcmask 1045509  }
 0x2f6   :  { %3455 = vlog2.f32 %v2363_v23  ;;  %v1887_v53 = vadd.f32 %v1879_v14, %v1836_v50  ;;  %v2367_v51 = vadd.f32 1.0, %v2366_v30  ;;  %v2267_v45 = vadd.f32 %v2259_v27, %v5091_v39 }
 0x2f7   :  { %v1786_v42 = vadd.f32 %v1778_v34, %v1711_v20  ;;  %v2210_v39 = vsel %vm2200_vm1, %v5164_v16, 0.0  ;;  %vm5342_vm1 = vmmov %vm5330_vm0 }
 0x2f8   :  { %v1969_v13 = vpop.xlane.xlu0 %1968  ;;  %v1938_v46 = vadd.f32 %v1930_v9, %v1887_v53  ;;  %v2368_v22 = vmul.f32 %v2367_v51, %v2339_v11 }
 0x2f9   :  { %v1837_v55 = vadd.f32 %v1829_v61, %v1786_v42  ;;  %v2317_v6 = vpop.xlane.xlu1 %2316  ;;  %v1981_v3 = vsel %vm5318_vm13, %v1969_v13, 0.0  ;;  %vm2475_vm13 = vcmask 1042434  }
 0x2fa   :  { %v2332_v25 = vsel %vm5330_vm0, %v2317_v6, 0.0  ;;  %v1989_v49 = vadd.f32 %v1981_v3, %v1938_v46 }
 0x2fb   :  { %v5185_v31 = vadd.f32 %v2332_v25, %v4967_v44  ;;  %v1888_v58 = vadd.f32 %v1880_v60, %v1837_v55  ;;  %v2369_v44 = vand.u32 2147483647, %v2339_v11  ;;  %v2159_v11 = vsel %vm2149_vm11, %v5107_v12, 0.0  ;;  %vm5341_vm11 = vmmov %vm5333_vm6 }
 0x2fc   :  { %v2248_v63 = vpop.xlane.xlu0 %2247  ;;  %v2064_v24 = vadd.f32 %v2056_v8, %v1989_v49 }
 0x2fd   :  { %v2372_v52 = vadd.f32 1.0, %v5185_v31  ;;  %v1939_v54 = vadd.f32 %v1931_v47, %v1888_v58  ;;  %v1971_v26 = vpop.xlane.xlu1 %1970  ;;  %v2375_v57 = vmul.f32 -0.5, %v5185_v31  ;;  %vm2370_vm9 = vcmp.lt.f32.partialorder %v2369_v44, 0.0004427343 }
 0x2fe   :  { %v1982_v32 = vsel %vm5334_vm15, %v1971_v26, 0.0  ;;  %v2115_v28 = vadd.f32 %v2107_v17, %v2064_v24  ;;  %v2260_v0 = vsel %vm5338_vm14, %v2248_v63, 0.0  ;;  %v2378_v53 = vand.u32 2147483647, %v5185_v31 }
 0x2ff   :  { %3457 = vlog2.f32 %v2372_v52  ;;  %v1990_v29 = vadd.f32 %v1982_v32, %v1939_v54  ;;  %v2376_v50 = vadd.f32 1.0, %v2375_v57 }
 0x300   :  { %v3456_v62 = vpop.eup %3455  ;;  %v2250_v21 = vpop.xlane.xlu0 %2249  ;;  %v2166_v56 = vadd.f32 %v2158_v41, %v2115_v28  ;;  %vm2379_vm3 = vcmp.lt.f32.partialorder %v2378_v53, 0.0004427343 }
 0x301   :  { %v2365_v33 = vmul.f32 0.6931472, %v3456_v62  ;;  %v2065_v35 = vadd.f32 %v2057_v4, %v1990_v29  ;;  %v2319_v1 = vpop.xlane.xlu1 %2318  ;;  %v2377_v6 = vmul.f32 %v2376_v50, %v5185_v31  ;;  %v2261_v60 = vsel %vm5341_vm11, %v2250_v21, 0.0 }
 0x302   :  { %v2333_v37 = vsel %vm5337_vm10, %v2319_v1, 0.0  ;;  %v2217_v59 = vadd.f32 %v2209_v10, %v2166_v56  ;;  %vm2485_vm10 = vcmask 1047559  }
 0x303   :  { %v2371_v2 = vsel %vm2370_vm9, %v2368_v22, %v2365_v33  ;;  %v2116_v5 = vadd.f32 %v2108_v7, %v2065_v35  ;;  %v2341_v43 = vadd.f32 %v2333_v37, %v2266_v40  ;;  %vm2483_vm9 = vcmask 1046534  }
 0x304   :  { %v2429_v48 = vrot.slane %v2371_v2, 4  ;;  %v2323_v15 = vpop.xlane.xlu0 %2322  ;;  %v2268_v14 = vadd.f32 %v2260_v0, %v2217_v59 }
 0x305   :  { %v2381_v23 = vadd.f32 1.0, %v2341_v43  ;;  %v2321_v20 = vpop.xlane.xlu1 %2320  ;;  %v2167_v34 = vadd.f32 %v2159_v11, %v2116_v5  ;;  %v2335_v12 = vsel %vm5340_vm2, %v2323_v15, 0.0  ;;  %v2384_v46 = vmul.f32 -0.5, %v2341_v43 }
 0x306   :  { %v2430_v36 = vadd.f32 %v2429_v48, %v2371_v2  ;;  %v2334_v42 = vsel %vm5339_vm12, %v2321_v20, 0.0  ;;  %v2343_v55 = vadd.f32 %v2335_v12, %v2268_v14  ;;  %v2387_v24 = vand.u32 2147483647, %v2341_v43 }
 0x307   :  { %3459 = vlog2.f32 %v2381_v23  ;;  %v2342_v61 = vadd.f32 %v2334_v42, %v2267_v45  ;;  %v2218_v13 = vadd.f32 %v2210_v39, %v2167_v34  ;;  %v2385_v54 = vadd.f32 1.0, %v2384_v46 }
 0x308   :  { %v2431_v9 = vrot.slane %v2430_v36, 2  ;;  %v2399_v47 = vadd.f32 1.0, %v2343_v55  ;;  %v2402_v4 = vmul.f32 -0.5, %v2343_v55  ;;  %vm2388_vm0 = vcmp.lt.f32.partialorder %v2387_v24, 0.0004427343 }
 0x309   :  { %v3458_v30 = vpop.eup %3457  ;;  %v2390_v3 = vadd.f32 1.0, %v2342_v61  ;;  %v2325_v25 = vpop.xlane.xlu1 %2324  ;;  %v2269_v8 = vadd.f32 %v2261_v60, %v2218_v13  ;;  %v2393_v26 = vmul.f32 -0.5, %v2342_v61  ;;  %v2386_v41 = vmul.f32 %v2385_v54, %v2341_v43 }
 0x30a   :  { %v2432_v58 = vadd.f32 %v2431_v9, %v2430_v36  ;;  %v2374_v49 = vmul.f32 0.6931472, %v3458_v30  ;;  %v2336_v16 = vsel %vm5342_vm1, %v2325_v25, 0.0  ;;  %v2396_v21 = vand.u32 2147483647, %v2342_v61 }
 0x30b   :  { %3461 = vlog2.f32 %v2390_v3  ;;  %v2344_v51 = vadd.f32 %v2336_v16, %v2269_v8  ;;  %v2394_v40 = vadd.f32 1.0, %v2393_v26  ;;  %v2403_v22 = vadd.f32 1.0, %v2402_v4 }
 0x30c   :  { %v2433_v63 = vrot.slane %v2432_v58, 1  ;;  %v2380_v18 = vsel %vm2379_vm3, %v2377_v6, %v2374_v49  ;;  %3463 = vlog2.f32 %v2399_v47  ;;  %v2405_v7 = vand.u32 2147483647, %v2343_v55 }
 0x30d   :  { %v2435_v52 = vrot.slane %v2380_v18, 4  ;;  %v2408_v44 = vadd.f32 1.0, %v2344_v51  ;;  %v2411_v27 = vmul.f32 -0.5, %v2344_v51  ;;  %v2395_v56 = vmul.f32 %v2394_v40, %v2342_v61 }
 0x30e   :  { %v2434_v31 = vadd.f32 %v2433_v63, %v2432_v58  ;;  %vm2397_vm5 = vcmp.lt.f32.partialorder %v2396_v21, 0.0004427343  ;;  %v2414_v11 = vand.u32 2147483647, %v2344_v51  ;;  %v2404_v45 = vmul.f32 %v2403_v22, %v2343_v55 }
 0x30f   :  { %v2436_v32 = vadd.f32 %v2435_v52, %v2380_v18  ;;  %3465 = vlog2.f32 %v2408_v44  ;;  %v2412_v10 = vadd.f32 1.0, %v2411_v27  ;;  %vm2406_vm6 = vcmp.lt.f32.partialorder %v2405_v7, 0.0004427343 }
 0x310   :  { %v2476_v19 = vsel %vm2475_vm13, %v2434_v31, %v4811_v38  ;;  %vm2415_vm15 = vcmp.lt.f32.partialorder %v2414_v11, 0.0004427343 }
 0x311   :  { %v3460_v17 = vpop.eup %3459  ;;  %v2437_v29 = vrot.slane %v2436_v32, 2  ;;  %v2413_v0 = vmul.f32 %v2412_v10, %v2344_v51 }
 0x312   :  { %v2383_v62 = vmul.f32 0.6931472, %v3460_v17 }
 0x313   :  { %v2438_v28 = vadd.f32 %v2437_v29, %v2436_v32 }
 0x314   :  { %v2389_v33 = vsel %vm2388_vm0, %v2386_v41, %v2383_v62 }
 0x315   :  { %v3462_v57 = vpop.eup %3461  ;;  %v2439_v35 = vrot.slane %v2438_v28, 1  ;;  %v2441_v1 = vrot.slane %v2389_v33, 4 }
 0x316   :  { %v2392_v37 = vmul.f32 0.6931472, %v3462_v57  ;;  %v3464_v38 = vpop.eup %3463 }
 0x317   :  { %v2442_v2 = vadd.f32 %v2441_v1, %v2389_v33  ;;  %v2440_v5 = vadd.f32 %v2439_v35, %v2438_v28  ;;  %v2401_v48 = vmul.f32 0.6931472, %v3464_v38 }
 0x318   :  { %v2398_v43 = vsel %vm2397_vm5, %v2395_v56, %v2392_v37 }
 0x319   :  { %v2443_v59 = vrot.slane %v2442_v2, 2  ;;  %v2447_v15 = vrot.slane %v2398_v43, 4  ;;  %v2478_v50 = vsel %vm2477_vm4, %v2440_v5, %v2476_v19  ;;  %v3466_v23 = vpop.eup %3465  ;;  %v2407_v20 = vsel %vm2406_vm6, %v2404_v45, %v2401_v48 }
 0x31a   :  { %v2410_v36 = vmul.f32 0.6931472, %v3466_v23  ;;  %v2453_v14 = vrot.slane %v2407_v20, 4 }
 0x31b   :  { %v2448_v34 = vadd.f32 %v2447_v15, %v2398_v43  ;;  %v2444_v42 = vadd.f32 %v2443_v59, %v2442_v2 }
 0x31c   :  { %v2416_v12 = vsel %vm2415_vm15, %v2413_v0, %v2410_v36  ;;  %v2454_v61 = vadd.f32 %v2453_v14, %v2407_v20 }
 0x31d   :  { %v2445_v39 = vrot.slane %v2444_v42, 1  ;;  %v2449_v53 = vrot.slane %v2448_v34, 2  ;;  %v2459_v9 = vrot.slane %v2416_v12, 4 }
 0x31e   :  { %v2455_v30 = vrot.slane %v2454_v61, 2 }
 0x31f   :  { %v2446_v13 = vadd.f32 %v2445_v39, %v2444_v42  ;;  %v2450_v55 = vadd.f32 %v2449_v53, %v2448_v34  ;;  %v2460_v6 = vadd.f32 %v2459_v9, %v2416_v12 }
 0x320   :  { %v2456_v3 = vadd.f32 %v2455_v30, %v2454_v61 }
 0x321   :  { %v2451_v46 = vrot.slane %v2450_v55, 1  ;;  %v2480_v60 = vsel %vm2479_vm7, %v2446_v13, %v2478_v50  ;;  %v2461_v25 = vrot.slane %v2460_v6, 2 }
 0x322   :  { %v2457_v49 = vrot.slane %v2456_v3, 1 }
 0x323   :  { %v2452_v58 = vadd.f32 %v2451_v46, %v2450_v55  ;;  %v2462_v8 = vadd.f32 %v2461_v25, %v2460_v6 }
 0x324   :  { %v2458_v16 = vadd.f32 %v2457_v49, %v2456_v3 }
 0x325   :  { %v2482_v47 = vsel %vm2481_vm8, %v2452_v58, %v2480_v60  ;;  %v2463_v63 = vrot.slane %v2462_v8, 1 }
 0x326   :  { %v2484_v18 = vsel %vm2483_vm9, %v2458_v16, %v2482_v47 }
 0x327   :  { %v2464_v51 = vadd.f32 %v2463_v63, %v2462_v8 }
 0x329   :  { %v2486_v52 = vsel %vm2485_vm10, %v2464_v51, %v2484_v18 }
 0x32a   :  { %2488 = vst [vmem:[#allocation2] sm:$0xff] %v2486_v52 }
 0x32b   :  { %3478 = shalt.err (!%p3475_p4)
}
 0x32c   :  { %s3479_s4 = scalar_lea.hbm %s5252_s2, 128 }
 0x32d   :  { %p3480_p5 = scmp.ne.s32.totalorder %s5252_s2, %s3479_s4  ;;  %p3483_p6 = scmp.lt.u32.totalorder %s3479_s4, %s5252_s2 }
 0x32f   :  { %p3485_p7 = pnand %p3483_p6, %p3480_p5 }
 0x331   :  { %3488 = shalt.err (!%p3485_p7)
}
 0x332   :  { %2498 = dma.vmem_to_hbm [thread:$0]  %s2496_s1, 128, %s5252_s2, [#allocation3]  }
 0x333   :  { %3489 = dma.done.wait [#allocation3], 128  }
 0x334   :  { %3490 = vsyncadd [#allocation3], 4294967168 }
 0x335   :  { %2502 = vsyncpa [#allocation3], 1 }

</bundles_post_ra>
